<compile_context>
chip_gen: v6e
topology: v6e:2x2x1
jax: 0.10.0
libtpu: 0.0.40
codegen_flags: <defaults>
</compile_context>

<pallas_src>
import functools

import jax
import jax.numpy as jnp
from jax.experimental import pallas as pl
from jax.experimental.pallas import tpu as pltpu

EPS = 1e-5          # nn.BatchNorm2d default eps
LANE = 128          # TPU lane width


def _round_up(x, m):
    return (x + m - 1) // m * m


def _pick_row_tile(ho, wo, max_rows=1024):
    """Largest divisor `th` of `ho` with th*wo <= max_rows; th=1 when wo % 8 != 0."""
    if wo % 8 != 0:
        return 1
    best = 1
    for t in range(1, ho + 1):
        if ho % t == 0 and t * wo <= max_rows:
            best = t
    return best


# ----------------------------------------------------------------------------
# Pallas kernels
# ----------------------------------------------------------------------------
def _make_conv_stats_kernel(kh, kw, pad, th, hi, wi, wo, cin):
    """Pass 1: stride-1 conv ('same' if pad>0 else VALID) + per-tile channel stats.

    Weights are packed (kh, kw*cin, Fp).  When cin % 128 == 0 the kw column taps are
    folded into the contraction (one MXU dot per ky); otherwise per-tap dots are used
    (tiny first-layer convs).  Writes bf16 y and (tile_sum, centered sum of squares).
    """
    fold = (cin % LANE == 0) and kw > 1
    n_rows = th * wo

    def _flatten(opnd):
        k = opnd.shape[-1]
        if th == 1:
            return opnd.reshape(wo, k)
        if wo % 16 == 0:                       # bf16 sublane tile -> pure layout no-op
            return opnd.reshape(n_rows, k)
        # wo % 8 == 0 by _pick_row_tile: f32 round-trip makes the (th, wo) collapse a
        # layout no-op (f32 sublane tile = 8); exact for bf16 data.  Once per ky only.
        return opnd.astype(jnp.float32).reshape(n_rows, k).astype(jnp.bfloat16)

    def kernel(x_ref, w_ref, y_ref, stats_ref, *scratch):
        ht = pl.program_id(1)
        row0 = ht * th

        if pad > 0:
            # Build the zero halo in VMEM (no HBM pad copy).  All stores are at
            # leading-dim offsets (aligned); W halo comes from a sublane concat.
            (xpad_ref,) = scratch
            wp = wi + 2 * pad
            zrow = jnp.zeros((pad, wp, cin), jnp.bfloat16)
            zcol = jnp.zeros((hi, pad, cin), jnp.bfloat16)
            xpad_ref[pl.ds(0, pad), :, :] = zrow
            xpad_ref[pl.ds(pad, hi), :, :] = jnp.concatenate(
                [zcol, x_ref[0], zcol], axis=1)
            xpad_ref[pl.ds(pad + hi, pad), :, :] = zrow

        def window(ky, kx):
            if pad > 0:
                return xpad_ref[pl.ds(row0 + ky, th), pl.ds(kx, wo), :]
            return x_ref[0, pl.ds(row0 + ky, th), pl.ds(kx, wo), :]

        acc = None
        for ky in range(kh):                       # static unroll over kernel rows
            if fold:
                opnd = jnp.concatenate([window(ky, kx) for kx in range(kw)], axis=-1)
                d = jnp.dot(_flatten(opnd), w_ref[ky],
                            preferred_element_type=jnp.float32)
                acc = d if acc is None else acc + d
            else:
                for kx in range(kw):
                    rows = _flatten(window(ky, kx))
                    wk = w_ref[ky, pl.ds(kx * cin, cin), :]
                    d = jnp.dot(rows, wk, preferred_element_type=jnp.float32)
                    acc = d if acc is None else acc + d

        fp = acc.shape[-1]
        y_ref[...] = acc.reshape(1, th, wo, fp).astype(y_ref.dtype)   # bf16 writeback

        # Streaming BatchNorm statistics: per-tile sum and *mean-centered* sum of
        # squares (two-level / Welford-style combine in the wrapper -> no E[y^2]-m^2
        # catastrophic cancellation).
        tsum = jnp.sum(acc, axis=0, keepdims=True)                    # (1, Fp)
        centered = acc - tsum * (1.0 / n_rows)
        css = jnp.sum(centered * centered, axis=0, keepdims=True)     # (1, Fp)
        stats_ref[0, 0, pl.ds(0, 1), :] = tsum
        stats_ref[0, 0, pl.ds(1, 1), :] = css

    return kernel


def _make_bn_act_kernel(add_residual, apply_relu):
    """Pass 2: y*a + c (folded BN affine) [+ residual] [+ ReLU], bf16 lane-dense out."""
    def kernel(y_ref, a_ref, c_ref, *rest):
        if add_residual:
            res_ref, o_ref = rest
        else:
            (o_ref,) = rest
        out = y_ref[...].astype(jnp.float32) * a_ref[...] + c_ref[...]
        if add_residual:
            out = out + res_ref[...].astype(jnp.float32)
        if apply_relu:
            out = jnp.maximum(out, 0.0)
        o_ref[...] = out.astype(o_ref.dtype)

    return kernel


# ----------------------------------------------------------------------------
# Fused conv + training-mode BatchNorm (+ residual) (+ ReLU)
# ----------------------------------------------------------------------------
def conv_bn_act(x, w_fold, kh, kw, pad, gamma, beta, residual=None, apply_relu=True):
    """Stride-1 conv ('same' if pad>0, VALID otherwise) + BN(train) + residual + ReLU.

    x:        (N, Hi, Wi, Cin)       bfloat16.
    w_fold:   (kh, kw*Cin, Fp)       bfloat16 packed filters (Fp multiple of 128).
    gamma/beta: (Fp,) float32 (zero in padded lanes).
    residual: (N, Ho, Wo, Fp) bfloat16 or None.
    Returns   (N, Ho, Wo, Fp) bfloat16.
    """
    N, Hi, Wi, Cin = x.shape
    kh_w, kfold, Fp = w_fold.shape
    assert kh_w == kh and kfold == kw * Cin and Fp % LANE == 0
    Ho = Hi + 2 * pad - kh + 1
    Wo = Wi + 2 * pad - kw + 1
    th = _pick_row_tile(Ho, Wo)
    assert Ho % th == 0
    n_ht = Ho // th
    M = N * Ho * Wo

    x_bytes = x.size * 2
    w_bytes = w_fold.size * 2
    y_bytes = M * Fp * 2                       # bf16 intermediate
    stats_bytes = N * n_ht * 2 * Fp * 4

    scratch = ([pltpu.VMEM((Hi + 2 * pad, Wi + 2 * pad, Cin), jnp.bfloat16)]
               if pad > 0 else [])

    # --- pass 1: tiled conv + per-tile channel stats ---------------------------------
    y, stats = pl.pallas_call(
        _make_conv_stats_kernel(kh, kw, pad, th, Hi, Wi, Wo, Cin),
        out_shape=(jax.ShapeDtypeStruct((N, Ho, Wo, Fp), jnp.bfloat16),
                   jax.ShapeDtypeStruct((N, n_ht, 2, Fp), jnp.float32)),
        grid=(N, n_ht),
        in_specs=[
            # full image stays VMEM-resident for a batch element; halo built in-kernel
            pl.BlockSpec((1, Hi, Wi, Cin), lambda n, h: (n, 0, 0, 0)),
            pl.BlockSpec((kh, kfold, Fp), lambda n, h: (0, 0, 0)),
        ],
        out_specs=(
            pl.BlockSpec((1, th, Wo, Fp), lambda n, h: (n, h, 0, 0)),
            pl.BlockSpec((1, 1, 2, Fp), lambda n, h: (n, h, 0, 0)),
        ),
        scratch_shapes=scratch,
        compiler_params=pltpu.CompilerParams(
            dimension_semantics=("parallel", "parallel")),
        cost_estimate=pl.CostEstimate(
            flops=2 * M * kh * kw * Cin * Fp,
            transcendentals=0,
            bytes_accessed=x_bytes + w_bytes + y_bytes + stats_bytes),
    )(x, w_fold)

    # --- global batch statistics (tiny (Fp,) work): two-level variance combine -------
    n_t = th * Wo
    tile_sum = stats[:, :, 0, :]                         # (N, n_ht, Fp)
    tile_css = stats[:, :, 1, :]
    total = jnp.sum(tile_sum, axis=(0, 1))
    mean = total / M
    tile_mean = tile_sum / n_t
    dm = tile_mean - mean[None, None, :]
    var = (jnp.sum(tile_css, axis=(0, 1)) + n_t * jnp.sum(dm * dm, axis=(0, 1))) / M
    var = jnp.maximum(var, 0.0)
    a = gamma * jax.lax.rsqrt(var + EPS)                 # folded scale
    c = beta - mean * a                                   # folded shift
    a4 = a.reshape(1, 1, 1, Fp)
    c4 = c.reshape(1, 1, 1, Fp)

    # --- pass 2: tiled normalize (+ residual) (+ ReLU) --------------------------------
    inputs = [y, a4, c4]
    in_specs = [
        pl.BlockSpec((1, th, Wo, Fp), lambda n, h: (n, h, 0, 0)),
        pl.BlockSpec((1, 1, 1, Fp), lambda n, h: (0, 0, 0, 0)),
        pl.BlockSpec((1, 1, 1, Fp), lambda n, h: (0, 0, 0, 0)),
    ]
    io_alias = {}
    if residual is not None:
        inputs.append(residual)
        in_specs.append(pl.BlockSpec((1, th, Wo, Fp), lambda n, h: (n, h, 0, 0)))
        io_alias = {3: 0}     # write the output into the residual's HBM buffer

    out = pl.pallas_call(
        _make_bn_act_kernel(residual is not None, apply_relu),
        out_shape=jax.ShapeDtypeStruct((N, Ho, Wo, Fp), jnp.bfloat16),
        grid=(N, n_ht),
        in_specs=in_specs,
        out_specs=pl.BlockSpec((1, th, Wo, Fp), lambda n, h: (n, h, 0, 0)),
        input_output_aliases=io_alias,
        compiler_params=pltpu.CompilerParams(
            dimension_semantics=("parallel", "parallel")),
        cost_estimate=pl.CostEstimate(
            flops=3 * M * Fp,
            transcendentals=0,
            bytes_accessed=y_bytes * (3 if residual is not None else 2)),
    )(*inputs)
    return out


# ----------------------------------------------------------------------------
# Parameter packing (done once, outside the hot path)
# ----------------------------------------------------------------------------
def _space_to_depth2(x):
    n, h, w, c = x.shape
    assert h % 2 == 0 and w % 2 == 0
    x = x.reshape(n, h // 2, 2, w // 2, 2, c)
    x = jnp.transpose(x, (0, 1, 3, 2, 4, 5))
    return x.reshape(n, h // 2, w // 2, 4 * c)


def _pack_conv_weight(w_oihw, cin_pad, f_pad):
    # (F, Cin, kh, kw) -> (kh, kw*cin_pad, f_pad)  bf16, zero-padded, kw folded into K
    f, cin, kh, kw = w_oihw.shape
    w = jnp.transpose(w_oihw, (2, 3, 1, 0))                         # (kh, kw, Cin, F)
    w = jnp.pad(w, ((0, 0), (0, 0), (0, cin_pad - cin), (0, f_pad - f)))
    return w.reshape(kh, kw * cin_pad, f_pad).astype(jnp.bfloat16)


def _pack_stride2_weight(w_oihw, f_pad):
    """k x k stride-2 conv == ((k+1)//2)^2 stride-1 conv on space-to-depth(2) input."""
    f, c, k, _ = w_oihw.shape
    assert k % 2 == 1
    k2 = (k + 1) // 2
    w = jnp.pad(w_oihw, ((0, 0), (0, 0), (0, 1), (0, 1)))           # (F, C, k+1, k+1)
    w = w.reshape(f, c, k2, 2, k2, 2)                               # (F, C, dy, p, dx, q)
    w = jnp.transpose(w, (2, 4, 3, 5, 1, 0))                        # (dy, dx, p, q, c, f)
    w = w.reshape(k2, k2 * 4 * c, f)                                # dx folded into K
    w = jnp.pad(w, ((0, 0), (0, 0), (0, f_pad - f)))
    return w.astype(jnp.bfloat16)


def _pad_vec(v, f_pad):
    return jnp.pad(v.astype(jnp.float32), (0, f_pad - v.shape[0]))


def pack_block_params(params, num_filters):
    fp = _round_up(max(num_filters, LANE), LANE)
    packed = []
    p = params[0]
    packed.append(dict(
        w1=_pack_stride2_weight(p["w1"], fp),
        w2=_pack_conv_weight(p["w2"], fp, fp),
        w_skip=_pack_conv_weight(p["w_skip"], p["w_skip"].shape[1], fp),
        g1=_pad_vec(p["g1"], fp), bt1=_pad_vec(p["bt1"], fp),
        g2=_pad_vec(p["g2"], fp), bt2=_pad_vec(p["bt2"], fp),
        g3=_pad_vec(p["g3"], fp), bt3=_pad_vec(p["bt3"], fp),
    ))
    for p in params[1:]:
        packed.append(dict(
            w1=_pack_conv_weight(p["w1"], fp, fp),
            w2=_pack_conv_weight(p["w2"], fp, fp),
            g1=_pad_vec(p["g1"], fp), bt1=_pad_vec(p["bt1"], fp),
            g2=_pad_vec(p["g2"], fp), bt2=_pad_vec(p["bt2"], fp),
        ))
    return packed
    # NOTE: conv biases are intentionally dropped: a per-channel bias followed by
    # training-mode BatchNorm is exactly cancelled by the mean subtraction.


# ----------------------------------------------------------------------------
# Forward (wrapper around the Pallas kernels)
# ----------------------------------------------------------------------------
def _first_sub_block_fwd(x, pp, k):
    p = k // 2
    # skip path: 1x1 stride-2 conv + bn3 (no ReLU). Stride-2 1x1 == subsample + 1x1.
    xs = x[:, ::2, ::2, :]
    x_skip = conv_bn_act(xs, pp["w_skip"], 1, 1, 0, pp["g3"], pp["bt3"],
                         apply_relu=False)
    # conv1: k x k stride-2 'same' == space-to-depth(2) + (k+1)//2 square VALID conv.
    # (This tiny Cin=4 input is the only place a wrapper-side pad remains.)
    k2 = (k + 1) // 2
    z = _space_to_depth2(jnp.pad(x, ((0, 0), (p, p), (p, p), (0, 0))))
    x1 = conv_bn_act(z, pp["w1"], k2, k2, 0, pp["g1"], pp["bt1"], apply_relu=True)
    # conv2: k x k stride-1 'same' (halo built in-kernel) + bn2 + skip residual + ReLU
    return conv_bn_act(x1, pp["w2"], k, k, p, pp["g2"], pp["bt2"],
                       residual=x_skip, apply_relu=True)


def _sub_block_fwd(x, pp, k):
    p = k // 2
    x1 = conv_bn_act(x, pp["w1"], k, k, p, pp["g1"], pp["bt1"], apply_relu=True)
    return conv_bn_act(x1, pp["w2"], k, k, p, pp["g2"], pp["bt2"],
                       residual=x, apply_relu=True)


@functools.partial(jax.jit, static_argnums=(2, 3))
def block_forward(x_nchw, packed_params, kernel_size, num_filters):
    x = jnp.transpose(x_nchw, (0, 2, 3, 1)).astype(jnp.bfloat16)   # NCHW -> NHWC bf16
    out = _first_sub_block_fwd(x, packed_params[0], kernel_size)
    for pp in packed_params[1:]:
        out = _sub_block_fwd(out, pp, kernel_size)
    out = out[:, :, :, :num_filters]                  # drop lane padding
    return jnp.transpose(out, (0, 3, 1, 2))           # NHWC -> NCHW (bf16)


# ----------------------------------------------------------------------------
# Parameter init (mirrors PyTorch Conv2d/BatchNorm2d defaults)
# ----------------------------------------------------------------------------
def init_conv(key, out_c, in_c, k):
    kw_, kb = jax.random.split(key)
    fan_in = in_c * k * k
    bound = 1.0 / jnp.sqrt(jnp.float32(fan_in))
    w = jax.random.uniform(kw_, (out_c, in_c, k, k), jnp.float32, -bound, bound)
    b = jax.random.uniform(kb, (out_c,), jnp.float32, -bound, bound)
    return w, b


def init_bn(num_feat):
    return jnp.ones((num_feat,), jnp.float32), jnp.zeros((num_feat,), jnp.float32)


def init_block_params(key, in_channels, kernel_size, num_filters, num_sub_blocks):
    keys = jax.random.split(key, 3 + 2 * (num_sub_blocks - 1))
    params = []
    w1, b1 = init_conv(keys[0], num_filters, in_channels, kernel_size)
    w2, b2 = init_conv(keys[1], num_filters, num_filters, kernel_size)
    ws, bs = init_conv(keys[2], num_filters, in_channels, 1)
    g1, bt1 = init_bn(num_filters); g2, bt2 = init_bn(num_filters); g3, bt3 = init_bn(num_filters)
    params.append(dict(w1=w1, b1=b1, w2=w2, b2=b2, w_skip=ws, b_skip=bs,
                       g1=g1, bt1=bt1, g2=g2, bt2=bt2, g3=g3, bt3=bt3))
    for i in range(num_sub_blocks - 1):
        wa, ba = init_conv(keys[3 + 2 * i], num_filters, num_filters, kernel_size)
        wb, bb = init_conv(keys[4 + 2 * i], num_filters, num_filters, kernel_size)
        ga, bta = init_bn(num_filters); gb, btb = init_bn(num_filters)
        params.append(dict(w1=wa, b1=ba, w2=wb, b2=bb, g1=ga, bt1=bta, g2=gb, bt2=btb))
    return params


# ----------------------------------------------------------------------------
# Reference (mirrors bf16 MXU operands / bf16 inter-layer activations; keeps the
# PyTorch conv bias to demonstrate that dropping it before training-mode BN is exact)
# ----------------------------------------------------------------------------
def _ref_conv(x, w, b, stride, pad):
    y = jax.lax.conv_general_dilated(
        x.astype(jnp.bfloat16), w.astype(jnp.bfloat16),
        (stride, stride), [(pad, pad), (pad, pad)],
        dimension_numbers=("NCHW", "OIHW", "NCHW"),
        preferred_element_type=jnp.float32)
    return y + b.astype(jnp.float32)[None, :, None, None]


def _ref_bn(y, g, bt):
    m = jnp.mean(y, axis=(0, 2, 3), keepdims=True)
    var = jnp.maximum(jnp.mean(y * y, axis=(0, 2, 3), keepdims=True) - m * m, 0.0)
    a = g[None, :, None, None] * jax.lax.rsqrt(var + EPS)
    return y * a + (bt[None, :, None, None] - m * a)


def _bf16(x):
    return x.astype(jnp.bfloat16).astype(jnp.float32)


def block_forward_ref(x, params, k):
    p = params[0]
    x_skip = _bf16(_ref_bn(_ref_conv(x, p["w_skip"], p["b_skip"], 2, 0), p["g3"], p["bt3"]))
    x1 = _bf16(jnp.maximum(_ref_bn(_ref_conv(x, p["w1"], p["b1"], 2, k // 2),
                                   p["g1"], p["bt1"]), 0.0))
    x2 = _ref_bn(_ref_conv(x1, p["w2"], p["b2"], 1, k // 2), p["g2"], p["bt2"])
    out = _bf16(jnp.maximum(x2 + x_skip, 0.0))
    for p in params[1:]:
        x1 = _bf16(jnp.maximum(_ref_bn(_ref_conv(out, p["w1"], p["b1"], 1, k // 2),
                                       p["g1"], p["bt1"]), 0.0))
        x2 = _ref_bn(_ref_conv(x1, p["w2"], p["b2"], 1, k // 2), p["g2"], p["bt2"])
        out = _bf16(jnp.maximum(out + x2, 0.0))
    return out


if __name__ == "__main__":
    # Block(in_channels=4, kernel_size=3, num_filters=8, num_sub_blocks=2)
    in_channels, kernel_size, num_filters, num_sub_blocks = 4, 3, 8, 2
    key = jax.random.PRNGKey(0)
    k_x, k_p = jax.random.split(key)
    x = jax.random.normal(k_x, (2, in_channels, 16, 16), jnp.float32)   # NCHW
    params = init_block_params(k_p, in_channels, kernel_size, num_filters, num_sub_blocks)
    packed = pack_block_params(params, num_filters)

    out = jax.block_until_ready(block_forward(x, packed, kernel_size, num_filters))
    assert out.shape == (2, num_filters, 8, 8), out.shape

    ref = jax.block_until_ready(block_forward_ref(x, params, kernel_size))
    out_f32 = out.astype(jnp.float32)
    max_err = float(jnp.max(jnp.abs(out_f32 - ref)))
    assert jnp.allclose(out_f32, ref, rtol=5e-2, atol=5e-2), max_err

    print("KERNEL_OK")
</pallas_src>

<mosaic_0001>
module attributes {stable_mosaic.version = 11 : i64} {
  func.func @kernel(%arg0: i32, %arg1: i32, %arg2: memref<1x9x9x16xbf16, #tpu.memory_space<vmem>>, %arg3: memref<2x32x128xbf16, #tpu.memory_space<vmem>>, %arg4: memref<1x8x8x128xbf16, #tpu.memory_space<vmem>>, %arg5: memref<1x1x2x128xf32, #tpu.memory_space<vmem>>) attributes {dimension_semantics = [#tpu.dimension_semantics<parallel>, #tpu.dimension_semantics<parallel>], iteration_bounds = array<i64: 2, 1>, scalar_prefetch = 0 : i64, scratch_operands = 0 : i64, tpu.core_type = #tpu.core_type<tc>, window_params = [{transform_indices = @transform_0, window_bounds = array<i64: 1, 9, 9, 16>}, {pipeline_mode = #tpu.pipeline_mode<synchronous>, transform_indices = @transform_1, window_bounds = array<i64: 2, 32, 128>}, {transform_indices = @transform_2, window_bounds = array<i64: 1, 8, 8, 128>}, {transform_indices = @transform_3, window_bounds = array<i64: 1, 1, 2, 128>}]} {
    %c8_i32 = arith.constant 8 : i32
    %0 = arith.muli %arg1, %c8_i32 : i32
    %c0_i32 = arith.constant 0 : i32
    %1 = arith.addi %0, %c0_i32 : i32
    %c0 = arith.constant 0 : index
    %2 = arith.index_cast %1 : i32 to index
    %c0_0 = arith.constant 0 : index
    %c0_1 = arith.constant 0 : index
    %3 = vector.load %arg2[%c0, %2, %c0_0, %c0_1] : memref<1x9x9x16xbf16, #tpu.memory_space<vmem>>, vector<1x8x8x16xbf16>
    %4 = vector.shape_cast %3 : vector<1x8x8x16xbf16> to vector<8x8x16xbf16>
    %5 = arith.extf %4 : vector<8x8x16xbf16> to vector<8x8x16xf32>
    %6 = vector.shape_cast %5 : vector<8x8x16xf32> to vector<64x16xf32>
    %7 = arith.truncf %6 : vector<64x16xf32> to vector<64x16xbf16>
    %c0_2 = arith.constant 0 : index
    %c0_3 = arith.constant 0 : index
    %c0_4 = arith.constant 0 : index
    %8 = vector.load %arg3[%c0_2, %c0_3, %c0_4] : memref<2x32x128xbf16, #tpu.memory_space<vmem>>, vector<1x16x128xbf16>
    %9 = vector.shape_cast %8 : vector<1x16x128xbf16> to vector<16x128xbf16>
    %cst = arith.constant dense<0.000000e+00> : vector<64x128xf32>
    %10 = tpu.matmul %7, %9, %cst {dimension_numbers = #tpu.dot_dimension_numbers<[1], [0], [0], [1], [0, 0, 1, 1], [], []>} : vector<64x16xbf16>, vector<16x128xbf16>, vector<64x128xf32> -> vector<64x128xf32>
    %c0_i32_5 = arith.constant 0 : i32
    %11 = arith.addi %0, %c0_i32_5 : i32
    %c0_6 = arith.constant 0 : index
    %12 = arith.index_cast %11 : i32 to index
    %c1 = arith.constant 1 : index
    %c0_7 = arith.constant 0 : index
    %13 = vector.load %arg2[%c0_6, %12, %c1, %c0_7] : memref<1x9x9x16xbf16, #tpu.memory_space<vmem>>, vector<1x8x8x16xbf16>
    %14 = vector.shape_cast %13 : vector<1x8x8x16xbf16> to vector<8x8x16xbf16>
    %15 = arith.extf %14 : vector<8x8x16xbf16> to vector<8x8x16xf32>
    %16 = vector.shape_cast %15 : vector<8x8x16xf32> to vector<64x16xf32>
    %17 = arith.truncf %16 : vector<64x16xf32> to vector<64x16xbf16>
    %c0_8 = arith.constant 0 : index
    %c16 = arith.constant 16 : index
    %c0_9 = arith.constant 0 : index
    %18 = vector.load %arg3[%c0_8, %c16, %c0_9] : memref<2x32x128xbf16, #tpu.memory_space<vmem>>, vector<1x16x128xbf16>
    %19 = vector.shape_cast %18 : vector<1x16x128xbf16> to vector<16x128xbf16>
    %cst_10 = arith.constant dense<0.000000e+00> : vector<64x128xf32>
    %20 = tpu.matmul %17, %19, %cst_10 {dimension_numbers = #tpu.dot_dimension_numbers<[1], [0], [0], [1], [0, 0, 1, 1], [], []>} : vector<64x16xbf16>, vector<16x128xbf16>, vector<64x128xf32> -> vector<64x128xf32>
    %21 = arith.addf %10, %20 : vector<64x128xf32>
    %c1_i32 = arith.constant 1 : i32
    %22 = arith.addi %0, %c1_i32 : i32
    %c0_11 = arith.constant 0 : index
    %23 = arith.index_cast %22 : i32 to index
    %c0_12 = arith.constant 0 : index
    %c0_13 = arith.constant 0 : index
    %24 = vector.load %arg2[%c0_11, %23, %c0_12, %c0_13] : memref<1x9x9x16xbf16, #tpu.memory_space<vmem>>, vector<1x8x8x16xbf16>
    %25 = vector.shape_cast %24 : vector<1x8x8x16xbf16> to vector<8x8x16xbf16>
    %26 = arith.extf %25 : vector<8x8x16xbf16> to vector<8x8x16xf32>
    %27 = vector.shape_cast %26 : vector<8x8x16xf32> to vector<64x16xf32>
    %28 = arith.truncf %27 : vector<64x16xf32> to vector<64x16xbf16>
    %c1_14 = arith.constant 1 : index
    %c0_15 = arith.constant 0 : index
    %c0_16 = arith.constant 0 : index
    %29 = vector.load %arg3[%c1_14, %c0_15, %c0_16] : memref<2x32x128xbf16, #tpu.memory_space<vmem>>, vector<1x16x128xbf16>
    %30 = vector.shape_cast %29 : vector<1x16x128xbf16> to vector<16x128xbf16>
    %cst_17 = arith.constant dense<0.000000e+00> : vector<64x128xf32>
    %31 = tpu.matmul %28, %30, %cst_17 {dimension_numbers = #tpu.dot_dimension_numbers<[1], [0], [0], [1], [0, 0, 1, 1], [], []>} : vector<64x16xbf16>, vector<16x128xbf16>, vector<64x128xf32> -> vector<64x128xf32>
    %32 = arith.addf %21, %31 : vector<64x128xf32>
    %c1_i32_18 = arith.constant 1 : i32
    %33 = arith.addi %0, %c1_i32_18 : i32
    %c0_19 = arith.constant 0 : index
    %34 = arith.index_cast %33 : i32 to index
    %c1_20 = arith.constant 1 : index
    %c0_21 = arith.constant 0 : index
    %35 = vector.load %arg2[%c0_19, %34, %c1_20, %c0_21] : memref<1x9x9x16xbf16, #tpu.memory_space<vmem>>, vector<1x8x8x16xbf16>
    %36 = vector.shape_cast %35 : vector<1x8x8x16xbf16> to vector<8x8x16xbf16>
    %37 = arith.extf %36 : vector<8x8x16xbf16> to vector<8x8x16xf32>
    %38 = vector.shape_cast %37 : vector<8x8x16xf32> to vector<64x16xf32>
    %39 = arith.truncf %38 : vector<64x16xf32> to vector<64x16xbf16>
    %c1_22 = arith.constant 1 : index
    %c16_23 = arith.constant 16 : index
    %c0_24 = arith.constant 0 : index
    %40 = vector.load %arg3[%c1_22, %c16_23, %c0_24] : memref<2x32x128xbf16, #tpu.memory_space<vmem>>, vector<1x16x128xbf16>
    %41 = vector.shape_cast %40 : vector<1x16x128xbf16> to vector<16x128xbf16>
    %cst_25 = arith.constant dense<0.000000e+00> : vector<64x128xf32>
    %42 = tpu.matmul %39, %41, %cst_25 {dimension_numbers = #tpu.dot_dimension_numbers<[1], [0], [0], [1], [0, 0, 1, 1], [], []>} : vector<64x16xbf16>, vector<16x128xbf16>, vector<64x128xf32> -> vector<64x128xf32>
    %43 = arith.addf %32, %42 : vector<64x128xf32>
    %44 = vector.shape_cast %43 : vector<64x128xf32> to vector<1x8x8x128xf32>
    %45 = arith.truncf %44 : vector<1x8x8x128xf32> to vector<1x8x8x128xbf16>
    %c0_26 = arith.constant 0 : index
    %c0_27 = arith.constant 0 : index
    %c0_28 = arith.constant 0 : index
    %c0_29 = arith.constant 0 : index
    %46 = vector.load %arg4[%c0_26, %c0_27, %c0_28, %c0_29] : memref<1x8x8x128xbf16, #tpu.memory_space<vmem>>, vector<1x8x8x128xbf16>
    tpu.vector_store %arg4[%c0_26, %c0_27, %c0_28, %c0_29], %45 {strides = array<i32>} : memref<1x8x8x128xbf16, #tpu.memory_space<vmem>>, vector<1x8x8x128xbf16>,
    %cst_30 = arith.constant dense<0.000000e+00> : vector<128xf32>
    %47 = vector.multi_reduction <add>, %43, %cst_30 [0] : vector<64x128xf32> to vector<128xf32>
    %48 = vector.shape_cast %47 : vector<128xf32> to vector<1x128xf32>
    %cst_31 = arith.constant 1.562500e-02 : f32
    %49 = vector.broadcast %cst_31 : f32 to vector<1x128xf32>
    %50 = arith.mulf %48, %49 : vector<1x128xf32>
    %51 = vector.broadcast %50 : vector<1x128xf32> to vector<64x128xf32>
    %52 = arith.subf %43, %51 : vector<64x128xf32>
    %53 = arith.mulf %52, %52 : vector<64x128xf32>
    %cst_32 = arith.constant dense<0.000000e+00> : vector<128xf32>
    %54 = vector.multi_reduction <add>, %53, %cst_32 [0] : vector<64x128xf32> to vector<128xf32>
    %55 = vector.shape_cast %54 : vector<128xf32> to vector<1x128xf32>
    %c0_33 = arith.constant 0 : index
    %c0_34 = arith.constant 0 : index
    %c0_35 = arith.constant 0 : index
    %c0_36 = arith.constant 0 : index
    %56 = vector.load %arg5[%c0_33, %c0_34, %c0_35, %c0_36] : memref<1x1x2x128xf32, #tpu.memory_space<vmem>>, vector<1x1x1x128xf32>
    %57 = vector.shape_cast %56 : vector<1x1x1x128xf32> to vector<1x128xf32>
    %58 = vector.shape_cast %48 : vector<1x128xf32> to vector<1x1x1x128xf32>
    tpu.vector_store %arg5[%c0_33, %c0_34, %c0_35, %c0_36], %58 {strides = array<i32>} : memref<1x1x2x128xf32, #tpu.memory_space<vmem>>, vector<1x1x1x128xf32>,
    %c0_37 = arith.constant 0 : index
    %c0_38 = arith.constant 0 : index
    %c1_39 = arith.constant 1 : index
    %c0_40 = arith.constant 0 : index
    %59 = vector.load %arg5[%c0_37, %c0_38, %c1_39, %c0_40] : memref<1x1x2x128xf32, #tpu.memory_space<vmem>>, vector<1x1x1x128xf32>
    %60 = vector.shape_cast %59 : vector<1x1x1x128xf32> to vector<1x128xf32>
    %61 = vector.shape_cast %55 : vector<1x128xf32> to vector<1x1x1x128xf32>
    tpu.vector_store %arg5[%c0_37, %c0_38, %c1_39, %c0_40], %61 {strides = array<i32>} : memref<1x1x2x128xf32, #tpu.memory_space<vmem>>, vector<1x1x1x128xf32>,
    return
  }
  func.func @transform_0(%arg0: i32, %arg1: i32) -> (i32, i32, i32, i32) {
    %c0_i32 = arith.constant 0 : i32
    %c0_i32_0 = arith.constant 0 : i32
    %c0_i32_1 = arith.constant 0 : i32
    %c0_i32_2 = arith.constant 0 : i32
    return %arg0, %c0_i32, %c0_i32_0, %c0_i32_1 : i32, i32, i32, i32
  }
  func.func @transform_1(%arg0: i32, %arg1: i32) -> (i32, i32, i32) {
    %c0_i32 = arith.constant 0 : i32
    %c0_i32_0 = arith.constant 0 : i32
    %c0_i32_1 = arith.constant 0 : i32
    %c0_i32_2 = arith.constant 0 : i32
    return %c0_i32, %c0_i32_0, %c0_i32_1 : i32, i32, i32
  }
  func.func @transform_2(%arg0: i32, %arg1: i32) -> (i32, i32, i32, i32) {
    %c0_i32 = arith.constant 0 : i32
    %c0_i32_0 = arith.constant 0 : i32
    %c0_i32_1 = arith.constant 0 : i32
    return %arg0, %arg1, %c0_i32, %c0_i32_0 : i32, i32, i32, i32
  }
  func.func @transform_3(%arg0: i32, %arg1: i32) -> (i32, i32, i32, i32) {
    %c0_i32 = arith.constant 0 : i32
    %c0_i32_0 = arith.constant 0 : i32
    %c0_i32_1 = arith.constant 0 : i32
    return %arg0, %arg1, %c0_i32, %c0_i32_0 : i32, i32, i32, i32
  }
}

module attributes {stable_mosaic.version = 11 : i64} {
  func.func @kernel(%arg0: i32, %arg1: i32, %arg2: memref<1x8x8x128xbf16, #tpu.memory_space<vmem>>, %arg3: memref<1x1x1x128xf32, #tpu.memory_space<vmem>>, %arg4: memref<1x1x1x128xf32, #tpu.memory_space<vmem>>, %arg5: memref<1x8x8x128xbf16, #tpu.memory_space<vmem>>) attributes {dimension_semantics = [#tpu.dimension_semantics<parallel>, #tpu.dimension_semantics<parallel>], iteration_bounds = array<i64: 2, 1>, scalar_prefetch = 0 : i64, scratch_operands = 0 : i64, tpu.core_type = #tpu.core_type<tc>, window_params = [{transform_indices = @transform_0, window_bounds = array<i64: 1, 8, 8, 128>}, {pipeline_mode = #tpu.pipeline_mode<synchronous>, transform_indices = @transform_1, window_bounds = array<i64: 1, 1, 1, 128>}, {pipeline_mode = #tpu.pipeline_mode<synchronous>, transform_indices = @transform_2, window_bounds = array<i64: 1, 1, 1, 128>}, {transform_indices = @transform_3, window_bounds = array<i64: 1, 8, 8, 128>}]} {
    %c0 = arith.constant 0 : index
    %c0_0 = arith.constant 0 : index
    %c0_1 = arith.constant 0 : index
    %c0_2 = arith.constant 0 : index
    %0 = vector.load %arg2[%c0, %c0_0, %c0_1, %c0_2] : memref<1x8x8x128xbf16, #tpu.memory_space<vmem>>, vector<1x8x8x128xbf16>
    %1 = arith.extf %0 : vector<1x8x8x128xbf16> to vector<1x8x8x128xf32>
    %c0_3 = arith.constant 0 : index
    %c0_4 = arith.constant 0 : index
    %c0_5 = arith.constant 0 : index
    %c0_6 = arith.constant 0 : index
    %2 = vector.load %arg3[%c0_3, %c0_4, %c0_5, %c0_6] : memref<1x1x1x128xf32, #tpu.memory_space<vmem>>, vector<1x1x1x128xf32>
    %3 = vector.broadcast %2 : vector<1x1x1x128xf32> to vector<1x8x8x128xf32>
    %4 = arith.mulf %1, %3 : vector<1x8x8x128xf32>
    %c0_7 = arith.constant 0 : index
    %c0_8 = arith.constant 0 : index
    %c0_9 = arith.constant 0 : index
    %c0_10 = arith.constant 0 : index
    %5 = vector.load %arg4[%c0_7, %c0_8, %c0_9, %c0_10] : memref<1x1x1x128xf32, #tpu.memory_space<vmem>>, vector<1x1x1x128xf32>
    %6 = vector.broadcast %5 : vector<1x1x1x128xf32> to vector<1x8x8x128xf32>
    %7 = arith.addf %4, %6 : vector<1x8x8x128xf32>
    %cst = arith.constant 0.000000e+00 : f32
    %8 = vector.broadcast %cst : f32 to vector<1x8x8x128xf32>
    %9 = arith.maximumf %7, %8 : vector<1x8x8x128xf32>
    %10 = arith.truncf %9 : vector<1x8x8x128xf32> to vector<1x8x8x128xbf16>
    %c0_11 = arith.constant 0 : index
    %c0_12 = arith.constant 0 : index
    %c0_13 = arith.constant 0 : index
    %c0_14 = arith.constant 0 : index
    %11 = vector.load %arg5[%c0_11, %c0_12, %c0_13, %c0_14] : memref<1x8x8x128xbf16, #tpu.memory_space<vmem>>, vector<1x8x8x128xbf16>
    tpu.vector_store %arg5[%c0_11, %c0_12, %c0_13, %c0_14], %10 {strides = array<i32>} : memref<1x8x8x128xbf16, #tpu.memory_space<vmem>>, vector<1x8x8x128xbf16>,
    return
  }
  func.func @transform_0(%arg0: i32, %arg1: i32) -> (i32, i32, i32, i32) {
    %c0_i32 = arith.constant 0 : i32
    %c0_i32_0 = arith.constant 0 : i32
    %c0_i32_1 = arith.constant 0 : i32
    return %arg0, %arg1, %c0_i32, %c0_i32_0 : i32, i32, i32, i32
  }
  func.func @transform_1(%arg0: i32, %arg1: i32) -> (i32, i32, i32, i32) {
    %c0_i32 = arith.constant 0 : i32
    %c0_i32_0 = arith.constant 0 : i32
    %c0_i32_1 = arith.constant 0 : i32
    %c0_i32_2 = arith.constant 0 : i32
    %c0_i32_3 = arith.constant 0 : i32
    return %c0_i32, %c0_i32_0, %c0_i32_1, %c0_i32_2 : i32, i32, i32, i32
  }
  func.func @transform_2(%arg0: i32, %arg1: i32) -> (i32, i32, i32, i32) {
    %c0_i32 = arith.constant 0 : i32
    %c0_i32_0 = arith.constant 0 : i32
    %c0_i32_1 = arith.constant 0 : i32
    %c0_i32_2 = arith.constant 0 : i32
    %c0_i32_3 = arith.constant 0 : i32
    return %c0_i32, %c0_i32_0, %c0_i32_1, %c0_i32_2 : i32, i32, i32, i32
  }
  func.func @transform_3(%arg0: i32, %arg1: i32) -> (i32, i32, i32, i32) {
    %c0_i32 = arith.constant 0 : i32
    %c0_i32_0 = arith.constant 0 : i32
    %c0_i32_1 = arith.constant 0 : i32
    return %arg0, %arg1, %c0_i32, %c0_i32_0 : i32, i32, i32, i32
  }
}

module attributes {stable_mosaic.version = 11 : i64} {
  func.func @kernel(%arg0: i32, %arg1: i32, %arg2: memref<1x8x8x128xbf16, #tpu.memory_space<vmem>>, %arg3: memref<3x384x128xbf16, #tpu.memory_space<vmem>>, %arg4: memref<1x8x8x128xbf16, #tpu.memory_space<vmem>>, %arg5: memref<1x1x2x128xf32, #tpu.memory_space<vmem>>, %arg6: memref<10x10x128xbf16, #tpu.memory_space<vmem>>) attributes {dimension_semantics = [#tpu.dimension_semantics<parallel>, #tpu.dimension_semantics<parallel>], iteration_bounds = array<i64: 2, 1>, scalar_prefetch = 0 : i64, scratch_operands = 1 : i64, tpu.core_type = #tpu.core_type<tc>, window_params = [{transform_indices = @transform_0, window_bounds = array<i64: 1, 8, 8, 128>}, {pipeline_mode = #tpu.pipeline_mode<synchronous>, transform_indices = @transform_1, window_bounds = array<i64: 3, 384, 128>}, {transform_indices = @transform_2, window_bounds = array<i64: 1, 8, 8, 128>}, {transform_indices = @transform_3, window_bounds = array<i64: 1, 1, 2, 128>}]} {
    %c8_i32 = arith.constant 8 : i32
    %0 = arith.muli %arg1, %c8_i32 : i32
    %cst = arith.constant 0.000000e+00 : bf16
    %1 = vector.broadcast %cst : bf16 to vector<1x10x128xbf16>
    %cst_0 = arith.constant 0.000000e+00 : bf16
    %2 = vector.broadcast %cst_0 : bf16 to vector<8x1x128xbf16>
    %c0 = arith.constant 0 : index
    %c0_1 = arith.constant 0 : index
    %c0_2 = arith.constant 0 : index
    %3 = vector.load %arg6[%c0, %c0_1, %c0_2] : memref<10x10x128xbf16, #tpu.memory_space<vmem>>, vector<1x10x128xbf16>
    tpu.vector_store %arg6[%c0, %c0_1, %c0_2], %1 {strides = array<i32>} : memref<10x10x128xbf16, #tpu.memory_space<vmem>>, vector<1x10x128xbf16>,
    %c0_3 = arith.constant 0 : index
    %c0_4 = arith.constant 0 : index
    %c0_5 = arith.constant 0 : index
    %c0_6 = arith.constant 0 : index
    %4 = vector.load %arg2[%c0_3, %c0_4, %c0_5, %c0_6] : memref<1x8x8x128xbf16, #tpu.memory_space<vmem>>, vector<1x8x8x128xbf16>
    %5 = vector.shape_cast %4 : vector<1x8x8x128xbf16> to vector<8x8x128xbf16>
    %6 = tpu.concatenate %2, %5, %2 in 1 : vector<8x1x128xbf16>, vector<8x8x128xbf16>, vector<8x1x128xbf16> -> vector<8x10x128xbf16>
    %c1 = arith.constant 1 : index
    %c0_7 = arith.constant 0 : index
    %c0_8 = arith.constant 0 : index
    %7 = vector.load %arg6[%c1, %c0_7, %c0_8] : memref<10x10x128xbf16, #tpu.memory_space<vmem>>, vector<8x10x128xbf16>
    tpu.vector_store %arg6[%c1, %c0_7, %c0_8], %6 {strides = array<i32>} : memref<10x10x128xbf16, #tpu.memory_space<vmem>>, vector<8x10x128xbf16>,
    %c9 = arith.constant 9 : index
    %c0_9 = arith.constant 0 : index
    %c0_10 = arith.constant 0 : index
    %8 = vector.load %arg6[%c9, %c0_9, %c0_10] : memref<10x10x128xbf16, #tpu.memory_space<vmem>>, vector<1x10x128xbf16>
    tpu.vector_store %arg6[%c9, %c0_9, %c0_10], %1 {strides = array<i32>} : memref<10x10x128xbf16, #tpu.memory_space<vmem>>, vector<1x10x128xbf16>,
    %c0_i32 = arith.constant 0 : i32
    %9 = arith.addi %0, %c0_i32 : i32
    %10 = arith.index_cast %9 : i32 to index
    %c0_11 = arith.constant 0 : index
    %c0_12 = arith.constant 0 : index
    %11 = vector.load %arg6[%10, %c0_11, %c0_12] : memref<10x10x128xbf16, #tpu.memory_space<vmem>>, vector<8x8x128xbf16>
    %c0_i32_13 = arith.constant 0 : i32
    %12 = arith.addi %0, %c0_i32_13 : i32
    %13 = arith.index_cast %12 : i32 to index
    %c1_14 = arith.constant 1 : index
    %c0_15 = arith.constant 0 : index
    %14 = vector.load %arg6[%13, %c1_14, %c0_15] : memref<10x10x128xbf16, #tpu.memory_space<vmem>>, vector<8x8x128xbf16>
    %c0_i32_16 = arith.constant 0 : i32
    %15 = arith.addi %0, %c0_i32_16 : i32
    %16 = arith.index_cast %15 : i32 to index
    %c2 = arith.constant 2 : index
    %c0_17 = arith.constant 0 : index
    %17 = vector.load %arg6[%16, %c2, %c0_17] : memref<10x10x128xbf16, #tpu.memory_space<vmem>>, vector<8x8x128xbf16>
    %18 = tpu.concatenate %11, %14, %17 in 2 : vector<8x8x128xbf16>, vector<8x8x128xbf16>, vector<8x8x128xbf16> -> vector<8x8x384xbf16>
    %19 = arith.extf %18 : vector<8x8x384xbf16> to vector<8x8x384xf32>
    %20 = vector.shape_cast %19 : vector<8x8x384xf32> to vector<64x384xf32>
    %21 = arith.truncf %20 : vector<64x384xf32> to vector<64x384xbf16>
    %c0_18 = arith.constant 0 : index
    %c0_19 = arith.constant 0 : index
    %c0_20 = arith.constant 0 : index
    %22 = vector.load %arg3[%c0_18, %c0_19, %c0_20] : memref<3x384x128xbf16, #tpu.memory_space<vmem>>, vector<1x384x128xbf16>
    %23 = vector.shape_cast %22 : vector<1x384x128xbf16> to vector<384x128xbf16>
    %cst_21 = arith.constant dense<0.000000e+00> : vector<64x128xf32>
    %24 = tpu.matmul %21, %23, %cst_21 {dimension_numbers = #tpu.dot_dimension_numbers<[1], [0], [0], [1], [0, 0, 1, 1], [], []>} : vector<64x384xbf16>, vector<384x128xbf16>, vector<64x128xf32> -> vector<64x128xf32>
    %c1_i32 = arith.constant 1 : i32
    %25 = arith.addi %0, %c1_i32 : i32
    %26 = arith.index_cast %25 : i32 to index
    %c0_22 = arith.constant 0 : index
    %c0_23 = arith.constant 0 : index
    %27 = vector.load %arg6[%26, %c0_22, %c0_23] : memref<10x10x128xbf16, #tpu.memory_space<vmem>>, vector<8x8x128xbf16>
    %c1_i32_24 = arith.constant 1 : i32
    %28 = arith.addi %0, %c1_i32_24 : i32
    %29 = arith.index_cast %28 : i32 to index
    %c1_25 = arith.constant 1 : index
    %c0_26 = arith.constant 0 : index
    %30 = vector.load %arg6[%29, %c1_25, %c0_26] : memref<10x10x128xbf16, #tpu.memory_space<vmem>>, vector<8x8x128xbf16>
    %c1_i32_27 = arith.constant 1 : i32
    %31 = arith.addi %0, %c1_i32_27 : i32
    %32 = arith.index_cast %31 : i32 to index
    %c2_28 = arith.constant 2 : index
    %c0_29 = arith.constant 0 : index
    %33 = vector.load %arg6[%32, %c2_28, %c0_29] : memref<10x10x128xbf16, #tpu.memory_space<vmem>>, vector<8x8x128xbf16>
    %34 = tpu.concatenate %27, %30, %33 in 2 : vector<8x8x128xbf16>, vector<8x8x128xbf16>, vector<8x8x128xbf16> -> vector<8x8x384xbf16>
    %35 = arith.extf %34 : vector<8x8x384xbf16> to vector<8x8x384xf32>
    %36 = vector.shape_cast %35 : vector<8x8x384xf32> to vector<64x384xf32>
    %37 = arith.truncf %36 : vector<64x384xf32> to vector<64x384xbf16>
    %c1_30 = arith.constant 1 : index
    %c0_31 = arith.constant 0 : index
    %c0_32 = arith.constant 0 : index
    %38 = vector.load %arg3[%c1_30, %c0_31, %c0_32] : memref<3x384x128xbf16, #tpu.memory_space<vmem>>, vector<1x384x128xbf16>
    %39 = vector.shape_cast %38 : vector<1x384x128xbf16> to vector<384x128xbf16>
    %cst_33 = arith.constant dense<0.000000e+00> : vector<64x128xf32>
    %40 = tpu.matmul %37, %39, %cst_33 {dimension_numbers = #tpu.dot_dimension_numbers<[1], [0], [0], [1], [0, 0, 1, 1], [], []>} : vector<64x384xbf16>, vector<384x128xbf16>, vector<64x128xf32> -> vector<64x128xf32>
    %41 = arith.addf %24, %40 : vector<64x128xf32>
    %c2_i32 = arith.constant 2 : i32
    %42 = arith.addi %0, %c2_i32 : i32
    %43 = arith.index_cast %42 : i32 to index
    %c0_34 = arith.constant 0 : index
    %c0_35 = arith.constant 0 : index
    %44 = vector.load %arg6[%43, %c0_34, %c0_35] : memref<10x10x128xbf16, #tpu.memory_space<vmem>>, vector<8x8x128xbf16>
    %c2_i32_36 = arith.constant 2 : i32
    %45 = arith.addi %0, %c2_i32_36 : i32
    %46 = arith.index_cast %45 : i32 to index
    %c1_37 = arith.constant 1 : index
    %c0_38 = arith.constant 0 : index
    %47 = vector.load %arg6[%46, %c1_37, %c0_38] : memref<10x10x128xbf16, #tpu.memory_space<vmem>>, vector<8x8x128xbf16>
    %c2_i32_39 = arith.constant 2 : i32
    %48 = arith.addi %0, %c2_i32_39 : i32
    %49 = arith.index_cast %48 : i32 to index
    %c2_40 = arith.constant 2 : index
    %c0_41 = arith.constant 0 : index
    %50 = vector.load %arg6[%49, %c2_40, %c0_41] : memref<10x10x128xbf16, #tpu.memory_space<vmem>>, vector<8x8x128xbf16>
    %51 = tpu.concatenate %44, %47, %50 in 2 : vector<8x8x128xbf16>, vector<8x8x128xbf16>, vector<8x8x128xbf16> -> vector<8x8x384xbf16>
    %52 = arith.extf %51 : vector<8x8x384xbf16> to vector<8x8x384xf32>
    %53 = vector.shape_cast %52 : vector<8x8x384xf32> to vector<64x384xf32>
    %54 = arith.truncf %53 : vector<64x384xf32> to vector<64x384xbf16>
    %c2_42 = arith.constant 2 : index
    %c0_43 = arith.constant 0 : index
    %c0_44 = arith.constant 0 : index
    %55 = vector.load %arg3[%c2_42, %c0_43, %c0_44] : memref<3x384x128xbf16, #tpu.memory_space<vmem>>, vector<1x384x128xbf16>
    %56 = vector.shape_cast %55 : vector<1x384x128xbf16> to vector<384x128xbf16>
    %cst_45 = arith.constant dense<0.000000e+00> : vector<64x128xf32>
    %57 = tpu.matmul %54, %56, %cst_45 {dimension_numbers = #tpu.dot_dimension_numbers<[1], [0], [0], [1], [0, 0, 1, 1], [], []>} : vector<64x384xbf16>, vector<384x128xbf16>, vector<64x128xf32> -> vector<64x128xf32>
    %58 = arith.addf %41, %57 : vector<64x128xf32>
    %59 = vector.shape_cast %58 : vector<64x128xf32> to vector<1x8x8x128xf32>
    %60 = arith.truncf %59 : vector<1x8x8x128xf32> to vector<1x8x8x128xbf16>
    %c0_46 = arith.constant 0 : index
    %c0_47 = arith.constant 0 : index
    %c0_48 = arith.constant 0 : index
    %c0_49 = arith.constant 0 : index
    %61 = vector.load %arg4[%c0_46, %c0_47, %c0_48, %c0_49] : memref<1x8x8x128xbf16, #tpu.memory_space<vmem>>, vector<1x8x8x128xbf16>
    tpu.vector_store %arg4[%c0_46, %c0_47, %c0_48, %c0_49], %60 {strides = array<i32>} : memref<1x8x8x128xbf16, #tpu.memory_space<vmem>>, vector<1x8x8x128xbf16>,
    %cst_50 = arith.constant dense<0.000000e+00> : vector<128xf32>
    %62 = vector.multi_reduction <add>, %58, %cst_50 [0] : vector<64x128xf32> to vector<128xf32>
    %63 = vector.shape_cast %62 : vector<128xf32> to vector<1x128xf32>
    %cst_51 = arith.constant 1.562500e-02 : f32
    %64 = vector.broadcast %cst_51 : f32 to vector<1x128xf32>
    %65 = arith.mulf %63, %64 : vector<1x128xf32>
    %66 = vector.broadcast %65 : vector<1x128xf32> to vector<64x128xf32>
    %67 = arith.subf %58, %66 : vector<64x128xf32>
    %68 = arith.mulf %67, %67 : vector<64x128xf32>
    %cst_52 = arith.constant dense<0.000000e+00> : vector<128xf32>
    %69 = vector.multi_reduction <add>, %68, %cst_52 [0] : vector<64x128xf32> to vector<128xf32>
    %70 = vector.shape_cast %69 : vector<128xf32> to vector<1x128xf32>
    %c0_53 = arith.constant 0 : index
    %c0_54 = arith.constant 0 : index
    %c0_55 = arith.constant 0 : index
    %c0_56 = arith.constant 0 : index
    %71 = vector.load %arg5[%c0_53, %c0_54, %c0_55, %c0_56] : memref<1x1x2x128xf32, #tpu.memory_space<vmem>>, vector<1x1x1x128xf32>
    %72 = vector.shape_cast %71 : vector<1x1x1x128xf32> to vector<1x128xf32>
    %73 = vector.shape_cast %63 : vector<1x128xf32> to vector<1x1x1x128xf32>
    tpu.vector_store %arg5[%c0_53, %c0_54, %c0_55, %c0_56], %73 {strides = array<i32>} : memref<1x1x2x128xf32, #tpu.memory_space<vmem>>, vector<1x1x1x128xf32>,
    %c0_57 = arith.constant 0 : index
    %c0_58 = arith.constant 0 : index
    %c1_59 = arith.constant 1 : index
    %c0_60 = arith.constant 0 : index
    %74 = vector.load %arg5[%c0_57, %c0_58, %c1_59, %c0_60] : memref<1x1x2x128xf32, #tpu.memory_space<vmem>>, vector<1x1x1x128xf32>
    %75 = vector.shape_cast %74 : vector<1x1x1x128xf32> to vector<1x128xf32>
    %76 = vector.shape_cast %70 : vector<1x128xf32> to vector<1x1x1x128xf32>
    tpu.vector_store %arg5[%c0_57, %c0_58, %c1_59, %c0_60], %76 {strides = array<i32>} : memref<1x1x2x128xf32, #tpu.memory_space<vmem>>, vector<1x1x1x128xf32>,
    return
  }
  func.func @transform_0(%arg0: i32, %arg1: i32) -> (i32, i32, i32, i32) {
    %c0_i32 = arith.constant 0 : i32
    %c0_i32_0 = arith.constant 0 : i32
    %c0_i32_1 = arith.constant 0 : i32
    %c0_i32_2 = arith.constant 0 : i32
    return %arg0, %c0_i32, %c0_i32_0, %c0_i32_1 : i32, i32, i32, i32
  }
  func.func @transform_1(%arg0: i32, %arg1: i32) -> (i32, i32, i32) {
    %c0_i32 = arith.constant 0 : i32
    %c0_i32_0 = arith.constant 0 : i32
    %c0_i32_1 = arith.constant 0 : i32
    %c0_i32_2 = arith.constant 0 : i32
    return %c0_i32, %c0_i32_0, %c0_i32_1 : i32, i32, i32
  }
  func.func @transform_2(%arg0: i32, %arg1: i32) -> (i32, i32, i32, i32) {
    %c0_i32 = arith.constant 0 : i32
    %c0_i32_0 = arith.constant 0 : i32
    %c0_i32_1 = arith.constant 0 : i32
    return %arg0, %arg1, %c0_i32, %c0_i32_0 : i32, i32, i32, i32
  }
  func.func @transform_3(%arg0: i32, %arg1: i32) -> (i32, i32, i32, i32) {
    %c0_i32 = arith.constant 0 : i32
    %c0_i32_0 = arith.constant 0 : i32
    %c0_i32_1 = arith.constant 0 : i32
    return %arg0, %arg1, %c0_i32, %c0_i32_0 : i32, i32, i32, i32
  }
}

module attributes {stable_mosaic.version = 11 : i64} {
  func.func @kernel(%arg0: i32, %arg1: i32, %arg2: memref<1x8x8x4xbf16, #tpu.memory_space<vmem>>, %arg3: memref<1x4x128xbf16, #tpu.memory_space<vmem>>, %arg4: memref<1x8x8x128xbf16, #tpu.memory_space<vmem>>, %arg5: memref<1x1x2x128xf32, #tpu.memory_space<vmem>>) attributes {dimension_semantics = [#tpu.dimension_semantics<parallel>, #tpu.dimension_semantics<parallel>], iteration_bounds = array<i64: 2, 1>, scalar_prefetch = 0 : i64, scratch_operands = 0 : i64, tpu.core_type = #tpu.core_type<tc>, window_params = [{transform_indices = @transform_0, window_bounds = array<i64: 1, 8, 8, 4>}, {pipeline_mode = #tpu.pipeline_mode<synchronous>, transform_indices = @transform_1, window_bounds = array<i64: 1, 4, 128>}, {transform_indices = @transform_2, window_bounds = array<i64: 1, 8, 8, 128>}, {transform_indices = @transform_3, window_bounds = array<i64: 1, 1, 2, 128>}]} {
    %c8_i32 = arith.constant 8 : i32
    %0 = arith.muli %arg1, %c8_i32 : i32
    %c0_i32 = arith.constant 0 : i32
    %1 = arith.addi %0, %c0_i32 : i32
    %c0 = arith.constant 0 : index
    %2 = arith.index_cast %1 : i32 to index
    %c0_0 = arith.constant 0 : index
    %c0_1 = arith.constant 0 : index
    %3 = vector.load %arg2[%c0, %2, %c0_0, %c0_1] : memref<1x8x8x4xbf16, #tpu.memory_space<vmem>>, vector<1x8x8x4xbf16>
    %4 = vector.shape_cast %3 : vector<1x8x8x4xbf16> to vector<8x8x4xbf16>
    %5 = arith.extf %4 : vector<8x8x4xbf16> to vector<8x8x4xf32>
    %6 = vector.shape_cast %5 : vector<8x8x4xf32> to vector<64x4xf32>
    %7 = arith.truncf %6 : vector<64x4xf32> to vector<64x4xbf16>
    %c0_2 = arith.constant 0 : index
    %c0_3 = arith.constant 0 : index
    %c0_4 = arith.constant 0 : index
    %8 = vector.load %arg3[%c0_2, %c0_3, %c0_4] : memref<1x4x128xbf16, #tpu.memory_space<vmem>>, vector<1x4x128xbf16>
    %9 = vector.shape_cast %8 : vector<1x4x128xbf16> to vector<4x128xbf16>
    %cst = arith.constant dense<0.000000e+00> : vector<64x128xf32>
    %10 = tpu.matmul %7, %9, %cst {dimension_numbers = #tpu.dot_dimension_numbers<[1], [0], [0], [1], [0, 0, 1, 1], [], []>} : vector<64x4xbf16>, vector<4x128xbf16>, vector<64x128xf32> -> vector<64x128xf32>
    %11 = vector.shape_cast %10 : vector<64x128xf32> to vector<1x8x8x128xf32>
    %12 = arith.truncf %11 : vector<1x8x8x128xf32> to vector<1x8x8x128xbf16>
    %c0_5 = arith.constant 0 : index
    %c0_6 = arith.constant 0 : index
    %c0_7 = arith.constant 0 : index
    %c0_8 = arith.constant 0 : index
    %13 = vector.load %arg4[%c0_5, %c0_6, %c0_7, %c0_8] : memref<1x8x8x128xbf16, #tpu.memory_space<vmem>>, vector<1x8x8x128xbf16>
    tpu.vector_store %arg4[%c0_5, %c0_6, %c0_7, %c0_8], %12 {strides = array<i32>} : memref<1x8x8x128xbf16, #tpu.memory_space<vmem>>, vector<1x8x8x128xbf16>,
    %cst_9 = arith.constant dense<0.000000e+00> : vector<128xf32>
    %14 = vector.multi_reduction <add>, %10, %cst_9 [0] : vector<64x128xf32> to vector<128xf32>
    %15 = vector.shape_cast %14 : vector<128xf32> to vector<1x128xf32>
    %cst_10 = arith.constant 1.562500e-02 : f32
    %16 = vector.broadcast %cst_10 : f32 to vector<1x128xf32>
    %17 = arith.mulf %15, %16 : vector<1x128xf32>
    %18 = vector.broadcast %17 : vector<1x128xf32> to vector<64x128xf32>
    %19 = arith.subf %10, %18 : vector<64x128xf32>
    %20 = arith.mulf %19, %19 : vector<64x128xf32>
    %cst_11 = arith.constant dense<0.000000e+00> : vector<128xf32>
    %21 = vector.multi_reduction <add>, %20, %cst_11 [0] : vector<64x128xf32> to vector<128xf32>
    %22 = vector.shape_cast %21 : vector<128xf32> to vector<1x128xf32>
    %c0_12 = arith.constant 0 : index
    %c0_13 = arith.constant 0 : index
    %c0_14 = arith.constant 0 : index
    %c0_15 = arith.constant 0 : index
    %23 = vector.load %arg5[%c0_12, %c0_13, %c0_14, %c0_15] : memref<1x1x2x128xf32, #tpu.memory_space<vmem>>, vector<1x1x1x128xf32>
    %24 = vector.shape_cast %23 : vector<1x1x1x128xf32> to vector<1x128xf32>
    %25 = vector.shape_cast %15 : vector<1x128xf32> to vector<1x1x1x128xf32>
    tpu.vector_store %arg5[%c0_12, %c0_13, %c0_14, %c0_15], %25 {strides = array<i32>} : memref<1x1x2x128xf32, #tpu.memory_space<vmem>>, vector<1x1x1x128xf32>,
    %c0_16 = arith.constant 0 : index
    %c0_17 = arith.constant 0 : index
    %c1 = arith.constant 1 : index
    %c0_18 = arith.constant 0 : index
    %26 = vector.load %arg5[%c0_16, %c0_17, %c1, %c0_18] : memref<1x1x2x128xf32, #tpu.memory_space<vmem>>, vector<1x1x1x128xf32>
    %27 = vector.shape_cast %26 : vector<1x1x1x128xf32> to vector<1x128xf32>
    %28 = vector.shape_cast %22 : vector<1x128xf32> to vector<1x1x1x128xf32>
    tpu.vector_store %arg5[%c0_16, %c0_17, %c1, %c0_18], %28 {strides = array<i32>} : memref<1x1x2x128xf32, #tpu.memory_space<vmem>>, vector<1x1x1x128xf32>,
    return
  }
  func.func @transform_0(%arg0: i32, %arg1: i32) -> (i32, i32, i32, i32) {
    %c0_i32 = arith.constant 0 : i32
    %c0_i32_0 = arith.constant 0 : i32
    %c0_i32_1 = arith.constant 0 : i32
    %c0_i32_2 = arith.constant 0 : i32
    return %arg0, %c0_i32, %c0_i32_0, %c0_i32_1 : i32, i32, i32, i32
  }
  func.func @transform_1(%arg0: i32, %arg1: i32) -> (i32, i32, i32) {
    %c0_i32 = arith.constant 0 : i32
    %c0_i32_0 = arith.constant 0 : i32
    %c0_i32_1 = arith.constant 0 : i32
    %c0_i32_2 = arith.constant 0 : i32
    return %c0_i32, %c0_i32_0, %c0_i32_1 : i32, i32, i32
  }
  func.func @transform_2(%arg0: i32, %arg1: i32) -> (i32, i32, i32, i32) {
    %c0_i32 = arith.constant 0 : i32
    %c0_i32_0 = arith.constant 0 : i32
    %c0_i32_1 = arith.constant 0 : i32
    return %arg0, %arg1, %c0_i32, %c0_i32_0 : i32, i32, i32, i32
  }
  func.func @transform_3(%arg0: i32, %arg1: i32) -> (i32, i32, i32, i32) {
    %c0_i32 = arith.constant 0 : i32
    %c0_i32_0 = arith.constant 0 : i32
    %c0_i32_1 = arith.constant 0 : i32
    return %arg0, %arg1, %c0_i32, %c0_i32_0 : i32, i32, i32, i32
  }
}

module attributes {stable_mosaic.version = 11 : i64} {
  func.func @kernel(%arg0: i32, %arg1: i32, %arg2: memref<1x8x8x128xbf16, #tpu.memory_space<vmem>>, %arg3: memref<1x1x1x128xf32, #tpu.memory_space<vmem>>, %arg4: memref<1x1x1x128xf32, #tpu.memory_space<vmem>>, %arg5: memref<1x8x8x128xbf16, #tpu.memory_space<vmem>>) attributes {dimension_semantics = [#tpu.dimension_semantics<parallel>, #tpu.dimension_semantics<parallel>], iteration_bounds = array<i64: 2, 1>, scalar_prefetch = 0 : i64, scratch_operands = 0 : i64, tpu.core_type = #tpu.core_type<tc>, window_params = [{transform_indices = @transform_0, window_bounds = array<i64: 1, 8, 8, 128>}, {pipeline_mode = #tpu.pipeline_mode<synchronous>, transform_indices = @transform_1, window_bounds = array<i64: 1, 1, 1, 128>}, {pipeline_mode = #tpu.pipeline_mode<synchronous>, transform_indices = @transform_2, window_bounds = array<i64: 1, 1, 1, 128>}, {transform_indices = @transform_3, window_bounds = array<i64: 1, 8, 8, 128>}]} {
    %c0 = arith.constant 0 : index
    %c0_0 = arith.constant 0 : index
    %c0_1 = arith.constant 0 : index
    %c0_2 = arith.constant 0 : index
    %0 = vector.load %arg2[%c0, %c0_0, %c0_1, %c0_2] : memref<1x8x8x128xbf16, #tpu.memory_space<vmem>>, vector<1x8x8x128xbf16>
    %1 = arith.extf %0 : vector<1x8x8x128xbf16> to vector<1x8x8x128xf32>
    %c0_3 = arith.constant 0 : index
    %c0_4 = arith.constant 0 : index
    %c0_5 = arith.constant 0 : index
    %c0_6 = arith.constant 0 : index
    %2 = vector.load %arg3[%c0_3, %c0_4, %c0_5, %c0_6] : memref<1x1x1x128xf32, #tpu.memory_space<vmem>>, vector<1x1x1x128xf32>
    %3 = vector.broadcast %2 : vector<1x1x1x128xf32> to vector<1x8x8x128xf32>
    %4 = arith.mulf %1, %3 : vector<1x8x8x128xf32>
    %c0_7 = arith.constant 0 : index
    %c0_8 = arith.constant 0 : index
    %c0_9 = arith.constant 0 : index
    %c0_10 = arith.constant 0 : index
    %5 = vector.load %arg4[%c0_7, %c0_8, %c0_9, %c0_10] : memref<1x1x1x128xf32, #tpu.memory_space<vmem>>, vector<1x1x1x128xf32>
    %6 = vector.broadcast %5 : vector<1x1x1x128xf32> to vector<1x8x8x128xf32>
    %7 = arith.addf %4, %6 : vector<1x8x8x128xf32>
    %8 = arith.truncf %7 : vector<1x8x8x128xf32> to vector<1x8x8x128xbf16>
    %c0_11 = arith.constant 0 : index
    %c0_12 = arith.constant 0 : index
    %c0_13 = arith.constant 0 : index
    %c0_14 = arith.constant 0 : index
    %9 = vector.load %arg5[%c0_11, %c0_12, %c0_13, %c0_14] : memref<1x8x8x128xbf16, #tpu.memory_space<vmem>>, vector<1x8x8x128xbf16>
    tpu.vector_store %arg5[%c0_11, %c0_12, %c0_13, %c0_14], %8 {strides = array<i32>} : memref<1x8x8x128xbf16, #tpu.memory_space<vmem>>, vector<1x8x8x128xbf16>,
    return
  }
  func.func @transform_0(%arg0: i32, %arg1: i32) -> (i32, i32, i32, i32) {
    %c0_i32 = arith.constant 0 : i32
    %c0_i32_0 = arith.constant 0 : i32
    %c0_i32_1 = arith.constant 0 : i32
    return %arg0, %arg1, %c0_i32, %c0_i32_0 : i32, i32, i32, i32
  }
  func.func @transform_1(%arg0: i32, %arg1: i32) -> (i32, i32, i32, i32) {
    %c0_i32 = arith.constant 0 : i32
    %c0_i32_0 = arith.constant 0 : i32
    %c0_i32_1 = arith.constant 0 : i32
    %c0_i32_2 = arith.constant 0 : i32
    %c0_i32_3 = arith.constant 0 : i32
    return %c0_i32, %c0_i32_0, %c0_i32_1, %c0_i32_2 : i32, i32, i32, i32
  }
  func.func @transform_2(%arg0: i32, %arg1: i32) -> (i32, i32, i32, i32) {
    %c0_i32 = arith.constant 0 : i32
    %c0_i32_0 = arith.constant 0 : i32
    %c0_i32_1 = arith.constant 0 : i32
    %c0_i32_2 = arith.constant 0 : i32
    %c0_i32_3 = arith.constant 0 : i32
    return %c0_i32, %c0_i32_0, %c0_i32_1, %c0_i32_2 : i32, i32, i32, i32
  }
  func.func @transform_3(%arg0: i32, %arg1: i32) -> (i32, i32, i32, i32) {
    %c0_i32 = arith.constant 0 : i32
    %c0_i32_0 = arith.constant 0 : i32
    %c0_i32_1 = arith.constant 0 : i32
    return %arg0, %arg1, %c0_i32, %c0_i32_0 : i32, i32, i32, i32
  }
}

module attributes {stable_mosaic.version = 11 : i64} {
  func.func @kernel(%arg0: i32, %arg1: i32, %arg2: memref<1x8x8x128xbf16, #tpu.memory_space<vmem>>, %arg3: memref<1x1x1x128xf32, #tpu.memory_space<vmem>>, %arg4: memref<1x1x1x128xf32, #tpu.memory_space<vmem>>, %arg5: memref<1x8x8x128xbf16, #tpu.memory_space<vmem>>, %arg6: memref<1x8x8x128xbf16, #tpu.memory_space<vmem>>) attributes {dimension_semantics = [#tpu.dimension_semantics<parallel>, #tpu.dimension_semantics<parallel>], iteration_bounds = array<i64: 2, 1>, scalar_prefetch = 0 : i64, scratch_operands = 0 : i64, tpu.core_type = #tpu.core_type<tc>, window_params = [{transform_indices = @transform_0, window_bounds = array<i64: 1, 8, 8, 128>}, {pipeline_mode = #tpu.pipeline_mode<synchronous>, transform_indices = @transform_1, window_bounds = array<i64: 1, 1, 1, 128>}, {pipeline_mode = #tpu.pipeline_mode<synchronous>, transform_indices = @transform_2, window_bounds = array<i64: 1, 1, 1, 128>}, {transform_indices = @transform_3, window_bounds = array<i64: 1, 8, 8, 128>}, {transform_indices = @transform_4, window_bounds = array<i64: 1, 8, 8, 128>}]} {
    %c0 = arith.constant 0 : index
    %c0_0 = arith.constant 0 : index
    %c0_1 = arith.constant 0 : index
    %c0_2 = arith.constant 0 : index
    %0 = vector.load %arg2[%c0, %c0_0, %c0_1, %c0_2] : memref<1x8x8x128xbf16, #tpu.memory_space<vmem>>, vector<1x8x8x128xbf16>
    %1 = arith.extf %0 : vector<1x8x8x128xbf16> to vector<1x8x8x128xf32>
    %c0_3 = arith.constant 0 : index
    %c0_4 = arith.constant 0 : index
    %c0_5 = arith.constant 0 : index
    %c0_6 = arith.constant 0 : index
    %2 = vector.load %arg3[%c0_3, %c0_4, %c0_5, %c0_6] : memref<1x1x1x128xf32, #tpu.memory_space<vmem>>, vector<1x1x1x128xf32>
    %3 = vector.broadcast %2 : vector<1x1x1x128xf32> to vector<1x8x8x128xf32>
    %4 = arith.mulf %1, %3 : vector<1x8x8x128xf32>
    %c0_7 = arith.constant 0 : index
    %c0_8 = arith.constant 0 : index
    %c0_9 = arith.constant 0 : index
    %c0_10 = arith.constant 0 : index
    %5 = vector.load %arg4[%c0_7, %c0_8, %c0_9, %c0_10] : memref<1x1x1x128xf32, #tpu.memory_space<vmem>>, vector<1x1x1x128xf32>
    %6 = vector.broadcast %5 : vector<1x1x1x128xf32> to vector<1x8x8x128xf32>
    %7 = arith.addf %4, %6 : vector<1x8x8x128xf32>
    %c0_11 = arith.constant 0 : index
    %c0_12 = arith.constant 0 : index
    %c0_13 = arith.constant 0 : index
    %c0_14 = arith.constant 0 : index
    %8 = vector.load %arg5[%c0_11, %c0_12, %c0_13, %c0_14] : memref<1x8x8x128xbf16, #tpu.memory_space<vmem>>, vector<1x8x8x128xbf16>
    %9 = arith.extf %8 : vector<1x8x8x128xbf16> to vector<1x8x8x128xf32>
    %10 = arith.addf %7, %9 : vector<1x8x8x128xf32>
    %cst = arith.constant 0.000000e+00 : f32
    %11 = vector.broadcast %cst : f32 to vector<1x8x8x128xf32>
    %12 = arith.maximumf %10, %11 : vector<1x8x8x128xf32>
    %13 = arith.truncf %12 : vector<1x8x8x128xf32> to vector<1x8x8x128xbf16>
    %c0_15 = arith.constant 0 : index
    %c0_16 = arith.constant 0 : index
    %c0_17 = arith.constant 0 : index
    %c0_18 = arith.constant 0 : index
    %14 = vector.load %arg6[%c0_15, %c0_16, %c0_17, %c0_18] : memref<1x8x8x128xbf16, #tpu.memory_space<vmem>>, vector<1x8x8x128xbf16>
    tpu.vector_store %arg6[%c0_15, %c0_16, %c0_17, %c0_18], %13 {strides = array<i32>} : memref<1x8x8x128xbf16, #tpu.memory_space<vmem>>, vector<1x8x8x128xbf16>,
    return
  }
  func.func @transform_0(%arg0: i32, %arg1: i32) -> (i32, i32, i32, i32) {
    %c0_i32 = arith.constant 0 : i32
    %c0_i32_0 = arith.constant 0 : i32
    %c0_i32_1 = arith.constant 0 : i32
    return %arg0, %arg1, %c0_i32, %c0_i32_0 : i32, i32, i32, i32
  }
  func.func @transform_1(%arg0: i32, %arg1: i32) -> (i32, i32, i32, i32) {
    %c0_i32 = arith.constant 0 : i32
    %c0_i32_0 = arith.constant 0 : i32
    %c0_i32_1 = arith.constant 0 : i32
    %c0_i32_2 = arith.constant 0 : i32
    %c0_i32_3 = arith.constant 0 : i32
    return %c0_i32, %c0_i32_0, %c0_i32_1, %c0_i32_2 : i32, i32, i32, i32
  }
  func.func @transform_2(%arg0: i32, %arg1: i32) -> (i32, i32, i32, i32) {
    %c0_i32 = arith.constant 0 : i32
    %c0_i32_0 = arith.constant 0 : i32
    %c0_i32_1 = arith.constant 0 : i32
    %c0_i32_2 = arith.constant 0 : i32
    %c0_i32_3 = arith.constant 0 : i32
    return %c0_i32, %c0_i32_0, %c0_i32_1, %c0_i32_2 : i32, i32, i32, i32
  }
  func.func @transform_3(%arg0: i32, %arg1: i32) -> (i32, i32, i32, i32) {
    %c0_i32 = arith.constant 0 : i32
    %c0_i32_0 = arith.constant 0 : i32
    %c0_i32_1 = arith.constant 0 : i32
    return %arg0, %arg1, %c0_i32, %c0_i32_0 : i32, i32, i32, i32
  }
  func.func @transform_4(%arg0: i32, %arg1: i32) -> (i32, i32, i32, i32) {
    %c0_i32 = arith.constant 0 : i32
    %c0_i32_0 = arith.constant 0 : i32
    %c0_i32_1 = arith.constant 0 : i32
    return %arg0, %arg1, %c0_i32, %c0_i32_0 : i32, i32, i32, i32
  }
}

</mosaic_0001>

<bundles_post_ra>
// kernel: block_forward.13
= control target key start
LH: loop header
LB: loop body
LE: loop exit
PB: predicated region body
PF: predicated region fallthrough
CT: control target
= control target key end

     0   :  { %s492_s12 = smov 0   ;;  %s494_s13 = smov 0   ;;  %s538_s0 = inlined_call_operand.vmem [shape: bf16[2,8,8,128], index: 0, kind: input, shape index: {}]   ;;  %s539_s1 = inlined_call_operand.vmem [shape: f32[1,1,1,128], index: 1, kind: input, shape index: {}]   ;;  %s540_s2 = inlined_call_operand.vmem [shape: f32[1,1,1,128], index: 2, kind: input, shape index: {}]   ;;  %s541_s3 = inlined_call_operand.vmem [shape: bf16[2,8,8,128], index: 3, kind: output, shape index: {}]  }
   0x1   :  { %s496_s14 = smov 0  }
   0x2 LB: > { %s25_s15 = sadd.s32 1, %s466_s13  ;;  %p371_p0 = scmp.ge.s32.totalorder %s470_s14, 1  ;;  %s470_s14 = sphi %s496_s14, %s13_s14   ;;  %s466_s13 = sphi %s494_s13, %s543_s13   ;;  %s462_s12 = sphi %s492_s12, %s542_s12  }
   0x3   : > { %p27_p1 = scmp.ge.s32.totalorder %s25_s15, 2  ;;  %p158_p2 = scmp.lt.s32.totalorder %s470_s14, 3 }
   0x5   : > { %s545_s15 = smov (%p27_p1, %s25_s15), 0  ;;  %p159_p3 = pnand %p371_p0, %p158_p2 }
   0x6   : > { %p191_p4 = scmp.lt.s32.totalorder (!%p159_p3), %s462_s12, 1 }
   0x7   : > { %162 = sbr.rel (%p159_p3) target bundleno = 28 (0x1c), region = 32 }
   0xc   : > { %s547_s12 = smov (!%p191_p4, %s462_s12), 1  ;;  %v376_v0 = vld [vmem:[%s539_s1] ss:$0 sm:$0xff] }
   0xd   : > { %s380_s16 = sshll.u32 %s547_s12, 5  ;;  %v377_v9 = vld [vmem:[%s540_s2] ss:$0 sm:$0xff] }
   0xe   : > { %s198_s19 = scalar_lea.vmem %s538_s0, %s380_s16  ;;  %s208_s26 = scalar_lea.vmem %s541_s3, %s380_s16 }
   0xf   : > { %v383_v1 = vld [vmem:[%s198_s19] sm:$0xff]   ;;  %v418_v2 = vld [vmem:[%s198_s19 + $0x8] sm:$0xff]   ;;  %v419_v3 = vld [vmem:[%s198_s19 + $0x10] sm:$0xff]  }
  0x10   : > { %v384_v4 = vunpack.c.l.bf16 %v383_v1  ;;  %v385_v5 = vunpack.c.h.bf16 %v383_v1  ;;  %v388_v6 = vunpack.c.l.bf16 %v418_v2  ;;  %v389_v7 = vunpack.c.h.bf16 %v418_v2  ;;  %v420_v8 = vld [vmem:[%s198_s19 + $0x18] sm:$0xff]  }
  0x11   : > { %v392_v10 = vunpack.c.l.bf16 %v419_v3  ;;  %v393_v11 = vunpack.c.h.bf16 %v419_v3  ;;  %v396_v12 = vunpack.c.l.bf16 %v420_v8  ;;  %v397_v13 = vunpack.c.h.bf16 %v420_v8 }
  0x12   : > { %v233_v14 = vmul.f32 %v384_v4, %v376_v0  ;;  %v234_v15 = vmul.f32 %v385_v5, %v376_v0  ;;  %v235_v16 = vmul.f32 %v388_v6, %v376_v0  ;;  %v236_v17 = vmul.f32 %v389_v7, %v376_v0 }
  0x13   : > { %v237_v18 = vmul.f32 %v392_v10, %v376_v0  ;;  %v238_v19 = vmul.f32 %v393_v11, %v376_v0  ;;  %v239_v20 = vmul.f32 %v396_v12, %v376_v0  ;;  %v240_v21 = vmul.f32 %v397_v13, %v376_v0 }
  0x14   : > { %v248_v22 = vadd.f32 %v377_v9, %v233_v14  ;;  %v249_v23 = vadd.f32 %v377_v9, %v234_v15  ;;  %v250_v24 = vadd.f32 %v377_v9, %v235_v16  ;;  %v251_v25 = vadd.f32 %v377_v9, %v236_v17 }
  0x15   : > { %v252_v26 = vadd.f32 %v377_v9, %v237_v18  ;;  %v253_v27 = vadd.f32 %v377_v9, %v238_v19  ;;  %v254_v28 = vadd.f32 %v377_v9, %v239_v20  ;;  %v255_v29 = vadd.f32 %v377_v9, %v240_v21 }
  0x16   : > { %v256_v30 = vmax.f32 %v248_v22, 0.0  ;;  %v257_v31 = vmax.f32 %v249_v23, 0.0  ;;  %v258_v32 = vmax.f32 %v250_v24, 0.0  ;;  %v259_v33 = vmax.f32 %v251_v25, 0.0 }
  0x17   : > { %v260_v34 = vmax.f32 %v252_v26, 0.0  ;;  %v261_v35 = vmax.f32 %v253_v27, 0.0  ;;  %v262_v36 = vmax.f32 %v254_v28, 0.0  ;;  %v263_v37 = vmax.f32 %v255_v29, 0.0 }
  0x18   : > { %v401_v38 = vpack.c.bf16 %v257_v31, %v256_v30  ;;  %v406_v39 = vpack.c.bf16 %v259_v33, %v258_v32 }
  0x19   : > { %v411_v40 = vpack.c.bf16 %v261_v35, %v260_v34  ;;  %v416_v41 = vpack.c.bf16 %v263_v37, %v262_v36 }
  0x1a   : > { %402 = vst [vmem:[%s208_s26] sm:$0xff] %v401_v38   ;;  %421 = vst [vmem:[%s208_s26 + $0x8] sm:$0xff] %v406_v39  }
  0x1b   : > { %422 = vst [vmem:[%s208_s26 + $0x10] sm:$0xff] %v411_v40   ;;  %423 = vst [vmem:[%s208_s26 + $0x18] sm:$0xff] %v416_v41  }
  0x1c PF: > { %s13_s14 = sadd.s32 1, %s470_s14   ;;  %s542_s12 = smov %s466_s13 }
  0x1d   : > { %p10_p5 = scmp.ge.s32.totalorder %s13_s14, 4   ;;  %s543_s13 = smov %s545_s15 }
  0x1f   :  { %12 = sbr.rel (!%p10_p5) target bundleno = 2 (0x2), region = 62 }

// kernel: block_forward.12
= control target key start
LH: loop header
LB: loop body
LE: loop exit
PB: predicated region body
PF: predicated region fallthrough
CT: control target
= control target key end

     0   :  { %s1194_s12 = smov 0   ;;  %s1196_s13 = smov 0   ;;  %s1327_s0 = inlined_call_operand.vmem [shape: bf16[2,9,9,16], index: 0, kind: input, shape index: {}]   ;;  %s1328_s1 = inlined_call_operand.vmem [shape: bf16[2,32,128], index: 1, kind: input, shape index: {}]   ;;  %s1329_s2 = inlined_call_operand.vmem [shape: bf16[2,8,8,128], index: 2, kind: output, shape index: {0}]   ;;  %s1330_s3 = inlined_call_operand.vmem [shape: f32[2,1,2,128], index: 3, kind: output, shape index: {1}]  }
   0x1   :  { %s1198_s14 = smov 0  }
   0x2 LB: > { %s26_s15 = sadd.s32 1, %s1168_s13  ;;  %p966_p0 = scmp.ge.s32.totalorder %s1172_s14, 1  ;;  %s1172_s14 = sphi %s1198_s14, %s14_s14   ;;  %s1168_s13 = sphi %s1196_s13, %s1332_s13   ;;  %s1164_s12 = sphi %s1194_s12, %s1331_s12  }
   0x3   : > { %p28_p1 = scmp.ge.s32.totalorder %s26_s15, 2  ;;  %p156_p2 = scmp.lt.s32.totalorder %s1172_s14, 3 }
   0x5   : > { %s1334_s15 = smov (%p28_p1, %s26_s15), 0  ;;  %p157_p3 = pnand %p966_p0, %p156_p2 }
   0x6   : > { %p191_p4 = scmp.lt.s32.totalorder (!%p157_p3), %s1164_s12, 1 }
   0x7   : > { %160 = sbr.rel (%p157_p3) target bundleno = 305 (0x131), region = 28 }
   0xc   : > { %v1138_v0 = vld [vmem:[%s1328_s1] sm:$0xff]   ;;  %v1139_v1 = vld [vmem:[%s1328_s1 + $0x8] sm:$0xff]   ;;  %s1336_s12 = smov (!%p191_p4, %s1164_s12), 1  ;;  %v1223_v2 = vld [vmem:[%s1328_s1 + $0x10] sm:$0xff]   ;;  %vm317_vm0 = vcmask 130048   ;;  %vm272_vm1 = vcmask 1046528  }
   0xd   : > { %1083 = vmatprep.subr.bf16.mxu1 %v1138_v0  ;;  %1073 = vmatprep.subr.bf16.mxu0 %v1139_v1  ;;  %s1113_s22 = smul.u32 72, %s1336_s12  ;;  %v1143_v3 = vld [vmem:[%s1328_s1 + $0x18] sm:$0xff]   ;;  %s1029_s28 = sshll.u32 %s1336_s12, 5 }
   0xe   : > { %1084 = vmatpush3.bf16.msra.mxu1 %v1138_v0  ;;  %1074 = vmatpush3.bf16.msra.mxu0 %v1139_v1  ;;  %s1304_s4 = scalar_lea.vmem %s1329_s2, %s1029_s28  ;;  %s970_s5 = sshll.u32 %s1336_s12, 1 }
   0xf   : > { %1093 = vmatprep.subr.bf16.mxu0 %v1223_v2  ;;  %s1233_s27 = scalar_lea.vmem %s1327_s0, %s1113_s22  ;;  %1103 = vmatprep.subr.bf16.mxu1 %v1143_v3  ;;  %s1314_s8 = scalar_lea.vmem %s1330_s3, %s970_s5 }
  0x10   : > { %v218_v4 = vld [vmem:[%s1233_s27] sm:$0xf]  ;;  %v219_v5 = vld [vmem:[%s1233_s27 + $0x8] sm:$0xf]  ;;  %v220_v6 = vld [vmem:[%s1233_s27 + $0x10] sm:$0xf] }
  0x11   : > { %v226_v7 = vunpack.c.l.bf16 %v218_v4  ;;  %v227_v8 = vunpack.c.l.bf16 %v219_v5  ;;  %v971_v9 = vcombine.low %v218_v4, %v219_v5  ;;  %v221_v10 = vld [vmem:[%s1233_s27 + $0x18] sm:$0xf]  ;;  %v228_v11 = vunpack.c.l.bf16 %v220_v6  ;;  %v240_v12 = vld [vmem:[%s1233_s27 + $0x4] sm:$0x1]  ;;  %v241_v13 = vld [vmem:[%s1233_s27 + $0xc] sm:$0x1] }
  0x12   : > { %v229_v14 = vunpack.c.l.bf16 %v221_v10  ;;  %v972_v15 = vcombine.low %v220_v6, %v221_v10  ;;  %v248_v16 = vunpack.c.l.bf16 %v240_v12  ;;  %v249_v17 = vunpack.c.l.bf16 %v241_v13  ;;  %v242_v18 = vld [vmem:[%s1233_s27 + $0x14] sm:$0x1]  ;;  %v243_v19 = vld [vmem:[%s1233_s27 + $0x1c] sm:$0x1]  ;;  %v222_v20 = vld [vmem:[%s1233_s27 + $0x20] sm:$0xf] }
  0x13   : > { %v273_v21 = vrot.slane %v226_v7, 1  ;;  %v276_v22 = vrot.slane %v227_v8, 1  ;;  %1085 = vmatprep.mubr.msk.bf16.mxu1 %vm317_vm0, %v971_v9  ;;  %v279_v23 = vrot.slane %v228_v11, 1  ;;  %v250_v24 = vunpack.c.l.bf16 %v242_v18  ;;  %v223_v25 = vld [vmem:[%s1233_s27 + $0x28] sm:$0xf] }
  0x14   : > { %v282_v26 = vrot.slane %v229_v14, 1  ;;  %1086 = vmatmul.mubr.msk.bf16.vlgmr.msra.gmra.mxu1 %vm317_vm0, %v972_v15  ;;  %v274_v27 = vrot.slane %v248_v16, 1  ;;  %v277_v28 = vrot.slane %v249_v17, 1  ;;  %v251_v29 = vunpack.c.l.bf16 %v243_v19  ;;  %v224_v30 = vld [vmem:[%s1233_s27 + $0x30] sm:$0xf] }
  0x15   : > { %v280_v31 = vrot.slane %v250_v24, 1  ;;  %1104 = vmatpush3.bf16.msra.mxu1 %v1143_v3  ;;  %v230_v32 = vunpack.c.l.bf16 %v222_v20  ;;  %v231_v33 = vunpack.c.l.bf16 %v223_v25  ;;  %v973_v34 = vcombine.low %v222_v20, %v223_v25  ;;  %v225_v35 = vld [vmem:[%s1233_s27 + $0x38] sm:$0xf]  ;;  %v244_v36 = vld [vmem:[%s1233_s27 + $0x24] sm:$0x1] }
  0x16   : > { %v275_v37 = vsel %vm272_vm1, %v273_v21, %v274_v27  ;;  %v278_v38 = vsel %vm272_vm1, %v276_v22, %v277_v28  ;;  %v283_v39 = vrot.slane %v251_v29, 1  ;;  %v232_v40 = vunpack.c.l.bf16 %v224_v30  ;;  %v245_v41 = vld [vmem:[%s1233_s27 + $0x2c] sm:$0x1]  ;;  %v246_v42 = vld [vmem:[%s1233_s27 + $0x34] sm:$0x1] }
  0x17   : > { %v305_v43 = vpack.c.bf16 %v278_v38, %v275_v37  ;;  %v281_v44 = vsel %vm272_vm1, %v279_v23, %v280_v31  ;;  %v285_v45 = vrot.slane %v230_v32, 1  ;;  %v288_v46 = vrot.slane %v231_v33, 1  ;;  %1089 = vmatprep.mubr.msk.bf16.mxu1 %vm317_vm0, %v973_v34  ;;  %v247_v47 = vld [vmem:[%s1233_s27 + $0x3c] sm:$0x1]  ;;  %v1004_v48 = vld [vmem:[%s1233_s27 + $0x8] ss:$8 sps:$4 sm:$0xff]  }
  0x18   : > { %v284_v49 = vsel %vm272_vm1, %v282_v26, %v283_v39  ;;  %v233_v50 = vunpack.c.l.bf16 %v225_v35  ;;  %v974_v51 = vcombine.low %v224_v30, %v225_v35  ;;  %v291_v52 = vrot.slane %v232_v40, 1  ;;  %v1005_v53 = vld [vmem:[%s1233_s27 + $0xc] sm:$0x1]  ;;  %v1007_v58 = vld [vmem:[%s1233_s27 + $0x14] sm:$0x1] }
  0x19   : > { %1075 = vmatprep.mubr.msk.bf16.mxu0 %vm317_vm0, %v305_v43  ;;  %v306_v54 = vpack.c.bf16 %v284_v49, %v281_v44  ;;  %v252_v55 = vunpack.c.l.bf16 %v244_v36  ;;  %v253_v56 = vunpack.c.l.bf16 %v245_v41  ;;  %v254_v57 = vunpack.c.l.bf16 %v246_v42  ;;  %v1008_v63 = vld [vmem:[%s1233_s27 + $0x18] ss:$8 sps:$4 sm:$0xff]   ;;  %v1009_v5 = vld [vmem:[%s1233_s27 + $0x1c] sm:$0x1]  ;;  %v1011_v14 = vld [vmem:[%s1233_s27 + $0x24] sm:$0x1] }
  0x1a   : > { %v294_v59 = vrot.slane %v233_v50, 1  ;;  %v255_v60 = vunpack.c.l.bf16 %v247_v47  ;;  %v612_v61 = vunpack.c.l.bf16 %v1004_v48  ;;  %v613_v62 = vunpack.c.l.bf16 %v1005_v53  ;;  %v1012_v18 = vld [vmem:[%s1233_s27 + $0x28] ss:$8 sps:$4 sm:$0xff]   ;;  %v1013_v19 = vld [vmem:[%s1233_s27 + $0x2c] sm:$0x1] }
  0x1b   : > { %1076 = vmatmul.mubr.msk.bf16.vlgmr.msra.gmra.mxu0 %vm317_vm0, %v306_v54  ;;  %v286_v0 = vrot.slane %v252_v55, 1  ;;  %v289_v1 = vrot.slane %v253_v56, 1  ;;  %v292_v3 = vrot.slane %v254_v57, 1  ;;  %v614_v4 = vunpack.c.h.bf16 %v1004_v48  ;;  %v1146_v24 = vld [vmem:[%s1233_s27 + $0x8] ss:$8 sps:$4 sm:$0xff]  }
  0x1c   : > { %1094 = vmatpush3.bf16.msra.mxu0 %v1223_v2  ;;  %1090 = vmatmul.mubr.msk.bf16.gmra.mxu1 %vm317_vm0, %v974_v51  ;;  %v295_v6 = vrot.slane %v255_v60, 1  ;;  %v615_v7 = vunpack.c.l.bf16 %v1007_v58  ;;  %v644_v8 = vrot.slane %v612_v61, 1  ;;  %v645_v9 = vrot.slane %v613_v62, 1  ;;  %v1015_v25 = vld [vmem:[%s1233_s27 + $0x34] sm:$0x1] }
  0x1d   : > { %v287_v10 = vsel %vm272_vm1, %v285_v45, %v286_v0  ;;  %v290_v11 = vsel %vm272_vm1, %v288_v46, %v289_v1  ;;  %v293_v12 = vsel %vm272_vm1, %v291_v52, %v292_v3  ;;  %v647_v13 = vrot.slane %v614_v4, 1  ;;  %v1016_v26 = vld [vmem:[%s1233_s27 + $0x38] ss:$8 sps:$4 sm:$0xff]   ;;  %v1017_v31 = vld [vmem:[%s1233_s27 + $0x3c] sm:$0x1] }
  0x1e   : > { %v307_v15 = vpack.c.bf16 %v290_v11, %v287_v10  ;;  %v296_v2 = vsel %vm272_vm1, %v294_v59, %v295_v6  ;;  %v646_v16 = vsel %vm272_vm1, %v644_v8, %v645_v9  ;;  %v648_v17 = vrot.slane %v615_v7, 1  ;;  %v1019_v36 = vld [vmem:[%s1233_s27 + $0x44] sm:$0x1]  ;;  %v1147_v56 = vld [vmem:[%s1233_s27 + $0x18] ss:$8 sps:$4 sm:$0xff]  }
  0x1f   : > { %v308_v20 = vpack.c.bf16 %v296_v2, %v293_v12  ;;  %v616_v21 = vunpack.c.l.bf16 %v1008_v63  ;;  %v617_v22 = vunpack.c.l.bf16 %v1009_v5  ;;  %v618_v23 = vunpack.c.h.bf16 %v1008_v63  ;;  %v1148_v60 = vld [vmem:[%s1233_s27 + $0x28] ss:$8 sps:$4 sm:$0xff]   ;;  %v1149_v63 = vld [vmem:[%s1233_s27 + $0x38] ss:$8 sps:$4 sm:$0xff]  }
  0x20   : > { %1079 = vmatprep.mubr.msk.bf16.mxu0 %vm317_vm0, %v307_v15  ;;  %v649_v27 = vsel %vm272_vm1, %v647_v13, %v648_v17  ;;  %v619_v28 = vunpack.c.l.bf16 %v1011_v14  ;;  %v620_v29 = vunpack.c.l.bf16 %v1012_v18  ;;  %v621_v30 = vunpack.c.l.bf16 %v1013_v19 }
  0x21   : > { %v676_v32 = vpack.c.bf16 %v649_v27, %v646_v16  ;;  %v650_v33 = vrot.slane %v616_v21, 1  ;;  %v651_v34 = vrot.slane %v617_v22, 1  ;;  %v653_v35 = vrot.slane %v618_v23, 1 }
  0x22   : > { %v654_v37 = vrot.slane %v619_v28, 1  ;;  %v622_v38 = vunpack.c.h.bf16 %v1012_v18  ;;  %v623_v39 = vunpack.c.l.bf16 %v1015_v25  ;;  %v656_v40 = vrot.slane %v620_v29, 1 }
  0x23   : > { %1080 = vmatmul.mubr.msk.bf16.gmra.mxu0 %vm317_vm0, %v308_v20  ;;  %1105 = vmatprep.mubr.msk.bf16.mxu1 %vm317_vm0, %v676_v32  ;;  %v652_v41 = vsel %vm272_vm1, %v650_v33, %v651_v34  ;;  %v657_v42 = vrot.slane %v621_v30, 1  ;;  %v624_v43 = vunpack.c.l.bf16 %v1016_v26  ;;  %v625_v44 = vunpack.c.l.bf16 %v1017_v31 }
  0x24   : > { %v655_v45 = vsel %vm272_vm1, %v653_v35, %v654_v37  ;;  %1095 = vmatprep.mubr.msk.bf16.mxu0 %vm317_vm0, %v1146_v24  ;;  %v659_v46 = vrot.slane %v622_v38, 1  ;;  %v660_v47 = vrot.slane %v623_v39, 1  ;;  %v626_v48 = vunpack.c.h.bf16 %v1016_v26 }
  0x25   : > { %v677_v49 = vpack.c.bf16 %v655_v45, %v652_v41  ;;  %v658_v50 = vsel %vm272_vm1, %v656_v40, %v657_v42  ;;  %v627_v51 = vunpack.c.l.bf16 %v1019_v36  ;;  %v662_v52 = vrot.slane %v624_v43, 1 }
  0x26   : > { %v661_v53 = vsel %vm272_vm1, %v659_v46, %v660_v47  ;;  %v663_v54 = vrot.slane %v625_v44, 1  ;;  %v665_v55 = vrot.slane %v626_v48, 1 }
  0x27   : > { %1106 = vmatmul.mubr.msk.bf16.vlgmr.msra.gmra.mxu1 %vm317_vm0, %v677_v49  ;;  %v678_v57 = vpack.c.bf16 %v661_v53, %v658_v50  ;;  %v666_v58 = vrot.slane %v627_v51, 1 }
  0x28   : > { %v664_v59 = vsel %vm272_vm1, %v662_v52, %v663_v54 }
  0x29   : > { %1109 = vmatprep.mubr.msk.bf16.mxu1 %vm317_vm0, %v678_v57  ;;  %v667_v61 = vsel %vm272_vm1, %v665_v55, %v666_v58 }
  0x2a   : > { %v679_v62 = vpack.c.bf16 %v667_v61, %v664_v59 }
  0x2b   : > { %1096 = vmatmul.mubr.msk.bf16.vlgmr.msra.gmra.mxu0 %vm317_vm0, %v1147_v56 }
  0x2c   : > { %1099 = vmatprep.mubr.msk.bf16.mxu0 %vm317_vm0, %v1148_v60 }
  0x2f   : > { %1110 = vmatmul.mubr.msk.bf16.gmra.mxu1 %vm317_vm0, %v679_v62 }
  0x33   : > { %1100 = vmatmul.mubr.msk.bf16.gmra.mxu0 %vm317_vm0, %v1149_v63 }
  0xd4   : > { %v1087_v0 = vpop.f32.mrf.mxu1 }
  0xd6   : > { %v447_v1 = vpop.f32.mrf.mxu1 }
  0xd8   : > { %v1088_v3 = vpop.f32.mrf.mxu1 }
  0xda   : > { %v450_v4 = vpop.f32.mrf.mxu1 }
  0xdb   : > { %v1077_v5 = vpop.f32.mrf.mxu0 }
  0xdc   : > { %v1091_v6 = vpop.f32.mrf.mxu1  ;;  %v456_v20 = vadd.f32 %v1087_v0, %v1077_v5 }
  0xdd   : > { %v364_v7 = vpop.f32.mrf.mxu0 }
  0xde   : > { %v463_v8 = vpop.f32.mrf.mxu1  ;;  %v448_v23 = vadd.f32 %v447_v1, %v364_v7 }
  0xdf   : > { %v1078_v9 = vpop.f32.mrf.mxu0 }
  0xe0   : > { %v1092_v10 = vpop.f32.mrf.mxu1  ;;  %v459_v24 = vadd.f32 %v1088_v3, %v1078_v9 }
  0xe1   : > { %v367_v11 = vpop.f32.mrf.mxu0 }
  0xe2   : > { %v466_v13 = vpop.f32.mrf.mxu1  ;;  %v451_v28 = vadd.f32 %v450_v4, %v367_v11 }
  0xe3   : > { %v1081_v12 = vpop.f32.mrf.mxu0 }
  0xe4   : > { %v472_v35 = vadd.f32 %v1091_v6, %v1081_v12 }
  0xe5   : > { %v380_v14 = vpop.f32.mrf.mxu0 }
  0xe6   : > { %v464_v38 = vadd.f32 %v463_v8, %v380_v14 }
  0xe7   : > { %v1082_v15 = vpop.f32.mrf.mxu0  ;;  %v1107_v2 = vpop.f32.mrf.mxu1 }
  0xe8   : > { %v475_v44 = vadd.f32 %v1092_v10, %v1082_v15 }
  0xe9   : > { %v383_v16 = vpop.f32.mrf.mxu0  ;;  %v734_v17 = vpop.f32.mrf.mxu1 }
  0xea   : > { %v467_v50 = vadd.f32 %v466_v13, %v383_v16 }
  0xeb   : > { %v1097_v18 = vpop.f32.mrf.mxu0  ;;  %v1108_v19 = vpop.f32.mrf.mxu1 }
  0xec   : > { %v590_v25 = vadd.f32 %v1097_v18, %v456_v20 }
  0xed   : > { %v557_v21 = vpop.f32.mrf.mxu0  ;;  %v737_v22 = vpop.f32.mrf.mxu1 }
  0xee   : > { %v588_v29 = vadd.f32 %v557_v21, %v448_v23  ;;  %v767_v32 = vadd.f32 %v1107_v2, %v590_v25 }
  0xef   : > { %v1098_v26 = vpop.f32.mrf.mxu0  ;;  %v1111_v27 = vpop.f32.mrf.mxu1 }
  0xf0   : > { %v591_v30 = vadd.f32 %v1098_v26, %v459_v24  ;;  %v765_v39 = vadd.f32 %v734_v17, %v588_v29 }
  0xf1   : > { %v560_v31 = vpop.f32.mrf.mxu0  ;;  %v750_v36 = vpop.f32.mrf.mxu1 }
  0xf2   : > { %v768_v33 = vadd.f32 %v1108_v19, %v591_v30  ;;  %v589_v34 = vadd.f32 %v560_v31, %v451_v28 }
  0xf3   : > { %v1101_v37 = vpop.f32.mrf.mxu0  ;;  %v1112_v48 = vpop.f32.mrf.mxu1 }
  0xf4   : > { %v1038_v40 = vpack.c.bf16 %v768_v33, %v767_v32  ;;  %v766_v41 = vadd.f32 %v737_v22, %v589_v34  ;;  %v594_v42 = vadd.f32 %v1101_v37, %v472_v35 }
  0xf5   : > { %v573_v43 = vpop.f32.mrf.mxu0  ;;  %v753_v59 = vpop.f32.mrf.mxu1 }
  0xf6   : > { %1050 = vst [vmem:[%s1304_s4 + $0x8] sm:$0xff] %v1038_v40   ;;  %v1033_v45 = vpack.c.bf16 %v766_v41, %v765_v39  ;;  %v789_v46 = vadd.f32 %v766_v41, %v765_v39  ;;  %v592_v47 = vadd.f32 %v573_v43, %v464_v38  ;;  %v771_v53 = vadd.f32 %v1111_v27, %v594_v42 }
  0xf7   : > { %v1102_v49 = vpop.f32.mrf.mxu0 }
  0xf8   : > { %1034 = vst [vmem:[%s1304_s4] sm:$0xff] %v1033_v45   ;;  %v790_v51 = vadd.f32 %v789_v46, %v767_v32  ;;  %v595_v52 = vadd.f32 %v1102_v49, %v475_v44  ;;  %v769_v55 = vadd.f32 %v750_v36, %v592_v47 }
  0xf9   : > { %v576_v54 = vpop.f32.mrf.mxu0 }
  0xfa   : > { %v791_v56 = vadd.f32 %v790_v51, %v768_v33  ;;  %v772_v57 = vadd.f32 %v1112_v48, %v595_v52  ;;  %v593_v58 = vadd.f32 %v576_v54, %v467_v50 }
  0xfc   : > { %v792_v60 = vadd.f32 %v791_v56, %v769_v55  ;;  %v1048_v61 = vpack.c.bf16 %v772_v57, %v771_v53  ;;  %v770_v62 = vadd.f32 %v753_v59, %v593_v58 }
  0xfe   : > { %1052 = vst [vmem:[%s1304_s4 + $0x18] sm:$0xff] %v1048_v61   ;;  %v1043_v63 = vpack.c.bf16 %v770_v62, %v769_v55  ;;  %v793_v0 = vadd.f32 %v792_v60, %v770_v62 }
 0x100   : > { %1051 = vst [vmem:[%s1304_s4 + $0x10] sm:$0xff] %v1043_v63   ;;  %v794_v1 = vadd.f32 %v793_v0, %v771_v53 }
 0x102   : > { %v795_v3 = vadd.f32 %v794_v1, %v772_v57 }
 0x104   : > { %v796_v4 = vrot.slane %v795_v3, 4 }
 0x106   : > { %v797_v5 = vadd.f32 %v796_v4, %v795_v3 }
 0x108   : > { %v798_v6 = vrot.slane %v797_v5, 2 }
 0x10a   : > { %v799_v7 = vadd.f32 %v798_v6, %v797_v5 }
 0x10c   : > { %v800_v8 = vrot.slane %v799_v7, 1 }
 0x10e   : > { %v801_v9 = vadd.f32 %v800_v8, %v799_v7 }
 0x110   : > { %v802_v10 = vmul.f32 0.015625, %v801_v9  ;;  %832 = vst [vmem:[%s1314_s8] sm:$0x1] %v801_v9 }
 0x112   : > { %v803_v11 = vsub.f32 %v765_v39, %v802_v10  ;;  %v804_v12 = vsub.f32 %v766_v41, %v802_v10  ;;  %v805_v13 = vsub.f32 %v767_v32, %v802_v10  ;;  %v806_v14 = vsub.f32 %v768_v33, %v802_v10 }
 0x113   : > { %v807_v16 = vsub.f32 %v769_v55, %v802_v10  ;;  %v808_v19 = vsub.f32 %v770_v62, %v802_v10  ;;  %v809_v22 = vsub.f32 %v771_v53, %v802_v10  ;;  %v810_v25 = vsub.f32 %v772_v57, %v802_v10 }
 0x114   : > { %v811_v15 = vmul.f32 %v803_v11, %v803_v11  ;;  %v812_v2 = vmul.f32 %v804_v12, %v804_v12  ;;  %v813_v17 = vmul.f32 %v805_v13, %v805_v13  ;;  %v814_v20 = vmul.f32 %v806_v14, %v806_v14 }
 0x115   : > { %v815_v23 = vmul.f32 %v807_v16, %v807_v16  ;;  %v816_v26 = vmul.f32 %v808_v19, %v808_v19  ;;  %v817_v28 = vmul.f32 %v809_v22, %v809_v22  ;;  %v818_v30 = vmul.f32 %v810_v25, %v810_v25 }
 0x116   : > { %v819_v18 = vadd.f32 %v812_v2, %v811_v15 }
 0x118   : > { %v820_v21 = vadd.f32 %v819_v18, %v813_v17 }
 0x11a   : > { %v821_v24 = vadd.f32 %v820_v21, %v814_v20 }
 0x11c   : > { %v822_v27 = vadd.f32 %v821_v24, %v815_v23 }
 0x11e   : > { %v823_v29 = vadd.f32 %v822_v27, %v816_v26 }
 0x120   : > { %v824_v31 = vadd.f32 %v823_v29, %v817_v28 }
 0x122   : > { %v825_v32 = vadd.f32 %v824_v31, %v818_v30 }
 0x124   : > { %v826_v33 = vrot.slane %v825_v32, 4 }
 0x126   : > { %v827_v34 = vadd.f32 %v826_v33, %v825_v32 }
 0x128   : > { %v828_v35 = vrot.slane %v827_v34, 2 }
 0x12a   : > { %v829_v36 = vadd.f32 %v828_v35, %v827_v34 }
 0x12c   : > { %v830_v37 = vrot.slane %v829_v36, 1 }
 0x12e   : > { %v831_v38 = vadd.f32 %v830_v37, %v829_v36 }
 0x130   : > { %833 = vst [vmem:[%s1314_s8 + $0x1] sm:$0x1] %v831_v38 }
 0x131 PF: > { %s14_s14 = sadd.s32 1, %s1172_s14   ;;  %s1331_s12 = smov %s1168_s13 }
 0x132   : > { %p11_p5 = scmp.ge.s32.totalorder %s14_s14, 4   ;;  %s1332_s13 = smov %s1334_s15 }
 0x134   :  { %13 = sbr.rel (!%p11_p5) target bundleno = 2 (0x2), region = 73 }

// kernel: block_forward.10
= control target key start
LH: loop header
LB: loop body
LE: loop exit
PB: predicated region body
PF: predicated region fallthrough
CT: control target
= control target key end

     0   :  { %s641_s12 = smov 0   ;;  %s643_s13 = smov 0   ;;  %s688_s0 = inlined_call_operand.vmem [shape: bf16[2,8,8,4], index: 0, kind: input, shape index: {}]   ;;  %s689_s1 = inlined_call_operand.vmem [shape: bf16[1,4,128], index: 1, kind: input, shape index: {}]   ;;  %s690_s2 = inlined_call_operand.vmem [shape: bf16[2,8,8,128], index: 2, kind: output, shape index: {0}]   ;;  %s691_s3 = inlined_call_operand.vmem [shape: f32[2,1,2,128], index: 3, kind: output, shape index: {1}]  }
   0x1   :  { %s645_s14 = smov 0  }
   0x2 LB: > { %s26_s15 = sadd.s32 1, %s615_s13  ;;  %p509_p0 = scmp.ge.s32.totalorder %s619_s14, 1  ;;  %s619_s14 = sphi %s645_s14, %s14_s14   ;;  %s615_s13 = sphi %s643_s13, %s693_s13   ;;  %s611_s12 = sphi %s641_s12, %s692_s12  }
   0x3   : > { %p28_p1 = scmp.ge.s32.totalorder %s26_s15, 2  ;;  %p156_p2 = scmp.lt.s32.totalorder %s619_s14, 3 }
   0x5   : > { %s695_s15 = smov (%p28_p1, %s26_s15), 0  ;;  %p157_p3 = pnand %p509_p0, %p156_p2 }
   0x6   : > { %p191_p4 = scmp.lt.s32.totalorder (!%p157_p3), %s611_s12, 1 }
   0x7   : > { %160 = sbr.rel (%p157_p3) target bundleno = 275 (0x113), region = 28 }
   0xc   : > { %v237_v0 = vld [vmem:[%s689_s1] sm:$0x3]  ;;  %vm251_vm0 = vcmask 1041408   ;;  %s697_s12 = smov (!%p191_p4, %s611_s12), 1  ;;  %vm238_vm1 = vcmask 31744  }
   0xd   : > { %567 = vmatprep.subr.msk.bf16.mxu0 %vm251_vm0, %v237_v0  ;;  %v253_v1 = vsel %vm251_vm0, %v237_v0, 0  ;;  %568 = vmatprep.subr.msk.bf16.mxu1 %vm251_vm0, %v237_v0  ;;  %s525_s18 = sshll.u32 %s697_s12, 5  ;;  %s514_s25 = sshll.u32 %s697_s12, 1 }
   0xe   : > { %556 = vmatpush3.bf16.msra.mxu0 %v253_v1  ;;  %566 = vmatpush3.bf16.msra.mxu1 %v253_v1  ;;  %s195_s21 = scalar_lea.vmem %s688_s0, %s525_s18  ;;  %s204_s24 = scalar_lea.vmem %s690_s2, %s525_s18 }
   0xf   : > { %v593_v2 = vld [vmem:[%s195_s21] sm:$0xff]   ;;  %v594_v3 = vld [vmem:[%s195_s21 + $0x8] sm:$0xff]   ;;  %v595_v4 = vld [vmem:[%s195_s21 + $0x10] sm:$0xff]   ;;  %s675_s28 = scalar_lea.vmem %s691_s3, %s514_s25 }
  0x10   : > { %557 = vmatprep.mubr.msk.bf16.mxu0 %vm238_vm1, %v593_v2  ;;  %v596_v5 = vld [vmem:[%s195_s21 + $0x18] sm:$0xff]   ;;  %561 = vmatprep.mubr.msk.bf16.mxu1 %vm238_vm1, %v595_v4 }
  0x11   : > { %558 = vmatmul.mubr.msk.bf16.vlgmr.msra.gmra.mxu0 %vm238_vm1, %v594_v3  ;;  %562 = vmatmul.mubr.msk.bf16.vlgmr.msra.gmra.mxu1 %vm238_vm1, %v596_v5 }
  0xd1   : > { %v559_v6 = vpop.f32.mrf.mxu0  ;;  %v563_v8 = vpop.f32.mrf.mxu1 }
  0xd3   : > { %v289_v7 = vpop.f32.mrf.mxu0  ;;  %v305_v10 = vpop.f32.mrf.mxu1 }
  0xd5   : > { %v560_v9 = vpop.f32.mrf.mxu0  ;;  %v564_v13 = vpop.f32.mrf.mxu1 }
  0xd6   : > { %v535_v11 = vpack.c.bf16 %v560_v9, %v559_v6  ;;  %v545_v16 = vpack.c.bf16 %v564_v13, %v563_v8 }
  0xd7   : > { %v292_v12 = vpop.f32.mrf.mxu0  ;;  %v308_v17 = vpop.f32.mrf.mxu1 }
  0xd8   : > { %547 = vst [vmem:[%s204_s24 + $0x8] sm:$0xff] %v535_v11   ;;  %v530_v14 = vpack.c.bf16 %v292_v12, %v289_v7  ;;  %v336_v15 = vadd.f32 %v292_v12, %v289_v7  ;;  %549 = vst [vmem:[%s204_s24 + $0x18] sm:$0xff] %v545_v16   ;;  %v540_v19 = vpack.c.bf16 %v308_v17, %v305_v10 }
  0xda   : > { %531 = vst [vmem:[%s204_s24] sm:$0xff] %v530_v14   ;;  %v337_v18 = vadd.f32 %v559_v6, %v336_v15  ;;  %548 = vst [vmem:[%s204_s24 + $0x10] sm:$0xff] %v540_v19  }
  0xdc   : > { %v338_v20 = vadd.f32 %v560_v9, %v337_v18 }
  0xde   : > { %v339_v21 = vadd.f32 %v338_v20, %v305_v10 }
  0xe0   : > { %v340_v22 = vadd.f32 %v339_v21, %v308_v17 }
  0xe2   : > { %v341_v23 = vadd.f32 %v563_v8, %v340_v22 }
  0xe4   : > { %v342_v24 = vadd.f32 %v564_v13, %v341_v23 }
  0xe6   : > { %v343_v25 = vrot.slane %v342_v24, 4 }
  0xe8   : > { %v344_v26 = vadd.f32 %v343_v25, %v342_v24 }
  0xea   : > { %v345_v27 = vrot.slane %v344_v26, 2 }
  0xec   : > { %v346_v28 = vadd.f32 %v345_v27, %v344_v26 }
  0xee   : > { %v347_v29 = vrot.slane %v346_v28, 1 }
  0xf0   : > { %v348_v30 = vadd.f32 %v347_v29, %v346_v28 }
  0xf2   : > { %v349_v31 = vmul.f32 0.015625, %v348_v30  ;;  %379 = vst [vmem:[%s675_s28] sm:$0x1] %v348_v30 }
  0xf4   : > { %v350_v32 = vsub.f32 %v289_v7, %v349_v31  ;;  %v351_v33 = vsub.f32 %v292_v12, %v349_v31  ;;  %v352_v34 = vsub.f32 %v559_v6, %v349_v31  ;;  %v353_v35 = vsub.f32 %v560_v9, %v349_v31 }
  0xf5   : > { %v354_v38 = vsub.f32 %v305_v10, %v349_v31  ;;  %v355_v41 = vsub.f32 %v308_v17, %v349_v31  ;;  %v356_v44 = vsub.f32 %v563_v8, %v349_v31  ;;  %v357_v47 = vsub.f32 %v564_v13, %v349_v31 }
  0xf6   : > { %v358_v36 = vmul.f32 %v350_v32, %v350_v32  ;;  %v359_v37 = vmul.f32 %v351_v33, %v351_v33  ;;  %v360_v39 = vmul.f32 %v352_v34, %v352_v34  ;;  %v361_v42 = vmul.f32 %v353_v35, %v353_v35 }
  0xf7   : > { %v362_v45 = vmul.f32 %v354_v38, %v354_v38  ;;  %v363_v48 = vmul.f32 %v355_v41, %v355_v41  ;;  %v364_v50 = vmul.f32 %v356_v44, %v356_v44  ;;  %v365_v52 = vmul.f32 %v357_v47, %v357_v47 }
  0xf8   : > { %v366_v40 = vadd.f32 %v359_v37, %v358_v36 }
  0xfa   : > { %v367_v43 = vadd.f32 %v366_v40, %v360_v39 }
  0xfc   : > { %v368_v46 = vadd.f32 %v367_v43, %v361_v42 }
  0xfe   : > { %v369_v49 = vadd.f32 %v368_v46, %v362_v45 }
 0x100   : > { %v370_v51 = vadd.f32 %v369_v49, %v363_v48 }
 0x102   : > { %v371_v53 = vadd.f32 %v370_v51, %v364_v50 }
 0x104   : > { %v372_v54 = vadd.f32 %v371_v53, %v365_v52 }
 0x106   : > { %v373_v55 = vrot.slane %v372_v54, 4 }
 0x108   : > { %v374_v56 = vadd.f32 %v373_v55, %v372_v54 }
 0x10a   : > { %v375_v57 = vrot.slane %v374_v56, 2 }
 0x10c   : > { %v376_v58 = vadd.f32 %v375_v57, %v374_v56 }
 0x10e   : > { %v377_v59 = vrot.slane %v376_v58, 1 }
 0x110   : > { %v378_v60 = vadd.f32 %v377_v59, %v376_v58 }
 0x112   : > { %380 = vst [vmem:[%s675_s28 + $0x1] sm:$0x1] %v378_v60 }
 0x113 PF: > { %s14_s14 = sadd.s32 1, %s619_s14   ;;  %s692_s12 = smov %s615_s13 }
 0x114   : > { %p11_p5 = scmp.ge.s32.totalorder %s14_s14, 4   ;;  %s693_s13 = smov %s695_s15 }
 0x116   :  { %13 = sbr.rel (!%p11_p5) target bundleno = 2 (0x2), region = 71 }

// kernel: block_forward.11
= control target key start
LH: loop header
LB: loop body
LE: loop exit
PB: predicated region body
PF: predicated region fallthrough
CT: control target
= control target key end

     0   :  { %s484_s12 = smov 0   ;;  %s486_s13 = smov 0   ;;  %s526_s0 = inlined_call_operand.vmem [shape: bf16[2,8,8,128], index: 0, kind: input, shape index: {}]   ;;  %s527_s1 = inlined_call_operand.vmem [shape: f32[1,1,1,128], index: 1, kind: input, shape index: {}]   ;;  %s528_s2 = inlined_call_operand.vmem [shape: f32[1,1,1,128], index: 2, kind: input, shape index: {}]   ;;  %s529_s3 = inlined_call_operand.vmem [shape: bf16[2,8,8,128], index: 3, kind: output, shape index: {}]  }
   0x1   :  { %s488_s14 = smov 0  }
   0x2 LB: > { %s25_s15 = sadd.s32 1, %s458_s13  ;;  %p363_p0 = scmp.ge.s32.totalorder %s462_s14, 1  ;;  %s462_s14 = sphi %s488_s14, %s13_s14   ;;  %s458_s13 = sphi %s486_s13, %s531_s13   ;;  %s454_s12 = sphi %s484_s12, %s530_s12  }
   0x3   : > { %p27_p1 = scmp.ge.s32.totalorder %s25_s15, 2  ;;  %p158_p2 = scmp.lt.s32.totalorder %s462_s14, 3 }
   0x5   : > { %s533_s15 = smov (%p27_p1, %s25_s15), 0  ;;  %p159_p3 = pnand %p363_p0, %p158_p2 }
   0x6   : > { %p191_p4 = scmp.lt.s32.totalorder (!%p159_p3), %s454_s12, 1 }
   0x7   : > { %162 = sbr.rel (%p159_p3) target bundleno = 26 (0x1a), region = 32 }
   0xc   : > { %s535_s12 = smov (!%p191_p4, %s454_s12), 1  ;;  %v368_v0 = vld [vmem:[%s527_s1] ss:$0 sm:$0xff] }
   0xd   : > { %s372_s16 = sshll.u32 %s535_s12, 5  ;;  %v369_v9 = vld [vmem:[%s528_s2] ss:$0 sm:$0xff] }
   0xe   : > { %s198_s19 = scalar_lea.vmem %s526_s0, %s372_s16  ;;  %s208_s26 = scalar_lea.vmem %s529_s3, %s372_s16 }
   0xf   : > { %v375_v1 = vld [vmem:[%s198_s19] sm:$0xff]   ;;  %v410_v2 = vld [vmem:[%s198_s19 + $0x8] sm:$0xff]   ;;  %v411_v3 = vld [vmem:[%s198_s19 + $0x10] sm:$0xff]  }
  0x10   : > { %v376_v4 = vunpack.c.l.bf16 %v375_v1  ;;  %v377_v5 = vunpack.c.h.bf16 %v375_v1  ;;  %v380_v6 = vunpack.c.l.bf16 %v410_v2  ;;  %v381_v7 = vunpack.c.h.bf16 %v410_v2  ;;  %v412_v8 = vld [vmem:[%s198_s19 + $0x18] sm:$0xff]  }
  0x11   : > { %v384_v10 = vunpack.c.l.bf16 %v411_v3  ;;  %v385_v11 = vunpack.c.h.bf16 %v411_v3  ;;  %v388_v12 = vunpack.c.l.bf16 %v412_v8  ;;  %v389_v13 = vunpack.c.h.bf16 %v412_v8 }
  0x12   : > { %v233_v14 = vmul.f32 %v376_v4, %v368_v0  ;;  %v234_v15 = vmul.f32 %v377_v5, %v368_v0  ;;  %v235_v16 = vmul.f32 %v380_v6, %v368_v0  ;;  %v236_v17 = vmul.f32 %v381_v7, %v368_v0 }
  0x13   : > { %v237_v18 = vmul.f32 %v384_v10, %v368_v0  ;;  %v238_v19 = vmul.f32 %v385_v11, %v368_v0  ;;  %v239_v20 = vmul.f32 %v388_v12, %v368_v0  ;;  %v240_v21 = vmul.f32 %v389_v13, %v368_v0 }
  0x14   : > { %v248_v22 = vadd.f32 %v369_v9, %v233_v14  ;;  %v249_v23 = vadd.f32 %v369_v9, %v234_v15  ;;  %v250_v24 = vadd.f32 %v369_v9, %v235_v16  ;;  %v251_v25 = vadd.f32 %v369_v9, %v236_v17 }
  0x15   : > { %v252_v26 = vadd.f32 %v369_v9, %v237_v18  ;;  %v253_v27 = vadd.f32 %v369_v9, %v238_v19  ;;  %v254_v28 = vadd.f32 %v369_v9, %v239_v20  ;;  %v255_v29 = vadd.f32 %v369_v9, %v240_v21 }
  0x16   : > { %v393_v30 = vpack.c.bf16 %v249_v23, %v248_v22  ;;  %v398_v31 = vpack.c.bf16 %v251_v25, %v250_v24 }
  0x17   : > { %v403_v32 = vpack.c.bf16 %v253_v27, %v252_v26  ;;  %v408_v33 = vpack.c.bf16 %v255_v29, %v254_v28 }
  0x18   : > { %394 = vst [vmem:[%s208_s26] sm:$0xff] %v393_v30   ;;  %413 = vst [vmem:[%s208_s26 + $0x8] sm:$0xff] %v398_v31  }
  0x19   : > { %414 = vst [vmem:[%s208_s26 + $0x10] sm:$0xff] %v403_v32   ;;  %415 = vst [vmem:[%s208_s26 + $0x18] sm:$0xff] %v408_v33  }
  0x1a PF: > { %s13_s14 = sadd.s32 1, %s462_s14   ;;  %s530_s12 = smov %s458_s13 }
  0x1b   : > { %p10_p5 = scmp.ge.s32.totalorder %s13_s14, 4   ;;  %s531_s13 = smov %s533_s15 }
  0x1d   :  { %12 = sbr.rel (!%p10_p5) target bundleno = 2 (0x2), region = 62 }

// kernel: block_forward.15
= control target key start
LH: loop header
LB: loop body
LE: loop exit
PB: predicated region body
PF: predicated region fallthrough
CT: control target
= control target key end

     0   :  { %s624_s15 = smov 0   ;;  %s626_s16 = smov 0   ;;  %s671_s0 = inlined_call_operand.vmem [shape: bf16[2,8,8,128], index: 0, kind: input, shape index: {}]   ;;  %s672_s1 = inlined_call_operand.vmem [shape: f32[1,1,1,128], index: 1, kind: input, shape index: {}]   ;;  %s673_s2 = inlined_call_operand.vmem [shape: f32[1,1,1,128], index: 2, kind: input, shape index: {}]   ;;  %s674_s3 = inlined_call_operand.vmem [shape: bf16[2,8,8,128], index: 3, kind: input, shape index: {}, may-alias: {3,4}]   ;;  %s675_s4 = inlined_call_operand.vmem [shape: bf16[2,8,8,128], index: 4, kind: output, shape index: {}, may-alias: {3,4}]  }
   0x1   :  { %s628_s17 = smov 0  }
   0x2 LB: > { %s26_s18 = sadd.s32 1, %s593_s16  ;;  %p476_p0 = scmp.ge.s32.totalorder %s597_s17, 1  ;;  %s597_s17 = sphi %s628_s17, %s14_s17   ;;  %s593_s16 = sphi %s626_s16, %s677_s16   ;;  %s589_s15 = sphi %s624_s15, %s676_s15  }
   0x3   : > { %p28_p1 = scmp.ge.s32.totalorder %s26_s18, 2  ;;  %p200_p2 = scmp.lt.s32.totalorder %s597_s17, 3 }
   0x5   : > { %s679_s18 = smov (%p28_p1, %s26_s18), 0  ;;  %p201_p3 = pnand %p476_p0, %p200_p2 }
   0x6   : > { %p244_p4 = scmp.lt.s32.totalorder (!%p201_p3), %s589_s15, 1 }
   0x7   : > { %204 = sbr.rel (%p201_p3) target bundleno = 32 (0x20), region = 36 }
   0xc   : > { %s681_s15 = smov (!%p244_p4, %s589_s15), 1  ;;  %v483_v0 = vld [vmem:[%s672_s1] ss:$0 sm:$0xff] }
   0xd   : > { %s642_s19 = sshll.u32 %s681_s15, 5  ;;  %v484_v13 = vld [vmem:[%s673_s2] ss:$0 sm:$0xff] }
   0xe   : > { %s251_s22 = scalar_lea.vmem %s671_s0, %s642_s19  ;;  %s261_s27 = scalar_lea.vmem %s674_s3, %s642_s19 }
   0xf   : > { %v491_v1 = vld [vmem:[%s251_s22] sm:$0xff]   ;;  %v542_v2 = vld [vmem:[%s251_s22 + $0x8] sm:$0xff]   ;;  %v543_v3 = vld [vmem:[%s251_s22 + $0x10] sm:$0xff]   ;;  %s271_s6 = scalar_lea.vmem %s675_s4, %s642_s19 }
  0x10   : > { %v492_v4 = vunpack.c.l.bf16 %v491_v1  ;;  %v493_v5 = vunpack.c.h.bf16 %v491_v1  ;;  %v496_v6 = vunpack.c.l.bf16 %v542_v2  ;;  %v497_v7 = vunpack.c.h.bf16 %v542_v2  ;;  %v544_v8 = vld [vmem:[%s251_s22 + $0x18] sm:$0xff]   ;;  %v507_v22 = vld [vmem:[%s261_s27] sm:$0xff]   ;;  %v545_v23 = vld [vmem:[%s261_s27 + $0x8] sm:$0xff]  }
  0x11   : > { %v500_v9 = vunpack.c.l.bf16 %v543_v3  ;;  %v501_v10 = vunpack.c.h.bf16 %v543_v3  ;;  %v504_v11 = vunpack.c.l.bf16 %v544_v8  ;;  %v505_v12 = vunpack.c.h.bf16 %v544_v8  ;;  %v546_v28 = vld [vmem:[%s261_s27 + $0x10] sm:$0xff]   ;;  %v547_v29 = vld [vmem:[%s261_s27 + $0x18] sm:$0xff]  }
  0x12   : > { %v296_v14 = vmul.f32 %v492_v4, %v483_v0  ;;  %v297_v15 = vmul.f32 %v493_v5, %v483_v0  ;;  %v298_v16 = vmul.f32 %v496_v6, %v483_v0  ;;  %v299_v17 = vmul.f32 %v497_v7, %v483_v0 }
  0x13   : > { %v300_v18 = vmul.f32 %v500_v9, %v483_v0  ;;  %v301_v19 = vmul.f32 %v501_v10, %v483_v0  ;;  %v302_v20 = vmul.f32 %v504_v11, %v483_v0  ;;  %v303_v21 = vmul.f32 %v505_v12, %v483_v0 }
  0x14   : > { %v311_v24 = vadd.f32 %v484_v13, %v296_v14  ;;  %v312_v25 = vadd.f32 %v484_v13, %v297_v15  ;;  %v313_v26 = vadd.f32 %v484_v13, %v298_v16  ;;  %v314_v27 = vadd.f32 %v484_v13, %v299_v17 }
  0x15   : > { %v315_v30 = vadd.f32 %v484_v13, %v300_v18  ;;  %v316_v31 = vadd.f32 %v484_v13, %v301_v19  ;;  %v317_v32 = vadd.f32 %v484_v13, %v302_v20  ;;  %v318_v33 = vadd.f32 %v484_v13, %v303_v21 }
  0x16   : > { %v508_v34 = vunpack.c.l.bf16 %v507_v22  ;;  %v509_v35 = vunpack.c.h.bf16 %v507_v22  ;;  %v512_v36 = vunpack.c.l.bf16 %v545_v23  ;;  %v513_v37 = vunpack.c.h.bf16 %v545_v23 }
  0x17   : > { %v516_v38 = vunpack.c.l.bf16 %v546_v28  ;;  %v517_v39 = vunpack.c.h.bf16 %v546_v28  ;;  %v520_v40 = vunpack.c.l.bf16 %v547_v29  ;;  %v521_v41 = vunpack.c.h.bf16 %v547_v29 }
  0x18   : > { %v335_v42 = vadd.f32 %v508_v34, %v311_v24  ;;  %v336_v43 = vadd.f32 %v509_v35, %v312_v25  ;;  %v337_v44 = vadd.f32 %v512_v36, %v313_v26  ;;  %v338_v45 = vadd.f32 %v513_v37, %v314_v27 }
  0x19   : > { %v339_v46 = vadd.f32 %v516_v38, %v315_v30  ;;  %v340_v47 = vadd.f32 %v517_v39, %v316_v31  ;;  %v341_v48 = vadd.f32 %v520_v40, %v317_v32  ;;  %v342_v49 = vadd.f32 %v521_v41, %v318_v33 }
  0x1a   : > { %v343_v50 = vmax.f32 %v335_v42, 0.0  ;;  %v344_v51 = vmax.f32 %v336_v43, 0.0  ;;  %v345_v52 = vmax.f32 %v337_v44, 0.0  ;;  %v346_v53 = vmax.f32 %v338_v45, 0.0 }
  0x1b   : > { %v347_v54 = vmax.f32 %v339_v46, 0.0  ;;  %v348_v55 = vmax.f32 %v340_v47, 0.0  ;;  %v349_v56 = vmax.f32 %v341_v48, 0.0  ;;  %v350_v57 = vmax.f32 %v342_v49, 0.0 }
  0x1c   : > { %v525_v58 = vpack.c.bf16 %v344_v51, %v343_v50  ;;  %v530_v59 = vpack.c.bf16 %v346_v53, %v345_v52 }
  0x1d   : > { %v535_v60 = vpack.c.bf16 %v348_v55, %v347_v54  ;;  %v540_v61 = vpack.c.bf16 %v350_v57, %v349_v56 }
  0x1e   : > { %526 = vst [vmem:[%s271_s6] sm:$0xff] %v525_v58   ;;  %548 = vst [vmem:[%s271_s6 + $0x8] sm:$0xff] %v530_v59  }
  0x1f   : > { %549 = vst [vmem:[%s271_s6 + $0x10] sm:$0xff] %v535_v60   ;;  %550 = vst [vmem:[%s271_s6 + $0x18] sm:$0xff] %v540_v61  }
  0x20 PF: > { %s14_s17 = sadd.s32 1, %s597_s17   ;;  %s676_s15 = smov %s593_s16 }
  0x21   : > { %p11_p5 = scmp.ge.s32.totalorder %s14_s17, 4   ;;  %s677_s16 = smov %s679_s18 }
  0x23   :  { %13 = sbr.rel (!%p11_p5) target bundleno = 2 (0x2), region = 69 }

// kernel: block_forward.14
= control target key start
LH: loop header
LB: loop body
LE: loop exit
PB: predicated region body
PF: predicated region fallthrough
CT: control target
= control target key end

     0   :  { %s3002_s12 = smov 0   ;;  %s3004_s13 = smov 0   ;;  %s3505_s0 = inlined_call_operand.vmem [shape: bf16[2,8,8,128], index: 0, kind: input, shape index: {}]   ;;  %s3506_s1 = inlined_call_operand.vmem [shape: bf16[3,384,128], index: 1, kind: input, shape index: {}]   ;;  %s3507_s2 = inlined_call_operand.vmem [shape: bf16[2,8,8,128], index: 2, kind: output, shape index: {0}]   ;;  %s3508_s3 = inlined_call_operand.vmem [shape: f32[2,1,2,128], index: 3, kind: output, shape index: {1}]  }
   0x1   :  { %s3006_s14 = smov 0  }
   0x2 LB: > { %s26_s15 = sadd.s32 1, %s2975_s13  ;;  %p2207_p0 = scmp.ge.s32.totalorder %s2979_s14, 1  ;;  %s2979_s14 = sphi %s3006_s14, %s14_s14   ;;  %s2975_s13 = sphi %s3004_s13, %s3518_s13   ;;  %s2971_s12 = sphi %s3002_s12, %s3517_s12  }
   0x3   : > { %p28_p1 = scmp.ge.s32.totalorder %s26_s15, 2  ;;  %p156_p2 = scmp.lt.s32.totalorder %s2979_s14, 3 }
   0x5   : > { %s3520_s15 = smov (%p28_p1, %s26_s15), 0  ;;  %p157_p3 = pnand %p2207_p0, %p156_p2 }
   0x7   : > { %160 = sbr.rel (%p157_p3) target bundleno = 397 (0x18d), region = 28 }
   0xc   : > { %v2817_v0 = vld [vmem:[%s3506_s1 + $0x138] sm:$0xff]   ;;  %v2820_v3 = vld [vmem:[%s3506_s1 + $0x130] sm:$0xff]   ;;  %v2823_v6 = vld [vmem:[%s3506_s1 + $0x128] sm:$0xff]   ;;  %v2981_v7 = vmov 0   ;;  %p191_p4 = scmp.lt.s32.totalorder %s2971_s12, 1  ;;  %vm313_vm0 = vcmask 1040384  }
   0xd   : > { %v2818_v1 = vld [vmem:[%s3506_s1 + $0xf8] sm:$0xff]   ;;  %2564 = vmatprep.subr.bf16.mxu0 %v2817_v0  ;;  %v2821_v4 = vld [vmem:[%s3506_s1 + $0xf0] sm:$0xff]   ;;  %215 = vst [vmem:[#allocation2] sm:$0xf] %v2981_v7  ;;  %216 = vst [vmem:[#allocation2 + $0x4] sm:$0x1] %v2981_v7 }
   0xe   : > { %v2819_v2 = vld [vmem:[%s3506_s1 + $0x178] sm:$0xff]   ;;  %2565 = vmatpush3.bf16.msra.mxu0 %v2818_v1  ;;  %v2822_v5 = vld [vmem:[%s3506_s1 + $0x170] sm:$0xff]   ;;  %409 = vst [vmem:[#allocation2 + $0x48] sm:$0xf] %v2981_v7  ;;  %410 = vst [vmem:[#allocation2 + $0x4c] sm:$0x1] %v2981_v7 }
   0xf   : > { %2720 = vmatprep.subr.bf16.mxu1 %v2819_v2  ;;  %2566 = vmatprep.subr.bf16.mxu0 %v2820_v3  ;;  %v2824_v8 = vld [vmem:[%s3506_s1 + $0xe8] sm:$0xff]   ;;  %v2826_v10 = vld [vmem:[%s3506_s1 + $0x120] sm:$0xff]   ;;  %v2829_v13 = vld [vmem:[%s3506_s1 + $0x118] sm:$0xff]   ;;  %s3522_s12 = smov (!%p191_p4, %s2971_s12), 1  ;;  %vm324_vm1 = vcmask 1044480  }
  0x10   : > { %2721 = vmatpush3.bf16.msra.mxu1 %v2819_v2  ;;  %v2825_v9 = vld [vmem:[%s3506_s1 + $0x168] sm:$0xff]   ;;  %v2827_v11 = vld [vmem:[%s3506_s1 + $0xe0] sm:$0xff]   ;;  %v2831_v14 = vld [vmem:[%s3506_s1 + $0x158] sm:$0xff]   ;;  %s2539_s27 = sshll.u32 %s3522_s12, 5  ;;  %vm314_vm2 = vsmask.f32 256 }
  0x11   : > { %2722 = vmatprep.subr.bf16.mxu1 %v2822_v5  ;;  %v2828_v12 = vld [vmem:[%s3506_s1 + $0x160] sm:$0xff]   ;;  %v2830_v15 = vld [vmem:[%s3506_s1 + $0xd8] sm:$0xff]   ;;  %v2832_v16 = vld [vmem:[%s3506_s1 + $0x110] sm:$0xff]   ;;  %s3092_s9 = scalar_lea.vmem %s3505_s0, %s2539_s27  ;;  %vm325_vm3 = vsmask.f32 4352  ;;  %s3451_s6 = scalar_lea.vmem %s3507_s2, %s2539_s27 }
  0x12   : > { %2567 = vmatpush3.bf16.msra.mxu0 %v2821_v4  ;;  %v2834_v17 = vld [vmem:[%s3506_s1 + $0x150] sm:$0xff]   ;;  %v2835_v19 = vld [vmem:[%s3506_s1 + $0x108] sm:$0xff]   ;;  %v2838_v22 = vld [vmem:[%s3506_s1 + $0x100] sm:$0xff]   ;;  %s2212_s27 = sshll.u32 %s3522_s12, 1 }
  0x13   : > { %2568 = vmatprep.subr.bf16.mxu0 %v2823_v6  ;;  %v2833_v18 = vld [vmem:[%s3506_s1 + $0xd0] sm:$0xff]   ;;  %v2836_v20 = vld [vmem:[%s3506_s1 + $0xc8] sm:$0xff]   ;;  %v2840_v23 = vld [vmem:[%s3506_s1 + $0x140] sm:$0xff]  }
  0x14   : > { %2723 = vmatpush3.bf16.msra.mxu1 %v2822_v5  ;;  %v2837_v21 = vld [vmem:[%s3506_s1 + $0x148] sm:$0xff]   ;;  %v2841_v24 = vld [vmem:[%s3092_s9] ss:$0 sps:$4 sm:$0xff]   ;;  %v2842_v25 = vld [vmem:[%s3092_s9 + $0x4] ss:$0 sps:$4 sm:$0xff]  }
  0x15   : > { %2724 = vmatprep.subr.bf16.mxu1 %v2825_v9  ;;  %v250_v26 = vshrl.u32 %v2841_v24, 16  ;;  %v253_v27 = vshll.u32 %v2841_v24, 16  ;;  %vm3105_vm4 = vmand %vm313_vm0, %vm314_vm2  ;;  %v2839_v29 = vld [vmem:[%s3506_s1 + $0xc0] sm:$0xff]   ;;  %v257_v30 = vshrl.u32 %v2842_v25, 16  ;;  %v260_v31 = vshll.u32 %v2842_v25, 16  ;;  %v2845_v34 = vld [vmem:[%s3506_s1 + $0x78] sm:$0xff]  }
  0x16   : > { %2569 = vmatpush3.bf16.msra.mxu0 %v2824_v8  ;;  %vm3113_vm5 = vmand %vm324_vm1, %vm325_vm3  ;;  %v2850_v36 = vld [vmem:[%s3092_s9 + $0x8] ss:$0 sps:$4 sm:$0xff]   ;;  %v3124_v37 = vld [vmem:[%s3506_s1 + $0xb8] sm:$0xff]  }
  0x17   : > { %2570 = vmatprep.subr.bf16.mxu0 %v2826_v10  ;;  %v252_v33 = vrot.slane %v250_v26, 7  ;;  %v259_v35 = vrot.slane %v257_v30, 7  ;;  %v2851_v39 = vld [vmem:[%s3092_s9 + $0xc] ss:$0 sps:$4 sm:$0xff]   ;;  %v264_v41 = vshrl.u32 %v2850_v36, 16  ;;  %v267_v42 = vshll.u32 %v2850_v36, 16 }
  0x18   : > { %2725 = vmatpush3.bf16.msra.mxu1 %v2825_v9  ;;  %v271_v44 = vshrl.u32 %v2851_v39, 16  ;;  %v274_v45 = vshll.u32 %v2851_v39, 16  ;;  %v2867_v1 = vld [vmem:[%s3092_s9 + $0x10] ss:$0 sps:$4 sm:$0xff]   ;;  %v2868_v2 = vld [vmem:[%s3092_s9 + $0x14] ss:$0 sps:$4 sm:$0xff]  }
  0x19   : > { %2726 = vmatprep.subr.bf16.mxu1 %v2828_v12  ;;  %v255_v38 = vor.u32 %v253_v27, %v252_v33  ;;  %v262_v40 = vor.u32 %v260_v31, %v259_v35  ;;  %v266_v48 = vrot.slane %v264_v41, 7  ;;  %v285_v25 = vshrl.u32 %v2868_v2, 16  ;;  %v3213_v28 = vld [vmem:[#allocation2] sm:$0xf]  ;;  %v2873_v32 = vld [vmem:[%s3506_s1 + $0x18] sm:$0xff]  }
  0x1a   : > { %2571 = vmatpush3.bf16.msra.mxu0 %v2827_v11  ;;  %v273_v52 = vrot.slane %v271_v44, 7 }
  0x1b   : > { %2572 = vmatprep.subr.bf16.mxu0 %v2829_v13  ;;  %v316_v43 = vsel %vm3105_vm4, 0, %v255_v38  ;;  %v317_v46 = vsel %vm3105_vm4, 0, %v262_v40  ;;  %v269_v55 = vor.u32 %v267_v42, %v266_v48  ;;  %v278_v13 = vshrl.u32 %v2867_v1, 16 }
  0x1c   : > { %2727 = vmatpush3.bf16.msra.mxu1 %v2828_v12  ;;  %v327_v47 = vsel %vm3113_vm5, %v316_v43, 0  ;;  %v328_v49 = vsel %vm3113_vm5, %v317_v46, 0  ;;  %v276_v56 = vor.u32 %v274_v45, %v273_v52  ;;  %v287_v40 = vrot.slane %v285_v25, 7 }
  0x1d   : > { %2728 = vmatprep.subr.bf16.mxu1 %v2831_v14  ;;  %v2221_v50 = vcombine.low %v327_v47, %v327_v47  ;;  %v2222_v51 = vcombine.high %v327_v47, %v327_v47  ;;  %v2223_v53 = vcombine.low %v328_v49, %v328_v49  ;;  %v2224_v54 = vcombine.high %v328_v49, %v328_v49  ;;  %v2876_v49 = vld [vmem:[%s3092_s9 + $0x18] ss:$0 sps:$4 sm:$0xff]  }
  0x1e   : > { %2573 = vmatpush3.bf16.msra.mxu0 %v2830_v15  ;;  %v318_v57 = vsel %vm3105_vm4, 0, %v269_v55  ;;  %v319_v58 = vsel %vm3105_vm4, 0, %v276_v56  ;;  %v288_v48 = vshll.u32 %v2868_v2, 16  ;;  %v2877_v55 = vld [vmem:[%s3092_s9 + $0x1c] ss:$0 sps:$4 sm:$0xff]   ;;  %v2857_v56 = vld [vmem:[%s3506_s1 + $0x70] sm:$0xff]   ;;  %s3489_s9 = scalar_lea.vmem %s3508_s3, %s2212_s27 }
  0x1f   : > { %2574 = vmatprep.subr.bf16.mxu0 %v2832_v16  ;;  %392 = vst [vmem:[#allocation2 + $0x8] sm:$0xf] %v2221_v50  ;;  %393 = vst [vmem:[#allocation2 + $0xc] sm:$0x1] %v2222_v51  ;;  %v329_v59 = vsel %vm3113_vm5, %v318_v57, 0  ;;  %v330_v60 = vsel %vm3113_vm5, %v319_v58, 0 }
  0x20   : > { %2729 = vmatpush3.bf16.msra.mxu1 %v2831_v14  ;;  %394 = vst [vmem:[#allocation2 + $0x10] sm:$0xf] %v2223_v53  ;;  %395 = vst [vmem:[#allocation2 + $0x14] sm:$0x1] %v2224_v54  ;;  %v2225_v61 = vcombine.low %v329_v59, %v329_v59  ;;  %v2226_v62 = vcombine.high %v329_v59, %v329_v59  ;;  %v2227_v63 = vcombine.low %v330_v60, %v330_v60  ;;  %v2847_v51 = vld [vmem:[%s3506_s1 + $0x38] sm:$0xff]  }
  0x21   : > { %2730 = vmatprep.subr.bf16.mxu1 %v2834_v17  ;;  %v2228_v0 = vcombine.high %v330_v60, %v330_v60  ;;  %v290_v59 = vor.u32 %v288_v48, %v287_v40  ;;  %v292_v2 = vshrl.u32 %v2876_v49, 16 }
  0x22   : > { %2575 = vmatpush3.bf16.msra.mxu0 %v2833_v18  ;;  %396 = vst [vmem:[#allocation2 + $0x18] sm:$0xf] %v2225_v61  ;;  %397 = vst [vmem:[#allocation2 + $0x1c] sm:$0x1] %v2226_v62  ;;  %v2858_v62 = vld [vmem:[%s3506_s1 + $0x30] sm:$0xff]  }
  0x23   : > { %2576 = vmatprep.subr.bf16.mxu0 %v2835_v19  ;;  %398 = vst [vmem:[#allocation2 + $0x20] sm:$0xf] %v2227_v63  ;;  %399 = vst [vmem:[#allocation2 + $0x24] sm:$0x1] %v2228_v0  ;;  %v2859_v63 = vld [vmem:[%s3506_s1 + $0xb0] sm:$0xff]  }
  0x24   : > { %2731 = vmatpush3.bf16.msra.mxu1 %v2834_v17  ;;  %v281_v17 = vshll.u32 %v2867_v1, 16 }
  0x25   : > { %2732 = vmatprep.subr.bf16.mxu1 %v2837_v21 }
  0x26   : > { %2577 = vmatpush3.bf16.msra.mxu0 %v2836_v20  ;;  %v3146_v3 = vld [vmem:[#allocation2 + $0x8] sm:$0xf]  ;;  %v2273_v4 = vld [vmem:[#allocation2 + $0xc] sm:$0x1] }
  0x27   : > { %2578 = vmatprep.subr.bf16.mxu0 %v2838_v22  ;;  %v2281_v5 = vld [vmem:[#allocation2 + $0x8] sm:$0xe]  ;;  %v2266_v6 = vld [vmem:[#allocation2 + $0x10] sm:$0xf]  ;;  %v2274_v7 = vld [vmem:[#allocation2 + $0x14] sm:$0x1]  ;;  %v2289_v8 = vcombine.low %v3146_v3, %v2273_v4 }
  0x28   : > { %2733 = vmatpush3.bf16.msra.mxu1 %v2837_v21  ;;  %v2282_v9 = vld [vmem:[#allocation2 + $0x10] sm:$0xe]  ;;  %v2297_v10 = vcombine.low %v2281_v5, %v2273_v4  ;;  %v2290_v11 = vcombine.low %v2266_v6, %v2274_v7  ;;  %v280_v21 = vrot.slane %v278_v13, 7  ;;  %v2305_v35 = vcombine.low %v3146_v3, %v2266_v6  ;;  %v2860_v5 = vld [vmem:[%s3506_s1 + $0x68] sm:$0xff]  }
  0x29   : > { %2734 = vmatprep.subr.bf16.mxu1 %v2840_v23  ;;  %v2298_v12 = vcombine.low %v2282_v9, %v2274_v7  ;;  %v735_v14 = vshrl.u32 %v2289_v8, 16  ;;  %v737_v15 = vshll.u32 %v2289_v8, 16  ;;  %v2275_v24 = vld [vmem:[#allocation2 + $0x1c] sm:$0x1]  ;;  %v2283_v36 = vld [vmem:[#allocation2 + $0x18] sm:$0xe] }
  0x2a   : > { %2579 = vmatpush3.bf16.msra.mxu0 %v2839_v29  ;;  %v822_v16 = vrot.slane %v2297_v10, 1  ;;  %v742_v18 = vshrl.u32 %v2290_v11, 16  ;;  %v744_v19 = vshll.u32 %v2290_v11, 16  ;;  %v3151_v29 = vld [vmem:[#allocation2 + $0x20] sm:$0xf]  ;;  %v283_v33 = vor.u32 %v281_v17, %v280_v21 }
  0x2b   : > { %2616 = vmatprep.subr.bf16.mxu0 %v2845_v34  ;;  %v823_v20 = vrot.slane %v2298_v12, 1  ;;  %v739_v22 = vrot.slane %v737_v15, 1  ;;  %v2276_v30 = vld [vmem:[#allocation2 + $0x24] sm:$0x1]  ;;  %v2284_v38 = vld [vmem:[#allocation2 + $0x20] sm:$0xe]  ;;  %v2299_v42 = vcombine.low %v2283_v36, %v2275_v24 }
  0x2c   : > { %2735 = vmatpush3.bf16.msra.mxu1 %v2840_v23  ;;  %v3149_v23 = vld [vmem:[#allocation2 + $0x18] sm:$0xf]  ;;  %v746_v26 = vrot.slane %v744_v19, 1  ;;  %v2292_v39 = vcombine.low %v3151_v29, %v2276_v30  ;;  %v2300_v43 = vcombine.low %v2284_v38, %v2276_v30  ;;  %v320_v54 = vsel %vm3105_vm4, 0, %v283_v33  ;;  %v2863_v15 = vld [vmem:[%s3506_s1 + $0xa8] sm:$0xff]   ;;  %v2864_v21 = vld [vmem:[%s3506_s1 + $0x60] sm:$0xff]  }
  0x2d   : > { %2744 = vmatprep.subr.bf16.mxu1 %v3124_v37  ;;  %v2307_v27 = vcombine.low %v822_v16, %v823_v20  ;;  %v2291_v31 = vcombine.low %v3149_v23, %v2275_v24  ;;  %v740_v34 = vor.u32 %v739_v22, %v735_v14  ;;  %v824_v52 = vrot.slane %v2299_v42, 1  ;;  %v2866_v24 = vld [vmem:[%s3506_s1 + $0xa0] sm:$0xff]   ;;  %v3215_v38 = vld [vmem:[#allocation2 + $0x8] sm:$0xf]  ;;  %v3217_v42 = vld [vmem:[#allocation2 + $0xc] sm:$0x1] }
  0x2e   : > { %v747_v41 = vor.u32 %v746_v26, %v742_v18  ;;  %v756_v46 = vshrl.u32 %v2292_v39, 16  ;;  %v758_v47 = vshll.u32 %v2292_v39, 16  ;;  %v825_v53 = vrot.slane %v2300_v43, 1 }
  0x2f   : > { %2736 = vmatprep.mubr.bf16.mxu1 %v2307_v27  ;;  %v749_v44 = vshrl.u32 %v2291_v31, 16  ;;  %v751_v45 = vshll.u32 %v2291_v31, 16  ;;  %v331_v60 = vsel %vm3113_vm5, %v320_v54, 0  ;;  %v321_v6 = vsel %vm3105_vm4, 0, %v290_v59 }
  0x30   : > { %v2306_v50 = vcombine.low %v740_v34, %v747_v41  ;;  %v760_v58 = vrot.slane %v758_v47, 1  ;;  %v2310_v61 = vcombine.low %v824_v52, %v825_v53  ;;  %v2229_v0 = vcombine.low %v331_v60, %v331_v60  ;;  %v2871_v34 = vld [vmem:[%s3506_s1 + $0x58] sm:$0xff]   ;;  %v422_v41 = vld [vmem:[#allocation2 + $0x4] sm:$0x1]  ;;  %v2883_v53 = vld [vmem:[%s3506_s1 + $0x50] sm:$0xff]  }
  0x31   : > { %v753_v57 = vrot.slane %v751_v45, 1  ;;  %v2230_v1 = vcombine.high %v331_v60, %v331_v60  ;;  %v295_v7 = vshll.u32 %v2876_v49, 16  ;;  %v332_v8 = vsel %vm3113_vm5, %v321_v6, 0 }
  0x32   : > { %1099 = vmatprep.mubr.bf16.mxu0 %v2306_v50  ;;  %v761_v4 = vor.u32 %v760_v58, %v756_v46  ;;  %2737 = vmatmul.mubr.bf16.vlgmr.msra.gmra.mxu1 %v2310_v61  ;;  %400 = vst [vmem:[#allocation2 + $0x28] sm:$0xf] %v2229_v0  ;;  %v294_v9 = vrot.slane %v292_v2, 7  ;;  %v299_v10 = vshrl.u32 %v2877_v55, 16  ;;  %v302_v11 = vshll.u32 %v2877_v55, 16  ;;  %v2882_v46 = vld [vmem:[%s3506_s1 + $0x98] sm:$0xff]  }
  0x33   : > { %1100 = vmatmul.mubr.bf16.vlgmr.msra.gmra.mxu0 %v2305_v35  ;;  %v754_v3 = vor.u32 %v753_v57, %v749_v44  ;;  %401 = vst [vmem:[#allocation2 + $0x2c] sm:$0x1] %v2230_v1  ;;  %2745 = vmatpush3.bf16.msra.mxu1 %v3124_v37  ;;  %v2231_v13 = vcombine.low %v332_v8, %v332_v8  ;;  %v2862_v37 = vld [vmem:[%s3506_s1 + $0x28] sm:$0xff]   ;;  %v2884_v0 = vld [vmem:[%s3506_s1 + $0x10] sm:$0xff]   ;;  %v430_v2 = vld [vmem:[#allocation2] sm:$0xe] }
  0x34   : > { %2617 = vmatpush3.bf16.msra.mxu0 %v2847_v51  ;;  %v2232_v14 = vcombine.high %v332_v8, %v332_v8  ;;  %2746 = vmatprep.subr.bf16.mxu1 %v2859_v63  ;;  %v297_v16 = vor.u32 %v295_v7, %v294_v9  ;;  %v301_v17 = vrot.slane %v299_v10, 7  ;;  %v2308_v18 = vcombine.low %v3149_v23, %v3151_v29  ;;  %v2865_v23 = vld [vmem:[%s3506_s1 + $0x20] sm:$0xff]   ;;  %v2886_v8 = vld [vmem:[%s3506_s1 + $0x48] sm:$0xff]  }
  0x35   : > { %2618 = vmatprep.subr.bf16.mxu0 %v2857_v56  ;;  %v2309_v12 = vcombine.low %v754_v3, %v761_v4  ;;  %402 = vst [vmem:[#allocation2 + $0x30] sm:$0xf] %v2231_v13  ;;  %v3228_v47 = vcombine.low %v3213_v28, %v422_v41  ;;  %v3232_v48 = vcombine.low %v3215_v38, %v3217_v42  ;;  %v2885_v56 = vld [vmem:[%s3506_s1 + $0x90] sm:$0xff]   ;;  %v431_v3 = vld [vmem:[#allocation2 + $0x8] sm:$0xe] }
  0x36   : > { %403 = vst [vmem:[#allocation2 + $0x34] sm:$0x1] %v2232_v14  ;;  %v304_v19 = vor.u32 %v302_v11, %v301_v17  ;;  %v322_v20 = vsel %vm3105_vm4, 0, %v297_v16  ;;  %v2245_v10 = vcombine.low %v430_v2, %v422_v41  ;;  %v2889_v16 = vld [vmem:[%s3506_s1 + $0x88] sm:$0xff]   ;;  %v2246_v17 = vcombine.low %v431_v3, %v3217_v42 }
  0x37   : > { %1107 = vmatprep.mubr.bf16.mxu0 %v2309_v12  ;;  %2747 = vmatpush3.bf16.msra.mxu1 %v2859_v63  ;;  %v333_v22 = vsel %vm3113_vm5, %v322_v20, 0  ;;  %v479_v57 = vshrl.u32 %v3228_v47, 16  ;;  %v481_v58 = vshll.u32 %v3228_v47, 16  ;;  %v486_v61 = vshrl.u32 %v3232_v48, 16 }
  0x38   : > { %2619 = vmatpush3.bf16.msra.mxu0 %v2858_v62  ;;  %2748 = vmatprep.subr.bf16.mxu1 %v2863_v15  ;;  %v323_v25 = vsel %vm3105_vm4, 0, %v304_v19  ;;  %v2233_v26 = vcombine.low %v333_v22, %v333_v22  ;;  %v2234_v27 = vcombine.high %v333_v22, %v333_v22  ;;  %v488_v62 = vshll.u32 %v3232_v48, 16  ;;  %v425_v19 = vld [vmem:[#allocation2 + $0x1c] sm:$0x1] }
  0x39   : > { %2620 = vmatprep.subr.bf16.mxu0 %v2860_v5  ;;  %v3205_v29 = vld [vmem:[#allocation2 + $0x28] sm:$0xf]  ;;  %v334_v36 = vsel %vm3113_vm5, %v323_v25, 0  ;;  %v483_v1 = vrot.slane %v481_v58, 1  ;;  %v567_v42 = vrot.slane %v2246_v17, 1  ;;  %v2897_v17 = vld [vmem:[%s3506_s1 + $0x1b8] sm:$0xff]  }
  0x3a   : > { %v2277_v30 = vld [vmem:[#allocation2 + $0x2c] sm:$0x1]  ;;  %v2285_v31 = vld [vmem:[#allocation2 + $0x28] sm:$0xe]  ;;  %404 = vst [vmem:[#allocation2 + $0x38] sm:$0xf] %v2233_v26  ;;  %v2235_v39 = vcombine.low %v334_v36, %v334_v36  ;;  %v2236_v40 = vcombine.high %v334_v36, %v334_v36 }
  0x3b   : > { %1108 = vmatmul.mubr.bf16.gmra.mxu0 %v2308_v18  ;;  %v2293_v33 = vcombine.low %v3205_v29, %v2277_v30  ;;  %v2301_v35 = vcombine.low %v2285_v31, %v2277_v30  ;;  %405 = vst [vmem:[#allocation2 + $0x3c] sm:$0x1] %v2234_v27  ;;  %2749 = vmatpush3.bf16.msra.mxu1 %v2863_v15  ;;  %v490_v9 = vrot.slane %v488_v62, 1  ;;  %v566_v18 = vrot.slane %v2245_v10, 1  ;;  %v2890_v31 = vld [vmem:[%s3506_s1 + $0x40] sm:$0xff]  }
  0x3c   : > { %2621 = vmatpush3.bf16.msra.mxu0 %v2862_v37  ;;  %2750 = vmatprep.subr.bf16.mxu1 %v2866_v24  ;;  %v3219_v43 = vld [vmem:[#allocation2 + $0x30] sm:$0xf]  ;;  %406 = vst [vmem:[#allocation2 + $0x40] sm:$0xf] %v2235_v39  ;;  %407 = vst [vmem:[#allocation2 + $0x44] sm:$0x1] %v2236_v40  ;;  %v484_v36 = vor.u32 %v483_v1, %v479_v57 }
  0x3d   : > { %2622 = vmatprep.subr.bf16.mxu0 %v2864_v21  ;;  %v2278_v44 = vld [vmem:[#allocation2 + $0x34] sm:$0x1]  ;;  %v765_v45 = vshll.u32 %v2293_v33, 16  ;;  %v763_v50 = vshrl.u32 %v2293_v33, 16  ;;  %v2286_v51 = vld [vmem:[#allocation2 + $0x30] sm:$0xe]  ;;  %v2311_v20 = vcombine.low %v3205_v29, %v3219_v43 }
  0x3e   : > { %v2294_v49 = vcombine.low %v3219_v43, %v2278_v44  ;;  %v826_v52 = vrot.slane %v2301_v35, 1  ;;  %v2302_v55 = vcombine.low %v2286_v51, %v2278_v44  ;;  %v424_v37 = vld [vmem:[#allocation2 + $0x14] sm:$0x1]  ;;  %v432_v29 = vld [vmem:[#allocation2 + $0x10] sm:$0xe]  ;;  %v2891_v44 = vld [vmem:[%s3506_s1] sm:$0xff]   ;;  %v2255_v51 = vcombine.low %v566_v18, %v567_v42 }
  0x3f   : > { %v767_v54 = vrot.slane %v765_v45, 1  ;;  %2751 = vmatpush3.bf16.msra.mxu1 %v2866_v24  ;;  %v2888_v24 = vld [vmem:[%s3506_s1 + $0x8] sm:$0xff]   ;;  %v433_v33 = vld [vmem:[#allocation2 + $0x18] sm:$0xe]  ;;  %v2892_v45 = vld [vmem:[%s3506_s1 + $0x80] sm:$0xff]  }
  0x40   : > { %2623 = vmatpush3.bf16.msra.mxu0 %v2865_v23  ;;  %v770_v59 = vshrl.u32 %v2294_v49, 16  ;;  %v772_v60 = vshll.u32 %v2294_v49, 16  ;;  %v827_v63 = vrot.slane %v2302_v55, 1  ;;  %2752 = vmatprep.subr.bf16.mxu1 %v2882_v46  ;;  %v2248_v47 = vcombine.low %v433_v33, %v425_v19  ;;  %v2903_v18 = vld [vmem:[%s3506_s1 + $0x1f0] sm:$0xff]  }
  0x41   : > { %2624 = vmatprep.subr.bf16.mxu0 %v2871_v34  ;;  %v768_v4 = vor.u32 %v767_v54, %v763_v50  ;;  %v3248_v6 = vld [vmem:[#allocation2 + $0x38] sm:$0xf]  ;;  %v436_v42 = vld [vmem:[#allocation2 + $0x30] sm:$0xe] }
  0x42   : > { %v774_v5 = vrot.slane %v772_v60, 1  ;;  %v2279_v7 = vld [vmem:[#allocation2 + $0x3c] sm:$0x1]  ;;  %v2313_v11 = vcombine.low %v826_v52, %v827_v63  ;;  %v2287_v12 = vld [vmem:[#allocation2 + $0x38] sm:$0xe]  ;;  %v569_v55 = vrot.slane %v2248_v47, 1 }
  0x43   : > { %v2295_v13 = vcombine.low %v3248_v6, %v2279_v7  ;;  %v2303_v15 = vcombine.low %v2287_v12, %v2279_v7  ;;  %2753 = vmatpush3.bf16.msra.mxu1 %v2882_v46  ;;  %v3260_v21 = vld [vmem:[#allocation2 + $0x40] sm:$0xf]  ;;  %v2280_v22 = vld [vmem:[#allocation2 + $0x44] sm:$0x1]  ;;  %v2247_v46 = vcombine.low %v432_v29, %v424_v37  ;;  %v2895_v50 = vld [vmem:[%s3506_s1 + $0x1f8] sm:$0xff]  }
  0x44   : > { %2625 = vmatpush3.bf16.msra.mxu0 %v2873_v32  ;;  %v775_v14 = vor.u32 %v774_v5, %v770_v59  ;;  %2740 = vmatprep.mubr.bf16.mxu1 %v2313_v11  ;;  %v2288_v23 = vld [vmem:[#allocation2 + $0x40] sm:$0xe]  ;;  %v2296_v26 = vcombine.low %v3260_v21, %v2280_v22  ;;  %v491_v32 = vor.u32 %v490_v9, %v486_v61  ;;  %v3278_v52 = vld [vmem:[#allocation2 + $0x10] sm:$0xf]  ;;  %v3294_v9 = vld [vmem:[#allocation2 + $0x28] sm:$0xf] }
  0x45   : > { %2626 = vmatprep.subr.bf16.mxu0 %v2883_v53  ;;  %2754 = vmatprep.subr.bf16.mxu1 %v2885_v56  ;;  %v2304_v27 = vcombine.low %v2288_v23, %v2280_v22  ;;  %v828_v30 = vrot.slane %v2303_v15, 1  ;;  %v777_v34 = vshrl.u32 %v2295_v13, 16  ;;  %v779_v35 = vshll.u32 %v2295_v13, 16  ;;  %v426_v12 = vld [vmem:[#allocation2 + $0x24] sm:$0x1] }
  0x46   : > { %v2312_v25 = vcombine.low %v768_v4, %v775_v14  ;;  %v784_v40 = vshrl.u32 %v2296_v26, 16  ;;  %v786_v41 = vshll.u32 %v2296_v26, 16  ;;  %v568_v54 = vrot.slane %v2247_v46, 1  ;;  %v427_v13 = vld [vmem:[#allocation2 + $0x2c] sm:$0x1] }
  0x47   : > { %v829_v39 = vrot.slane %v2304_v27, 1  ;;  %v781_v43 = vrot.slane %v779_v35, 1  ;;  %2755 = vmatpush3.bf16.msra.mxu1 %v2885_v56  ;;  %v3280_v56 = vld [vmem:[#allocation2 + $0x18] sm:$0xf]  ;;  %v2239_v57 = vcombine.low %v3278_v52, %v424_v37  ;;  %v2314_v60 = vcombine.low %v3248_v6, %v3260_v21  ;;  %v2905_v6 = vld [vmem:[%s3506_s1 + $0x230] sm:$0xff]  }
  0x48   : > { %2627 = vmatpush3.bf16.msra.mxu0 %v2884_v0  ;;  %1115 = vmatprep.mubr.bf16.mxu0 %v2312_v25  ;;  %v788_v49 = vrot.slane %v786_v41, 1  ;;  %v2240_v59 = vcombine.low %v3280_v56, %v425_v19  ;;  %v2254_v61 = vcombine.low %v484_v36, %v491_v32  ;;  %v2900_v0 = vld [vmem:[%s3506_s1 + $0x238] sm:$0xff]   ;;  %v2258_v5 = vcombine.low %v568_v54, %v569_v55  ;;  %v435_v23 = vld [vmem:[#allocation2 + $0x28] sm:$0xe]  ;;  %v3315_v29 = vld [vmem:[#allocation2 + $0x30] sm:$0xf] }
  0x49   : > { %2628 = vmatprep.subr.bf16.mxu0 %v2886_v8  ;;  %1116 = vmatmul.mubr.bf16.gmra.mxu0 %v2311_v20  ;;  %v2316_v48 = vcombine.low %v828_v30, %v829_v39  ;;  %v782_v53 = vor.u32 %v781_v43, %v777_v34  ;;  %v495_v62 = vshll.u32 %v2239_v57, 16  ;;  %v493_v1 = vshrl.u32 %v2239_v57, 16  ;;  %v3292_v8 = vld [vmem:[#allocation2 + $0x20] sm:$0xf]  ;;  %v2904_v30 = vld [vmem:[%s3506_s1 + $0x1b0] sm:$0xff]   ;;  %v2908_v32 = vld [vmem:[%s3506_s1 + $0x1e8] sm:$0xff]  }
  0x4a   : > { %2756 = vmatprep.subr.bf16.mxu1 %v2889_v16  ;;  %v789_v58 = vor.u32 %v788_v49, %v784_v40  ;;  %v500_v2 = vshrl.u32 %v2240_v59, 16  ;;  %v502_v3 = vshll.u32 %v2240_v59, 16  ;;  %v2241_v14 = vcombine.low %v3292_v8, %v426_v12  ;;  %v3317_v33 = vld [vmem:[#allocation2 + $0x38] sm:$0xf]  ;;  %v428_v40 = vld [vmem:[#allocation2 + $0x34] sm:$0x1] }
  0x4b   : > { %2741 = vmatmul.mubr.bf16.gmra.mxu1 %v2316_v48  ;;  %v497_v4 = vrot.slane %v495_v62, 1  ;;  %v2242_v15 = vcombine.low %v3294_v9, %v427_v13  ;;  %v2250_v27 = vcombine.low %v435_v23, %v427_v13  ;;  %v429_v41 = vld [vmem:[#allocation2 + $0x3c] sm:$0x1]  ;;  %v437_v43 = vld [vmem:[#allocation2 + $0x38] sm:$0xe]  ;;  %v2251_v47 = vcombine.low %v436_v42, %v428_v40  ;;  %v2910_v48 = vld [vmem:[%s3506_s1 + $0x1a8] sm:$0xff]  }
  0x4c   : > { %2629 = vmatpush3.bf16.msra.mxu0 %v2888_v24  ;;  %2757 = vmatpush3.bf16.msra.mxu1 %v2889_v16  ;;  %v2315_v63 = vcombine.low %v782_v53, %v789_v58  ;;  %v504_v7 = vrot.slane %v502_v3, 1  ;;  %v2253_v16 = vcombine.low %v3213_v28, %v3215_v38  ;;  %v507_v37 = vshrl.u32 %v2241_v14, 16  ;;  %v2911_v28 = vld [vmem:[%s3506_s1 + $0x228] sm:$0xff]   ;;  %v434_v38 = vld [vmem:[#allocation2 + $0x20] sm:$0xe]  ;;  %v2917_v3 = vld [vmem:[%s3506_s1 + $0x1d8] sm:$0xff]  }
  0x4d   : > { %2630 = vmatprep.subr.bf16.mxu0 %v2890_v31  ;;  %2760 = vmatprep.mubr.bf16.mxu1 %v2255_v51  ;;  %v498_v10 = vor.u32 %v497_v4, %v493_v1  ;;  %v509_v19 = vshll.u32 %v2241_v14, 16  ;;  %v514_v20 = vshrl.u32 %v2242_v15, 16  ;;  %v516_v21 = vshll.u32 %v2242_v15, 16  ;;  %v2914_v31 = vld [vmem:[%s3506_s1 + $0x220] sm:$0xff]   ;;  %v3344_v4 = vld [vmem:[#allocation2 + $0x10] sm:$0xf] }
  0x4e   : > { %2758 = vmatprep.subr.bf16.mxu1 %v2892_v45  ;;  %1123 = vmatprep.mubr.bf16.mxu0 %v2315_v63  ;;  %v505_v11 = vor.u32 %v504_v7, %v500_v2  ;;  %v2249_v26 = vcombine.low %v434_v38, %v426_v12  ;;  %v571_v39 = vrot.slane %v2250_v27, 1  ;;  %v2252_v49 = vcombine.low %v437_v43, %v429_v41  ;;  %v2912_v53 = vld [vmem:[%s3506_s1 + $0x1e0] sm:$0xff]   ;;  %v2421_v7 = vld [vmem:[#allocation2 + $0x14] sm:$0x1]  ;;  %v2933_v14 = vld [vmem:[%s3506_s1 + $0x208] sm:$0xff]  }
  0x4f   : > { %v511_v24 = vrot.slane %v509_v19, 1  ;;  %v518_v25 = vrot.slane %v516_v21, 1  ;;  %v2256_v51 = vcombine.low %v3278_v52, %v3280_v56  ;;  %v572_v55 = vrot.slane %v2251_v47, 1  ;;  %v2920_v52 = vld [vmem:[%s3506_s1 + $0x218] sm:$0xff]   ;;  %v2913_v63 = vld [vmem:[%s3506_s1 + $0x1a0] sm:$0xff]   ;;  %v2923_v13 = vld [vmem:[%s3506_s1 + $0x1d0] sm:$0xff]  }
  0x50   : > { %2631 = vmatpush3.bf16.msra.mxu0 %v2891_v44  ;;  %2759 = vmatpush3.bf16.msra.mxu1 %v2892_v45  ;;  %v2257_v22 = vcombine.low %v498_v10, %v505_v11  ;;  %v570_v36 = vrot.slane %v2249_v26, 1  ;;  %v2243_v44 = vcombine.low %v3315_v29, %v428_v40  ;;  %v2244_v45 = vcombine.low %v3317_v33, %v429_v41  ;;  %v2422_v10 = vld [vmem:[#allocation2 + $0x1c] sm:$0x1]  ;;  %v2429_v11 = vld [vmem:[#allocation2 + $0x10] sm:$0xe] }
  0x51   : > { %2668 = vmatprep.subr.bf16.mxu0 %v2895_v50  ;;  %1124 = vmatmul.mubr.bf16.gmra.mxu0 %v2314_v60  ;;  %v512_v34 = vor.u32 %v511_v24, %v507_v37  ;;  %v519_v35 = vor.u32 %v518_v25, %v514_v20  ;;  %v573_v58 = vrot.slane %v2252_v49, 1  ;;  %v2259_v12 = vcombine.low %v3292_v8, %v3294_v9  ;;  %v2423_v37 = vld [vmem:[#allocation2 + $0x24] sm:$0x1]  ;;  %v2424_v19 = vld [vmem:[#allocation2 + $0x2c] sm:$0x1] }
  0x52   : > { %1373 = vmatprep.mubr.bf16.mxu0 %v2254_v61  ;;  %2768 = vmatprep.subr.bf16.mxu1 %v2900_v0  ;;  %v2261_v46 = vcombine.low %v570_v36, %v571_v39  ;;  %v523_v50 = vshll.u32 %v2243_v44, 16  ;;  %v530_v57 = vshll.u32 %v2244_v45, 16  ;;  %v521_v59 = vshrl.u32 %v2243_v44, 16  ;;  %v2431_v20 = vld [vmem:[#allocation2 + $0x20] sm:$0xe] }
  0x53   : > { %2761 = vmatmul.mubr.bf16.vlgmr.msra.gmra.mxu1 %v2258_v5  ;;  %v2260_v54 = vcombine.low %v512_v34, %v519_v35  ;;  %v528_v61 = vshrl.u32 %v2244_v45, 16  ;;  %v2264_v62 = vcombine.low %v572_v55, %v573_v58  ;;  %v3346_v5 = vld [vmem:[#allocation2 + $0x18] sm:$0xf]  ;;  %v2437_v15 = vcombine.low %v3344_v4, %v2421_v7  ;;  %v2432_v21 = vld [vmem:[#allocation2 + $0x28] sm:$0xe]  ;;  %v2928_v34 = vld [vmem:[%s3506_s1 + $0x190] sm:$0xff]  }
  0x54   : > { %2769 = vmatpush3.bf16.msra.mxu1 %v2900_v0  ;;  %2764 = vmatprep.mubr.bf16.mxu1 %v2261_v46  ;;  %v525_v60 = vrot.slane %v523_v50, 1  ;;  %v532_v56 = vrot.slane %v530_v57, 1  ;;  %v2929_v0 = vld [vmem:[%s3506_s1 + $0x210] sm:$0xff]   ;;  %v3363_v25 = vld [vmem:[#allocation2 + $0x28] sm:$0xf]  ;;  %v2936_v35 = vld [vmem:[%s3506_s1 + $0x200] sm:$0xff]   ;;  %v2262_v47 = vcombine.low %v3315_v29, %v3317_v33 }
  0x55   : > { %2770 = vmatprep.subr.bf16.mxu1 %v2905_v6  ;;  %v1542_v38 = vshll.u32 %v2437_v15, 16  ;;  %v2440_v41 = vcombine.low %v3363_v25, %v2424_v19  ;;  %v3373_v42 = vld [vmem:[#allocation2 + $0x30] sm:$0xf]  ;;  %v3375_v44 = vld [vmem:[#allocation2 + $0x38] sm:$0xf]  ;;  %v2930_v46 = vld [vmem:[%s3506_s1 + $0x1c8] sm:$0xff]  }
  0x56   : > { %v526_v1 = vor.u32 %v525_v60, %v521_v59  ;;  %v533_v2 = vor.u32 %v532_v56, %v528_v61  ;;  %v2425_v45 = vld [vmem:[#allocation2 + $0x34] sm:$0x1]  ;;  %v2932_v59 = vld [vmem:[%s3506_s1 + $0x188] sm:$0xff]  }
  0x57   : > { %v1544_v36 = vrot.slane %v1542_v38, 1  ;;  %v1563_v58 = vshll.u32 %v2440_v41, 16  ;;  %v1561_v61 = vshrl.u32 %v2440_v41, 16  ;;  %v2441_v29 = vcombine.low %v3373_v42, %v2425_v45 }
  0x58   : > { %2771 = vmatpush3.bf16.msra.mxu1 %v2905_v6  ;;  %v2919_v6 = vld [vmem:[%s3506_s1 + $0x198] sm:$0xff]   ;;  %v2263_v8 = vcombine.low %v526_v1, %v533_v2  ;;  %v2435_v1 = vld [vmem:[#allocation2 + $0x40] sm:$0xe] }
  0x59   : > { %1374 = vmatmul.mubr.bf16.vlgmr.msra.gmra.mxu0 %v2253_v16  ;;  %2772 = vmatprep.subr.bf16.mxu1 %v2911_v28  ;;  %v2438_v16 = vcombine.low %v3346_v5, %v2422_v10  ;;  %v1565_v56 = vrot.slane %v1563_v58, 1  ;;  %v2934_v2 = vld [vmem:[%s3506_s1 + $0x1c0] sm:$0xff]  }
  0x5a   : > { %2669 = vmatpush3.bf16.msra.mxu0 %v2897_v17  ;;  %1381 = vmatprep.mubr.bf16.mxu0 %v2257_v22  ;;  %v2430_v17 = vld [vmem:[#allocation2 + $0x18] sm:$0xe]  ;;  %v3361_v22 = vld [vmem:[#allocation2 + $0x20] sm:$0xf] }
  0x5b   : > { %2670 = vmatprep.subr.bf16.mxu0 %v2903_v18  ;;  %2765 = vmatmul.mubr.bf16.gmra.mxu1 %v2264_v62  ;;  %v2445_v18 = vcombine.low %v2429_v11, %v2421_v7  ;;  %v2446_v9 = vcombine.low %v2430_v17, %v2422_v10  ;;  %v1547_v23 = vshrl.u32 %v2438_v16, 16  ;;  %v1549_v24 = vshll.u32 %v2438_v16, 16  ;;  %v2428_v10 = vld [vmem:[#allocation2 + $0x4c] sm:$0x1]  ;;  %v2436_v11 = vld [vmem:[#allocation2 + $0x48] sm:$0xe] }
  0x5c   : > { %2773 = vmatpush3.bf16.msra.mxu1 %v2911_v28  ;;  %v1540_v28 = vshrl.u32 %v2437_v15, 16  ;;  %v2439_v40 = vcombine.low %v3361_v22, %v2423_v37  ;;  %v1566_v16 = vor.u32 %v1565_v56, %v1561_v61 }
  0x5d   : > { %2774 = vmatprep.subr.bf16.mxu1 %v2914_v31  ;;  %v1627_v26 = vrot.slane %v2445_v18, 1  ;;  %v1628_v27 = vrot.slane %v2446_v9, 1  ;;  %v1551_v39 = vrot.slane %v1549_v24, 1  ;;  %v2453_v9 = vcombine.low %v3344_v4, %v3346_v5 }
  0x5e   : > { %2671 = vmatpush3.bf16.msra.mxu0 %v2904_v30  ;;  %v2447_v30 = vcombine.low %v2431_v20, %v2423_v37  ;;  %v1556_v50 = vshll.u32 %v2439_v40, 16  ;;  %v1554_v57 = vshrl.u32 %v2439_v40, 16  ;;  %v2419_v37 = vld [vmem:[#allocation2 + $0x40] sm:$0xf]  ;;  %v2456_v4 = vcombine.low %v3361_v22, %v3363_v25 }
  0x5f   : > { %2672 = vmatprep.subr.bf16.mxu0 %v2908_v32  ;;  %v2455_v43 = vcombine.low %v1627_v26, %v1628_v27  ;;  %v2433_v32 = vld [vmem:[#allocation2 + $0x30] sm:$0xe]  ;;  %v1552_v49 = vor.u32 %v1551_v39, %v1547_v23 }
  0x60   : > { %2775 = vmatpush3.bf16.msra.mxu1 %v2914_v31  ;;  %v2448_v31 = vcombine.low %v2432_v21, %v2424_v19  ;;  %v2449_v33 = vcombine.low %v2433_v32, %v2425_v45  ;;  %v2420_v19 = vld [vmem:[#allocation2 + $0x48] sm:$0xf]  ;;  %v1568_v21 = vshrl.u32 %v2441_v29, 16 }
  0x61   : > { %1382 = vmatmul.mubr.bf16.gmra.mxu0 %v2256_v51  ;;  %2776 = vmatprep.subr.bf16.mxu1 %v2920_v52  ;;  %v2426_v51 = vld [vmem:[#allocation2 + $0x3c] sm:$0x1] }
  0x62   : > { %2673 = vmatpush3.bf16.msra.mxu0 %v2910_v48  ;;  %1389 = vmatprep.mubr.bf16.mxu0 %v2260_v54  ;;  %v1545_v48 = vor.u32 %v1544_v36, %v1540_v28  ;;  %v1629_v54 = vrot.slane %v2447_v30, 1  ;;  %v1630_v55 = vrot.slane %v2448_v31, 1  ;;  %v2442_v62 = vcombine.low %v3375_v44, %v2426_v51 }
  0x63   : > { %2674 = vmatprep.subr.bf16.mxu0 %v2912_v53  ;;  %v2434_v53 = vld [vmem:[#allocation2 + $0x38] sm:$0xe]  ;;  %2784 = vmatprep.mubr.bf16.mxu1 %v2455_v43  ;;  %v2444_v30 = vcombine.low %v2420_v19, %v2428_v10 }
  0x64   : > { %2777 = vmatpush3.bf16.msra.mxu1 %v2920_v52  ;;  %v2454_v60 = vcombine.low %v1545_v48, %v1552_v49  ;;  %v1558_v52 = vrot.slane %v1556_v50, 1  ;;  %v1577_v17 = vshll.u32 %v2442_v62, 16  ;;  %v1575_v38 = vshrl.u32 %v2442_v62, 16 }
  0x65   : > { %2778 = vmatprep.subr.bf16.mxu1 %v2929_v0  ;;  %v1591_v39 = vshll.u32 %v2444_v30, 16  ;;  %v1589_v43 = vshrl.u32 %v2444_v30, 16  ;;  %v2462_v49 = vcombine.low %v2419_v37, %v2420_v19 }
  0x66   : > { %2675 = vmatpush3.bf16.msra.mxu0 %v2913_v63  ;;  %v2450_v63 = vcombine.low %v2434_v53, %v2426_v51  ;;  %v1559_v15 = vor.u32 %v1558_v52, %v1554_v57  ;;  %v1579_v26 = vrot.slane %v1577_v17, 1 }
  0x67   : > { %2676 = vmatprep.subr.bf16.mxu0 %v2917_v3  ;;  %v1631_v3 = vrot.slane %v2449_v33, 1  ;;  %v1593_v45 = vrot.slane %v1591_v39, 1 }
  0x68   : > { %2779 = vmatpush3.bf16.msra.mxu1 %v2929_v0  ;;  %v2427_v0 = vld [vmem:[#allocation2 + $0x44] sm:$0x1]  ;;  %v1632_v7 = vrot.slane %v2450_v63, 1  ;;  %v2457_v24 = vcombine.low %v1559_v15, %v1566_v16 }
  0x69   : > { %1390 = vmatmul.mubr.bf16.gmra.mxu0 %v2259_v12  ;;  %2780 = vmatprep.subr.bf16.mxu1 %v2933_v14  ;;  %v1570_v12 = vshll.u32 %v2441_v29, 16  ;;  %v2443_v27 = vcombine.low %v2419_v37, %v2427_v0 }
  0x6a   : > { %2677 = vmatpush3.bf16.msra.mxu0 %v2919_v6  ;;  %1397 = vmatprep.mubr.bf16.mxu0 %v2263_v8  ;;  %v2458_v6 = vcombine.low %v1629_v54, %v1630_v55  ;;  %v2461_v18 = vcombine.low %v1631_v3, %v1632_v7  ;;  %v2452_v8 = vcombine.low %v2436_v11, %v2428_v10 }
  0x6b   : > { %2678 = vmatprep.subr.bf16.mxu0 %v2923_v13  ;;  %v2451_v13 = vcombine.low %v2435_v1, %v2427_v0  ;;  %v1572_v28 = vrot.slane %v1570_v12, 1  ;;  %v1584_v36 = vshll.u32 %v2443_v27, 16  ;;  %v1582_v5 = vshrl.u32 %v2443_v27, 16 }
  0x6c   : > { %2781 = vmatpush3.bf16.msra.mxu1 %v2933_v14  ;;  %v2935_v14 = vld [vmem:[%s3506_s1 + $0x180] sm:$0xff]   ;;  %v1634_v23 = vrot.slane %v2452_v8, 1 }
  0x6d   : > { %2782 = vmatprep.subr.bf16.mxu1 %v2936_v35  ;;  %v1633_v20 = vrot.slane %v2451_v13, 1  ;;  %v1586_v41 = vrot.slane %v1584_v36, 1 }
  0x6e   : > { %2679 = vmatpush3.bf16.msra.mxu0 %v2928_v34  ;;  %v1573_v34 = vor.u32 %v1572_v28, %v1568_v21 }
  0x6f   : > { %2680 = vmatprep.subr.bf16.mxu0 %v2930_v46  ;;  %v2464_v31 = vcombine.low %v1633_v20, %v1634_v23  ;;  %v1587_v32 = vor.u32 %v1586_v41, %v1582_v5  ;;  %v1594_v46 = vor.u32 %v1593_v45, %v1589_v43 }
  0x70   : > { %2783 = vmatpush3.bf16.msra.mxu1 %v2936_v35  ;;  %v1580_v35 = vor.u32 %v1579_v26, %v1575_v38 }
  0x71   : > { %1398 = vmatmul.mubr.bf16.gmra.mxu0 %v2262_v47  ;;  %v2459_v47 = vcombine.low %v3373_v42, %v3375_v44  ;;  %v2463_v48 = vcombine.low %v1587_v32, %v1594_v46 }
  0x72   : > { %2681 = vmatpush3.bf16.msra.mxu0 %v2932_v59  ;;  %1904 = vmatprep.mubr.bf16.mxu0 %v2454_v60  ;;  %v2460_v40 = vcombine.low %v1573_v34, %v1580_v35 }
  0x73   : > { %2682 = vmatprep.subr.bf16.mxu0 %v2934_v2  ;;  %2785 = vmatmul.mubr.bf16.vlgmr.msra.gmra.mxu1 %v2458_v6 }
  0x74   : > { %2788 = vmatprep.mubr.bf16.mxu1 %v2461_v18 }
  0x76   : > { %2683 = vmatpush3.bf16.msra.mxu0 %v2935_v14 }
  0x79   : > { %1905 = vmatmul.mubr.bf16.vlgmr.msra.gmra.mxu0 %v2453_v9 }
  0x7a   : > { %1912 = vmatprep.mubr.bf16.mxu0 %v2457_v24 }
  0x7b   : > { %2789 = vmatmul.mubr.bf16.gmra.mxu1 %v2464_v31 }
  0x81   : > { %1913 = vmatmul.mubr.bf16.gmra.mxu0 %v2456_v4 }
  0x82   : > { %1920 = vmatprep.mubr.bf16.mxu0 %v2460_v40 }
  0x89   : > { %1921 = vmatmul.mubr.bf16.gmra.mxu0 %v2459_v47 }
  0x8a   : > { %1928 = vmatprep.mubr.bf16.mxu0 %v2463_v48 }
  0x91   : > { %1929 = vmatmul.mubr.bf16.gmra.mxu0 %v2462_v49 }
  0xf2   : > { %v2738_v58 = vpop.f32.mrf.mxu1 }
  0xf3   : > { %v2580_v50 = vpop.f32.mrf.mxu0 }
  0xf4   : > { %v1166_v60 = vpop.f32.mrf.mxu1 }
  0xf5   : > { %v2581_v51 = vpop.f32.mrf.mxu0 }
  0xf6   : > { %v2582_v22 = vadd.f32 %v2581_v51, %v2580_v50  ;;  %v3399_v29 = vpop.f32.mrf.mxu1 }
  0xf7   : > { %v2583_v25 = vpop.f32.mrf.mxu0 }
  0xf8   : > { %v1169_v44 = vpop.f32.mrf.mxu1  ;;  %v1167_v32 = vadd.f32 %v2582_v22, %v1166_v60 }
  0xf9   : > { %v2584_v53 = vpop.f32.mrf.mxu0 }
  0xfa   : > { %v2585_v4 = vadd.f32 %v2584_v53, %v2583_v25 }
  0xfb   : > { %v2586_v54 = vpop.f32.mrf.mxu0 }
  0xfc   : > { %v1170_v46 = vadd.f32 %v2585_v4, %v1169_v44 }
  0xfd   : > { %v2587_v55 = vpop.f32.mrf.mxu0 }
  0xfe   : > { %v2588_v57 = vadd.f32 %v2587_v55, %v2586_v54 }
  0xff   : > { %v2589_v59 = vpop.f32.mrf.mxu0 }
 0x100   : > { %v1175_v54 = vadd.f32 %v2738_v58, %v2588_v57 }
 0x101   : > { %v2590_v61 = vpop.f32.mrf.mxu0 }
 0x109   : > { %v2592_v42 = vpop.f32.mrf.mxu0 }
 0x10b   : > { %v2593_v33 = vpop.f32.mrf.mxu0  ;;  %v3403_v56 = vpop.f32.mrf.mxu1 }
 0x10c   : > { %v3401_v52 = vadd.f32 %v2593_v33, %v2592_v42  ;;  %v2591_v33 = vadd.f32 %v2590_v61, %v2589_v59 }
 0x10d   : > { %v3405_v62 = vpop.f32.mrf.mxu0  ;;  %v3407_v63 = vpop.f32.mrf.mxu1 }
 0x10e   : > { %v1178_v60 = vadd.f32 %v3399_v29, %v2591_v33 }
 0x10f   : > { %v3409_v0 = vpop.f32.mrf.mxu0  ;;  %v3413_v2 = vpop.f32.mrf.mxu1 }
 0x111   : > { %v3411_v1 = vpop.f32.mrf.mxu0  ;;  %v3419_v7 = vpop.f32.mrf.mxu1 }
 0x113   : > { %v3415_v3 = vpop.f32.mrf.mxu0  ;;  %v2762_v11 = vpop.f32.mrf.mxu1 }
 0x115   : > { %v3417_v6 = vpop.f32.mrf.mxu0  ;;  %v1440_v14 = vpop.f32.mrf.mxu1 }
 0x117   : > { %v3421_v10 = vpop.f32.mrf.mxu0  ;;  %v3423_v17 = vpop.f32.mrf.mxu1 }
 0x119   : > { %v2632_v12 = vpop.f32.mrf.mxu0  ;;  %v1443_v19 = vpop.f32.mrf.mxu1 }
 0x11b   : > { %v2633_v13 = vpop.f32.mrf.mxu0  ;;  %v3425_v9 = vpop.f32.mrf.mxu1 }
 0x11c   : > { %3513 = vst [vmem:[#allocation3_spill] sm:$0xff] %v3425_v9  ;;  %v2634_v40 = vadd.f32 %v2633_v13, %v2632_v12 }
 0x11d   : > { %v2635_v15 = vpop.f32.mrf.mxu0  ;;  %v3427_v28 = vpop.f32.mrf.mxu1 }
 0x11e   : > { %v1376_v50 = vadd.f32 %v2634_v40, %v1167_v32 }
 0x11f   : > { %v2636_v16 = vpop.f32.mrf.mxu0  ;;  %v3429_v24 = vpop.f32.mrf.mxu1 }
 0x120   : > { %3514 = vst [vmem:[#allocation4_spill] sm:$0xff] %v3429_v24  ;;  %v2637_v41 = vadd.f32 %v2636_v16, %v2635_v15  ;;  %v1441_v12 = vadd.f32 %v1440_v14, %v1376_v50 }
 0x121   : > { %v2638_v18 = vpop.f32.mrf.mxu0  ;;  %v3433_v30 = vpop.f32.mrf.mxu1 }
 0x122   : > { %v1379_v51 = vadd.f32 %v2637_v41, %v1170_v46 }
 0x123   : > { %v2639_v37 = vpop.f32.mrf.mxu0 }
 0x124   : > { %v2640_v48 = vadd.f32 %v2639_v37, %v2638_v18  ;;  %v1444_v13 = vadd.f32 %v1443_v19, %v1379_v51 }
 0x125   : > { %v2641_v8 = vpop.f32.mrf.mxu0 }
 0x126   : > { %v1384_v25 = vadd.f32 %v2640_v48, %v1175_v54 }
 0x127   : > { %v2642_v20 = vpop.f32.mrf.mxu0 }
 0x128   : > { %v2643_v15 = vadd.f32 %v2642_v20, %v2641_v8  ;;  %v1449_v58 = vadd.f32 %v2762_v11, %v1384_v25  ;;  %v2597_v8 = vadd.f32 %v3409_v0, %v3405_v62  ;;  %v1183_v11 = vadd.f32 %v3401_v52, %v3407_v63 }
 0x129   : > { %v2644_v21 = vpop.f32.mrf.mxu0  ;;  %v2600_v52 = vadd.f32 %v3415_v3, %v3411_v1  ;;  %v2603_v1 = vadd.f32 %v3421_v10, %v3417_v6 }
 0x12a   : > { %v1387_v14 = vadd.f32 %v2643_v15, %v1178_v60  ;;  %v1186_v0 = vadd.f32 %v2597_v8, %v3419_v7 }
 0x12b   : > { %v2645_v38 = vpop.f32.mrf.mxu0  ;;  %v1191_v48 = vadd.f32 %v3403_v56, %v2600_v52  ;;  %v1194_v33 = vadd.f32 %v3413_v2, %v2603_v1 }
 0x12c   : > { %v2646_v37 = vadd.f32 %v2645_v38, %v2644_v21 }
 0x12d   : > { %v2647_v23 = vpop.f32.mrf.mxu0 }
 0x12f   : > { %v2648_v26 = vpop.f32.mrf.mxu0 }
 0x130   : > { %v2649_v4 = vadd.f32 %v2648_v26, %v2647_v23 }
 0x131   : > { %v3431_v27 = vpop.f32.mrf.mxu0 }
 0x132   : > { %v1395_v32 = vadd.f32 %v2649_v4, %v1186_v0 }
 0x133   : > { %v3435_v31 = vpop.f32.mrf.mxu0  ;;  %v2786_v34 = vpop.f32.mrf.mxu1 }
 0x134   : > { %v1460_v51 = vadd.f32 %v3433_v30, %v1395_v32 }
 0x135   : > { %v3437_v35 = vpop.f32.mrf.mxu0  ;;  %v1971_v39 = vpop.f32.mrf.mxu1 }
 0x137   : > { %v3439_v36 = vpop.f32.mrf.mxu0  ;;  %v2787_v45 = vpop.f32.mrf.mxu1 }
 0x139   : > { %v2684_v5 = vpop.f32.mrf.mxu0  ;;  %v1974_v42 = vpop.f32.mrf.mxu1 }
 0x13b   : > { %v2685_v43 = vpop.f32.mrf.mxu0  ;;  %v2790_v61 = vpop.f32.mrf.mxu1 }
 0x13c   : > { %v2686_v47 = vadd.f32 %v2685_v43, %v2684_v5  ;;  %v1452_v5 = vadd.f32 %v3423_v17, %v1387_v14  ;;  %v2652_v17 = vadd.f32 %v3435_v31, %v3431_v27  ;;  %v2655_v27 = vadd.f32 %v3439_v36, %v3437_v35  ;;  %v3516_v36 = vld [vmem:[#allocation4_spill] sm:$0xff] }
 0x13d   : > { %v2687_v49 = vpop.f32.mrf.mxu0  ;;  %v1987_v38 = vpop.f32.mrf.mxu1 }
 0x13e   : > { %v1972_v24 = vadd.f32 %v2686_v47, %v1971_v39 }
 0x13f   : > { %v2688_v55 = vpop.f32.mrf.mxu0  ;;  %v2791_v23 = vpop.f32.mrf.mxu1 }
 0x140   : > { %v2689_v9 = vadd.f32 %v2688_v55, %v2687_v49  ;;  %v3442_v44 = vadd.f32 %v1972_v24, %v1441_v12  ;;  %v1400_v55 = vadd.f32 %v2652_v17, %v1191_v48 }
 0x141   : > { %v2690_v53 = vpop.f32.mrf.mxu0  ;;  %v1990_v54 = vpop.f32.mrf.mxu1 }
 0x142   : > { %v1975_v16 = vadd.f32 %v2689_v9, %v1974_v42 }
 0x143   : > { %v2691_v22 = vpop.f32.mrf.mxu0 }
 0x144   : > { %v3444_v18 = vadd.f32 %v1975_v16, %v1444_v13  ;;  %v2692_v57 = vadd.f32 %v2691_v22, %v2690_v53  ;;  %v3515_v53 = vld [vmem:[#allocation3_spill] sm:$0xff]  ;;  %v1403_v13 = vadd.f32 %v2655_v27, %v1194_v33 }
 0x145   : > { %v2693_v59 = vpop.f32.mrf.mxu0  ;;  %v1465_v12 = vadd.f32 %v3515_v53, %v1400_v55 }
 0x146   : > { %v2544_v29 = vpack.c.bf16 %v3444_v18, %v3442_v44  ;;  %v1980_v19 = vadd.f32 %v2786_v34, %v2692_v57  ;;  %v2026_v20 = vadd.f32 %v3444_v18, %v3442_v44  ;;  %v1392_v34 = vadd.f32 %v2646_v37, %v1183_v11 }
 0x147   : > { %v2694_v9 = vpop.f32.mrf.mxu0  ;;  %v1468_v57 = vadd.f32 %v3516_v36, %v1403_v13 }
 0x148   : > { %2545 = vst [vmem:[%s3451_s6] sm:$0xff] %v2544_v29   ;;  %v3462_v24 = vadd.f32 %v1980_v19, %v1449_v58  ;;  %v2695_v39 = vadd.f32 %v2694_v9, %v2693_v59  ;;  %v1457_v26 = vadd.f32 %v3427_v28, %v1392_v34 }
 0x149   : > { %v2696_v21 = vpop.f32.mrf.mxu0 }
 0x14a   : > { %v2027_v40 = vadd.f32 %v2026_v20, %v3462_v24  ;;  %v1983_v62 = vadd.f32 %v2787_v45, %v2695_v39 }
 0x14b   : > { %v2697_v63 = vpop.f32.mrf.mxu0 }
 0x14c   : > { %v2005_v41 = vadd.f32 %v1983_v62, %v1452_v5  ;;  %v2698_v43 = vadd.f32 %v2697_v63, %v2696_v21 }
 0x14d   : > { %v2699_v46 = vpop.f32.mrf.mxu0 }
 0x14e   : > { %v2549_v47 = vpack.c.bf16 %v2005_v41, %v3462_v24  ;;  %v1988_v45 = vadd.f32 %v2698_v43, %v1987_v38  ;;  %v2028_v49 = vadd.f32 %v2027_v40, %v2005_v41 }
 0x14f   : > { %v2700_v7 = vpop.f32.mrf.mxu0 }
 0x150   : > { %2561 = vst [vmem:[%s3451_s6 + $0x8] sm:$0xff] %v2549_v47   ;;  %v2006_v3 = vadd.f32 %v1988_v45, %v1457_v26  ;;  %v2701_v50 = vadd.f32 %v2700_v7, %v2699_v46 }
 0x151   : > { %v2702_v28 = vpop.f32.mrf.mxu0 }
 0x152   : > { %v2029_v31 = vadd.f32 %v2028_v49, %v2006_v3  ;;  %v1991_v42 = vadd.f32 %v2701_v50, %v1990_v54 }
 0x153   : > { %v2703_v56 = vpop.f32.mrf.mxu0 }
 0x154   : > { %v2007_v25 = vadd.f32 %v1991_v42, %v1460_v51  ;;  %v2704_v6 = vadd.f32 %v2703_v56, %v2702_v28 }
 0x155   : > { %v2705_v10 = vpop.f32.mrf.mxu0 }
 0x156   : > { %v2554_v30 = vpack.c.bf16 %v2007_v25, %v2006_v3  ;;  %v1996_v15 = vadd.f32 %v2790_v61, %v2704_v6  ;;  %v2030_v22 = vadd.f32 %v2029_v31, %v2007_v25 }
 0x157   : > { %v2706_v16 = vpop.f32.mrf.mxu0 }
 0x158   : > { %2562 = vst [vmem:[%s3451_s6 + $0x10] sm:$0xff] %v2554_v30   ;;  %v2008_v60 = vadd.f32 %v1996_v15, %v1465_v12  ;;  %v2707_v35 = vadd.f32 %v2706_v16, %v2705_v10 }
 0x15a   : > { %v2031_v58 = vadd.f32 %v2030_v22, %v2008_v60  ;;  %v1999_v59 = vadd.f32 %v2791_v23, %v2707_v35 }
 0x15c   : > { %v2009_v2 = vadd.f32 %v1999_v59, %v1468_v57 }
 0x15e   : > { %v2559_v14 = vpack.c.bf16 %v2009_v2, %v2008_v60  ;;  %v2032_v37 = vadd.f32 %v2031_v58, %v2009_v2 }
 0x160   : > { %2563 = vst [vmem:[%s3451_s6 + $0x18] sm:$0xff] %v2559_v14   ;;  %v2033_v29 = vrot.slane %v2032_v37, 4 }
 0x162   : > { %v2034_v19 = vadd.f32 %v2033_v29, %v2032_v37 }
 0x164   : > { %v2035_v8 = vrot.slane %v2034_v19, 2 }
 0x166   : > { %v2036_v9 = vadd.f32 %v2035_v8, %v2034_v19 }
 0x168   : > { %v2037_v61 = vrot.slane %v2036_v9, 1 }
 0x16a   : > { %v2038_v11 = vadd.f32 %v2037_v61, %v2036_v9 }
 0x16c   : > { %v2039_v20 = vmul.f32 0.015625, %v2038_v11  ;;  %2069 = vst [vmem:[%s3489_s9] sm:$0x1] %v2038_v11 }
 0x16e   : > { %v2040_v39 = vsub.f32 %v3442_v44, %v2039_v20  ;;  %v2041_v4 = vsub.f32 %v3444_v18, %v2039_v20  ;;  %v2042_v21 = vsub.f32 %v3462_v24, %v2039_v20  ;;  %v2044_v38 = vsub.f32 %v2006_v3, %v2039_v20 }
 0x16f   : > { %v2046_v5 = vsub.f32 %v2008_v60, %v2039_v20  ;;  %v2043_v34 = vsub.f32 %v2005_v41, %v2039_v20  ;;  %v2045_v63 = vsub.f32 %v2007_v25, %v2039_v20  ;;  %v2047_v26 = vsub.f32 %v2009_v2, %v2039_v20 }
 0x170   : > { %v2048_v40 = vmul.f32 %v2040_v39, %v2040_v39  ;;  %v2049_v62 = vmul.f32 %v2041_v4, %v2041_v4  ;;  %v2050_v0 = vmul.f32 %v2042_v21, %v2042_v21  ;;  %v2052_v46 = vmul.f32 %v2044_v38, %v2044_v38 }
 0x171   : > { %v2051_v43 = vmul.f32 %v2043_v34, %v2043_v34  ;;  %v2053_v17 = vmul.f32 %v2045_v63, %v2045_v63  ;;  %v2054_v47 = vmul.f32 %v2046_v5, %v2046_v5  ;;  %v2055_v45 = vmul.f32 %v2047_v26, %v2047_v26 }
 0x172   : > { %v2056_v52 = vadd.f32 %v2049_v62, %v2048_v40 }
 0x174   : > { %v2057_v32 = vadd.f32 %v2056_v52, %v2050_v0 }
 0x176   : > { %v2058_v23 = vadd.f32 %v2057_v32, %v2051_v43 }
 0x178   : > { %v2059_v44 = vadd.f32 %v2058_v23, %v2052_v46 }
 0x17a   : > { %v2060_v18 = vadd.f32 %v2059_v44, %v2053_v17 }
 0x17c   : > { %v2061_v24 = vadd.f32 %v2060_v18, %v2054_v47 }
 0x17e   : > { %v2062_v48 = vadd.f32 %v2061_v24, %v2055_v45 }
 0x180   : > { %v2063_v7 = vrot.slane %v2062_v48, 4 }
 0x182   : > { %v2064_v41 = vadd.f32 %v2063_v7, %v2062_v48 }
 0x184   : > { %v2065_v1 = vrot.slane %v2064_v41, 2 }
 0x186   : > { %v2066_v3 = vadd.f32 %v2065_v1, %v2064_v41 }
 0x188   : > { %v2067_v49 = vrot.slane %v2066_v3, 1 }
 0x18a   : > { %v2068_v50 = vadd.f32 %v2067_v49, %v2066_v3 }
 0x18c   : > { %2070 = vst [vmem:[%s3489_s9 + $0x1] sm:$0x1] %v2068_v50 }
 0x18d PF: > { %s14_s14 = sadd.s32 1, %s2979_s14   ;;  %s3517_s12 = smov %s2975_s13 }
 0x18e   : > { %p11_p5 = scmp.ge.s32.totalorder %s14_s14, 4   ;;  %s3518_s13 = smov %s3520_s15 }
 0x190   :  { %13 = sbr.rel (!%p11_p5) target bundleno = 2 (0x2), region = 77 }

</bundles_post_ra>
